<compile_context>
chip_gen: v5e
topology: v5e:2x2
jax: 0.10.0
libtpu: 0.0.40
codegen_flags: <defaults>
</compile_context>

<pallas_src>
import functools
import math

import jax
import jax.numpy as jnp
from jax import lax
from jax.experimental import pallas as pl
from jax.experimental.pallas import tpu as pltpu

# ----------------------------- small synthetic config ------------------------
AUDIO_EMB = 32          # settings['data']['audio_emb_size']
D_MODEL   = 64          # lm_emb_size == bart_config.d_model (small synthetic BART)
N_HEADS   = 4
HEAD_DIM  = D_MODEL // N_HEADS
FFN_DIM   = 128
VOCAB     = 128
N_ENC     = 1
N_DEC     = 1
N_ADAPT   = 2           # settings['adapt']['nb_layers']
MAX_POS   = 64
EMBED_SCALE = math.sqrt(D_MODEL)   # bart embed_scale (scale_embedding=True)
LN_EPS    = 1e-5
NEG_INF   = -1e9
IGNORE_INDEX = -100     # HF CrossEntropyLoss default ignore_index
STATS_LANES = 128       # lane-dense loss-stats row: [0]=loss_sum, [1]=valid_cnt
# settings['lm']['token_conditioning'] = True, combine_tokens_audio = 'add'


# ------------------------------- helpers --------------------------------------
def _gelu(x):
    # tanh-approximate GELU.
    # TODO(synk): exact erf GELU if lax.erf lowering is available.
    return 0.5 * x * (1.0 + jnp.tanh(0.7978845608028654 * (x + 0.044715 * x * x * x)))


def _ln(x, g, b, eps):
    mu = jnp.mean(x, axis=-1, keepdims=True)
    var = jnp.mean((x - mu) * (x - mu), axis=-1, keepdims=True)
    return (x - mu) * lax.rsqrt(var + eps) * g + b


# --------------------------- the single fused kernel ---------------------------
def _bartaac_kernel(*refs, n_adapt, n_enc, n_dec, nheads, scale, eps, embed_scale):
    """Whole BARTAAC forward for one batch element (one grid step)."""
    it = iter(refs)
    nxt = lambda: next(it)

    # ---- per-batch data blocks ----
    audio_ref = nxt()        # (1, Te, A)
    cond_ref = nxt()         # (1, Te, 1) int32
    dec_ids_ref = nxt()      # (1, Td, 1) int32
    labels_ref = nxt()       # (1, Td, 1) int32
    enc_mask_ref = nxt()     # (1, 1, Te) f32 padding mask (1=keep)
    dec_mask_ref = nxt()     # (1, 1, Td) f32 padding mask

    # ---- shared weights (constant block index across the parallel grid) ----
    emb_ref = nxt()          # (V, D)  shared token embedding (natural layout)
    lbias_ref = nxt()        # (1, V)  final_logits_bias
    enc_pos_ref = nxt()      # (Te, D) learned positions (already offset by 2)
    dec_pos_ref = nxt()      # (Td, D)
    adapt = [(nxt(), nxt()) for _ in range(n_adapt)]
    enc_emb_ln = (nxt(), nxt())
    dec_emb_ln = (nxt(), nxt())
    enc_layers = []
    for _ in range(n_enc):
        enc_layers.append(dict(sa=[nxt() for _ in range(8)], sa_ln=(nxt(), nxt()),
                               fc1=(nxt(), nxt()), fc2=(nxt(), nxt()),
                               fln=(nxt(), nxt())))
    dec_layers = []
    for _ in range(n_dec):
        dec_layers.append(dict(sa=[nxt() for _ in range(8)], sa_ln=(nxt(), nxt()),
                               ca=[nxt() for _ in range(8)], ca_ln=(nxt(), nxt()),
                               fc1=(nxt(), nxt()), fc2=(nxt(), nxt()),
                               fln=(nxt(), nxt())))

    # ---- outputs ----
    logits_ref = nxt()       # (1, Td, V)
    stats_ref = nxt()        # (1, 1, STATS_LANES)

    V, D = emb_ref.shape
    Te = audio_ref.shape[1]
    Td = dec_ids_ref.shape[1]
    Dh = D // nheads

    emb = emb_ref[...].astype(jnp.float32)          # used 3x (enc/dec embed, LM head)

    # ----- audio adapter: Linear [-> ReLU -> Linear]* -----
    x = audio_ref[0].astype(jnp.float32)            # (Te, A)
    for li, (w, b) in enumerate(adapt):
        x = jnp.dot(x, w[...], preferred_element_type=jnp.float32) + b[...]
        if li < n_adapt - 1:                        # ReLU only between adapter linears
            x = jnp.maximum(x, 0.0)

    # ----- token embedding lookups via one-hot matmul (V=128, table is VMEM-resident) -----
    def embed_tokens(tok_ref, T):
        tok = tok_ref[0]                            # (T, 1) int32
        lane = lax.broadcasted_iota(jnp.int32, (T, V), 1)
        onehot = (lane == tok).astype(jnp.float32)  # (T, V)
        return jnp.dot(onehot, emb, preferred_element_type=jnp.float32) * embed_scale

    # ----- encoder input: audio + scaled cond-token embeds + positions, post-LN -----
    x = x + embed_tokens(cond_ref, Te) + enc_pos_ref[...]
    x = _ln(x, enc_emb_ln[0][...], enc_emb_ln[1][...], eps)

    # ----- additive masks, built in-kernel (never materialized in HBM) -----
    enc_add = (1.0 - enc_mask_ref[0].astype(jnp.float32)) * NEG_INF    # (1, Te)
    dec_pad = (1.0 - dec_mask_ref[0].astype(jnp.float32)) * NEG_INF    # (1, Td)
    qi = lax.broadcasted_iota(jnp.int32, (Td, Td), 0)
    ki = lax.broadcasted_iota(jnp.int32, (Td, Td), 1)
    dec_self_add = jnp.where(qi >= ki, 0.0, NEG_INF) + dec_pad         # (Td, Td)

    # ----- fused attention sublayer (proj -> per-head attn -> out proj -> res -> LN) -----
    def attn_block(xq, xkv, mask_add, wts, ln):
        wq, bq, wk, bk, wv, bv, wo, bo = wts
        q = (jnp.dot(xq, wq[...], preferred_element_type=jnp.float32) + bq[...]) * scale
        k = jnp.dot(xkv, wk[...], preferred_element_type=jnp.float32) + bk[...]
        v = jnp.dot(xkv, wv[...], preferred_element_type=jnp.float32) + bv[...]
        heads = []
        for h in range(nheads):
            sl = slice(h * Dh, (h + 1) * Dh)        # static Dh=16 lane slice
            s = lax.dot_general(q[:, sl], k[:, sl], (((1,), (1,)), ((), ())),
                                preferred_element_type=jnp.float32)    # (Tq, Tk)
            s = s + mask_add
            s = s - jnp.max(s, axis=-1, keepdims=True)
            p = jnp.exp(s)
            p = p * pl.reciprocal(jnp.sum(p, axis=-1, keepdims=True), approx=True)
            heads.append(jnp.dot(p, v[:, sl], preferred_element_type=jnp.float32))
        att = jnp.concatenate(heads, axis=-1)       # (Tq, D)
        o = jnp.dot(att, wo[...], preferred_element_type=jnp.float32) + bo[...]
        return _ln(xq + o, ln[0][...], ln[1][...], eps)

    # ----- fused FFN sublayer (fc1 + GELU -> fc2 -> residual -> LN) -----
    def ffn_block(xin, fc1, fc2, fln):
        h = jnp.dot(xin, fc1[0][...], preferred_element_type=jnp.float32) + fc1[1][...]
        h = _gelu(h)
        o = jnp.dot(h, fc2[0][...], preferred_element_type=jnp.float32) + fc2[1][...]
        return _ln(xin + o, fln[0][...], fln[1][...], eps)

    # ----- BART encoder (post-LN) -----
    for L in enc_layers:
        x = attn_block(x, x, enc_add, L['sa'], L['sa_ln'])
        x = ffn_block(x, L['fc1'], L['fc2'], L['fln'])
    enc_h = x

    # ----- BART decoder -----
    y = embed_tokens(dec_ids_ref, Td) + dec_pos_ref[...]
    y = _ln(y, dec_emb_ln[0][...], dec_emb_ln[1][...], eps)
    for L in dec_layers:
        y = attn_block(y, y, dec_self_add, L['sa'], L['sa_ln'])
        y = attn_block(y, enc_h, enc_add, L['ca'], L['ca_ln'])
        y = ffn_block(y, L['fc1'], L['fc2'], L['fln'])

    # ----- tied LM head (embedding in natural (V,D) layout, rhs-transposed contraction) -----
    logits = lax.dot_general(y, emb, (((1,), (1,)), ((), ())),
                             preferred_element_type=jnp.float32) + lbias_ref[...]
    logits_ref[0] = logits.astype(logits_ref.dtype)          # (Td, V), lane-dense

    # ----- cross-entropy (ignore_index=-100 aware), no (N,V) one-hot -----
    m = jnp.max(logits, axis=-1, keepdims=True)
    lse = jnp.log(jnp.sum(jnp.exp(logits - m), axis=-1, keepdims=True)) + m
    labels = labels_ref[0]                                   # (Td, 1) int32
    lane = lax.broadcasted_iota(jnp.int32, (Td, V), 1)
    tgt = jnp.sum(jnp.where(lane == labels, logits, 0.0), axis=-1, keepdims=True)
    valid = (labels >= 0).astype(jnp.float32)
    per_tok = (lse - tgt) * valid
    lsum = jnp.sum(per_tok, axis=0, keepdims=True)           # (1, 1)
    cnt = jnp.sum(valid, axis=0, keepdims=True)              # (1, 1)
    slane = lax.broadcasted_iota(jnp.int32, (1, STATS_LANES), 1)
    stats_ref[0] = jnp.where(slane == 0, lsum,
                             jnp.where(slane == 1, cnt, 0.0))


# ------------------------------- forward wrapper -------------------------------
def bart_aac_forward(p, audio_features, cond_tokens, attention_mask,
                     decoder_input_ids, decoder_attention_mask, labels):
    B, Te, _ = audio_features.shape
    Td = decoder_input_ids.shape[1]

    args, specs = [], []

    def add_batched(a, blk):
        args.append(a)
        specs.append(pl.BlockSpec(tuple(int(s) for s in blk), lambda b: (b, 0, 0)))

    def add_shared(a):
        a2 = a if a.ndim == 2 else a.reshape(1, -1)
        args.append(a2)
        shp = tuple(int(s) for s in a2.shape)
        specs.append(pl.BlockSpec(shp, lambda b, n=len(shp): (0,) * n))

    # per-batch data (sliced along the parallel grid axis)
    add_batched(audio_features.astype(jnp.float32), (1, Te, AUDIO_EMB))
    add_batched(cond_tokens.reshape(B, Te, 1).astype(jnp.int32), (1, Te, 1))
    add_batched(decoder_input_ids.reshape(B, Td, 1).astype(jnp.int32), (1, Td, 1))
    add_batched(labels.reshape(B, Td, 1).astype(jnp.int32), (1, Td, 1))
    add_batched(attention_mask.reshape(B, 1, Te).astype(jnp.float32), (1, 1, Te))
    add_batched(decoder_attention_mask.reshape(B, 1, Td).astype(jnp.float32), (1, 1, Td))

    # shared weights (full blocks, constant block index)
    add_shared(p['shared_emb'])                       # (V, D), natural layout (no .T)
    add_shared(p['final_logits_bias'])
    add_shared(p['enc_pos'][2:2 + Te])                # learned positions, offset 2
    add_shared(p['dec_pos'][2:2 + Td])
    for i in range(N_ADAPT):
        add_shared(p[f'adapt{i}_w']); add_shared(p[f'adapt{i}_b'])
    for n in ('enc_emb_ln_g', 'enc_emb_ln_b', 'dec_emb_ln_g', 'dec_emb_ln_b'):
        add_shared(p[n])
    for i in range(N_ENC):
        pre = f'enc{i}_'
        for n in ('sa_q', 'sa_k', 'sa_v', 'sa_o'):
            add_shared(p[pre + n + '_w']); add_shared(p[pre + n + '_b'])
        add_shared(p[pre + 'sa_ln_g']); add_shared(p[pre + 'sa_ln_b'])
        add_shared(p[pre + 'fc1_w']); add_shared(p[pre + 'fc1_b'])
        add_shared(p[pre + 'fc2_w']); add_shared(p[pre + 'fc2_b'])
        add_shared(p[pre + 'final_ln_g']); add_shared(p[pre + 'final_ln_b'])
    for i in range(N_DEC):
        pre = f'dec{i}_'
        for n in ('sa_q', 'sa_k', 'sa_v', 'sa_o'):
            add_shared(p[pre + n + '_w']); add_shared(p[pre + n + '_b'])
        add_shared(p[pre + 'sa_ln_g']); add_shared(p[pre + 'sa_ln_b'])
        for n in ('ca_q', 'ca_k', 'ca_v', 'ca_o'):
            add_shared(p[pre + n + '_w']); add_shared(p[pre + n + '_b'])
        add_shared(p[pre + 'ca_ln_g']); add_shared(p[pre + 'ca_ln_b'])
        add_shared(p[pre + 'fc1_w']); add_shared(p[pre + 'fc1_b'])
        add_shared(p[pre + 'fc2_w']); add_shared(p[pre + 'fc2_b'])
        add_shared(p[pre + 'final_ln_g']); add_shared(p[pre + 'final_ln_b'])

    out_shape = (jax.ShapeDtypeStruct((B, Td, VOCAB), jnp.float32),
                 jax.ShapeDtypeStruct((B, 1, STATS_LANES), jnp.float32))
    out_specs = (pl.BlockSpec((1, Td, VOCAB), lambda b: (b, 0, 0)),
                 pl.BlockSpec((1, 1, STATS_LANES), lambda b: (b, 0, 0)))

    logits, stats = pl.pallas_call(
        functools.partial(_bartaac_kernel, n_adapt=N_ADAPT, n_enc=N_ENC,
                          n_dec=N_DEC, nheads=N_HEADS, scale=HEAD_DIM ** -0.5,
                          eps=LN_EPS, embed_scale=EMBED_SCALE),
        out_shape=out_shape,
        grid=(B,),
        in_specs=specs,
        out_specs=out_specs,
        compiler_params=pltpu.CompilerParams(
            dimension_semantics=("parallel",)),      # v7x: one batch per TensorCore
    )(*args)

    # two floats of host-side work: combine per-batch loss sums / valid counts
    loss = jnp.sum(stats[:, 0, 0]) / jnp.maximum(jnp.sum(stats[:, 0, 1]), 1.0)
    return loss, logits


# ------------------------------- parameter init -------------------------------
def init_params(key):
    p = {}

    def nk():
        nonlocal key
        key, sub = jax.random.split(key)
        return sub

    def dense(name, din, dout):
        p[name + '_w'] = 0.02 * jax.random.normal(nk(), (din, dout), jnp.float32)
        p[name + '_b'] = jnp.zeros((dout,), jnp.float32)

    def ln(name, d):
        p[name + '_g'] = jnp.ones((d,), jnp.float32)
        p[name + '_b'] = jnp.zeros((d,), jnp.float32)

    # audio adapter
    dense('adapt0', AUDIO_EMB, D_MODEL)
    for i in range(1, N_ADAPT):
        dense(f'adapt{i}', D_MODEL, D_MODEL)

    # shared token embedding (tied LM head), positions, embedding layernorms
    p['shared_emb'] = 0.02 * jax.random.normal(nk(), (VOCAB, D_MODEL), jnp.float32)
    p['enc_pos'] = 0.02 * jax.random.normal(nk(), (MAX_POS + 2, D_MODEL), jnp.float32)
    p['dec_pos'] = 0.02 * jax.random.normal(nk(), (MAX_POS + 2, D_MODEL), jnp.float32)
    p['final_logits_bias'] = jnp.zeros((VOCAB,), jnp.float32)
    ln('enc_emb_ln', D_MODEL)
    ln('dec_emb_ln', D_MODEL)

    for i in range(N_ENC):
        pre = f'enc{i}_'
        for n in ('sa_q', 'sa_k', 'sa_v', 'sa_o'):
            dense(pre + n, D_MODEL, D_MODEL)
        ln(pre + 'sa_ln', D_MODEL)
        dense(pre + 'fc1', D_MODEL, FFN_DIM)
        dense(pre + 'fc2', FFN_DIM, D_MODEL)
        ln(pre + 'final_ln', D_MODEL)

    for i in range(N_DEC):
        pre = f'dec{i}_'
        for n in ('sa_q', 'sa_k', 'sa_v', 'sa_o',
                  'ca_q', 'ca_k', 'ca_v', 'ca_o'):
            dense(pre + n, D_MODEL, D_MODEL)
        ln(pre + 'sa_ln', D_MODEL)
        ln(pre + 'ca_ln', D_MODEL)
        dense(pre + 'fc1', D_MODEL, FFN_DIM)
        dense(pre + 'fc2', FFN_DIM, D_MODEL)
        ln(pre + 'final_ln', D_MODEL)
    return p


# ------------------------------------ main ------------------------------------
if __name__ == "__main__":
    key = jax.random.PRNGKey(0)
    pkey, k1, k2, k3, k4 = jax.random.split(key, 5)
    params = init_params(pkey)

    B, Te, Td = 2, 8, 8
    audio_features = jax.random.normal(k1, (B, Te, AUDIO_EMB), jnp.float32)
    cond_tokens = jax.random.randint(k2, (B, Te), 0, VOCAB)
    attention_mask = jnp.ones((B, Te), jnp.float32)
    decoder_input_ids = jax.random.randint(k3, (B, Td), 0, VOCAB)
    decoder_attention_mask = jnp.ones((B, Td), jnp.float32)
    labels = jax.random.randint(k4, (B, Td), 0, VOCAB)

    fwd = jax.jit(bart_aac_forward)
    loss, logits = fwd(params, audio_features, cond_tokens, attention_mask,
                       decoder_input_ids, decoder_attention_mask, labels)
    jax.block_until_ready((loss, logits))

    assert logits.shape == (B, Td, VOCAB)
    assert bool(jnp.isfinite(loss))
    print("KERNEL_OK")
</pallas_src>

<mosaic_0001>
module attributes {stable_mosaic.version = 11 : i64} {
  func.func @_bartaac_kernel(%arg0: i32, %arg1: memref<1x8x32xf32, #tpu.memory_space<vmem>>, %arg2: memref<1x8x1xi32, #tpu.memory_space<vmem>>, %arg3: memref<1x8x1xi32, #tpu.memory_space<vmem>>, %arg4: memref<1x8x1xi32, #tpu.memory_space<vmem>>, %arg5: memref<1x1x8xf32, #tpu.memory_space<vmem>>, %arg6: memref<1x1x8xf32, #tpu.memory_space<vmem>>, %arg7: memref<128x64xf32, #tpu.memory_space<vmem>>, %arg8: memref<1x128xf32, #tpu.memory_space<vmem>>, %arg9: memref<8x64xf32, #tpu.memory_space<vmem>>, %arg10: memref<8x64xf32, #tpu.memory_space<vmem>>, %arg11: memref<32x64xf32, #tpu.memory_space<vmem>>, %arg12: memref<1x64xf32, #tpu.memory_space<vmem>>, %arg13: memref<64x64xf32, #tpu.memory_space<vmem>>, %arg14: memref<1x64xf32, #tpu.memory_space<vmem>>, %arg15: memref<1x64xf32, #tpu.memory_space<vmem>>, %arg16: memref<1x64xf32, #tpu.memory_space<vmem>>, %arg17: memref<1x64xf32, #tpu.memory_space<vmem>>, %arg18: memref<1x64xf32, #tpu.memory_space<vmem>>, %arg19: memref<64x64xf32, #tpu.memory_space<vmem>>, %arg20: memref<1x64xf32, #tpu.memory_space<vmem>>, %arg21: memref<64x64xf32, #tpu.memory_space<vmem>>, %arg22: memref<1x64xf32, #tpu.memory_space<vmem>>, %arg23: memref<64x64xf32, #tpu.memory_space<vmem>>, %arg24: memref<1x64xf32, #tpu.memory_space<vmem>>, %arg25: memref<64x64xf32, #tpu.memory_space<vmem>>, %arg26: memref<1x64xf32, #tpu.memory_space<vmem>>, %arg27: memref<1x64xf32, #tpu.memory_space<vmem>>, %arg28: memref<1x64xf32, #tpu.memory_space<vmem>>, %arg29: memref<64x128xf32, #tpu.memory_space<vmem>>, %arg30: memref<1x128xf32, #tpu.memory_space<vmem>>, %arg31: memref<128x64xf32, #tpu.memory_space<vmem>>, %arg32: memref<1x64xf32, #tpu.memory_space<vmem>>, %arg33: memref<1x64xf32, #tpu.memory_space<vmem>>, %arg34: memref<1x64xf32, #tpu.memory_space<vmem>>, %arg35: memref<64x64xf32, #tpu.memory_space<vmem>>, %arg36: memref<1x64xf32, #tpu.memory_space<vmem>>, %arg37: memref<64x64xf32, #tpu.memory_space<vmem>>, %arg38: memref<1x64xf32, #tpu.memory_space<vmem>>, %arg39: memref<64x64xf32, #tpu.memory_space<vmem>>, %arg40: memref<1x64xf32, #tpu.memory_space<vmem>>, %arg41: memref<64x64xf32, #tpu.memory_space<vmem>>, %arg42: memref<1x64xf32, #tpu.memory_space<vmem>>, %arg43: memref<1x64xf32, #tpu.memory_space<vmem>>, %arg44: memref<1x64xf32, #tpu.memory_space<vmem>>, %arg45: memref<64x64xf32, #tpu.memory_space<vmem>>, %arg46: memref<1x64xf32, #tpu.memory_space<vmem>>, %arg47: memref<64x64xf32, #tpu.memory_space<vmem>>, %arg48: memref<1x64xf32, #tpu.memory_space<vmem>>, %arg49: memref<64x64xf32, #tpu.memory_space<vmem>>, %arg50: memref<1x64xf32, #tpu.memory_space<vmem>>, %arg51: memref<64x64xf32, #tpu.memory_space<vmem>>, %arg52: memref<1x64xf32, #tpu.memory_space<vmem>>, %arg53: memref<1x64xf32, #tpu.memory_space<vmem>>, %arg54: memref<1x64xf32, #tpu.memory_space<vmem>>, %arg55: memref<64x128xf32, #tpu.memory_space<vmem>>, %arg56: memref<1x128xf32, #tpu.memory_space<vmem>>, %arg57: memref<128x64xf32, #tpu.memory_space<vmem>>, %arg58: memref<1x64xf32, #tpu.memory_space<vmem>>, %arg59: memref<1x64xf32, #tpu.memory_space<vmem>>, %arg60: memref<1x64xf32, #tpu.memory_space<vmem>>, %arg61: memref<1x8x128xf32, #tpu.memory_space<vmem>>, %arg62: memref<1x1x128xf32, #tpu.memory_space<vmem>>) attributes {dimension_semantics = [#tpu.dimension_semantics<parallel>], iteration_bounds = array<i64: 2>, scalar_prefetch = 0 : i64, scratch_operands = 0 : i64, tpu.core_type = #tpu.core_type<tc>, window_params = [{transform_indices = @transform_0, window_bounds = array<i64: 1, 8, 32>}, {transform_indices = @transform_1, window_bounds = array<i64: 1, 8, 1>}, {transform_indices = @transform_2, window_bounds = array<i64: 1, 8, 1>}, {transform_indices = @transform_3, window_bounds = array<i64: 1, 8, 1>}, {transform_indices = @transform_4, window_bounds = array<i64: 1, 1, 8>}, {transform_indices = @transform_5, window_bounds = array<i64: 1, 1, 8>}, {pipeline_mode = #tpu.pipeline_mode<synchronous>, transform_indices = @transform_6, window_bounds = array<i64: 128, 64>}, {pipeline_mode = #tpu.pipeline_mode<synchronous>, transform_indices = @transform_7, window_bounds = array<i64: 1, 128>}, {pipeline_mode = #tpu.pipeline_mode<synchronous>, transform_indices = @transform_8, window_bounds = array<i64: 8, 64>}, {pipeline_mode = #tpu.pipeline_mode<synchronous>, transform_indices = @transform_9, window_bounds = array<i64: 8, 64>}, {pipeline_mode = #tpu.pipeline_mode<synchronous>, transform_indices = @transform_10, window_bounds = array<i64: 32, 64>}, {pipeline_mode = #tpu.pipeline_mode<synchronous>, transform_indices = @transform_11, window_bounds = array<i64: 1, 64>}, {pipeline_mode = #tpu.pipeline_mode<synchronous>, transform_indices = @transform_12, window_bounds = array<i64: 64, 64>}, {pipeline_mode = #tpu.pipeline_mode<synchronous>, transform_indices = @transform_13, window_bounds = array<i64: 1, 64>}, {pipeline_mode = #tpu.pipeline_mode<synchronous>, transform_indices = @transform_14, window_bounds = array<i64: 1, 64>}, {pipeline_mode = #tpu.pipeline_mode<synchronous>, transform_indices = @transform_15, window_bounds = array<i64: 1, 64>}, {pipeline_mode = #tpu.pipeline_mode<synchronous>, transform_indices = @transform_16, window_bounds = array<i64: 1, 64>}, {pipeline_mode = #tpu.pipeline_mode<synchronous>, transform_indices = @transform_17, window_bounds = array<i64: 1, 64>}, {pipeline_mode = #tpu.pipeline_mode<synchronous>, transform_indices = @transform_18, window_bounds = array<i64: 64, 64>}, {pipeline_mode = #tpu.pipeline_mode<synchronous>, transform_indices = @transform_19, window_bounds = array<i64: 1, 64>}, {pipeline_mode = #tpu.pipeline_mode<synchronous>, transform_indices = @transform_20, window_bounds = array<i64: 64, 64>}, {pipeline_mode = #tpu.pipeline_mode<synchronous>, transform_indices = @transform_21, window_bounds = array<i64: 1, 64>}, {pipeline_mode = #tpu.pipeline_mode<synchronous>, transform_indices = @transform_22, window_bounds = array<i64: 64, 64>}, {pipeline_mode = #tpu.pipeline_mode<synchronous>, transform_indices = @transform_23, window_bounds = array<i64: 1, 64>}, {pipeline_mode = #tpu.pipeline_mode<synchronous>, transform_indices = @transform_24, window_bounds = array<i64: 64, 64>}, {pipeline_mode = #tpu.pipeline_mode<synchronous>, transform_indices = @transform_25, window_bounds = array<i64: 1, 64>}, {pipeline_mode = #tpu.pipeline_mode<synchronous>, transform_indices = @transform_26, window_bounds = array<i64: 1, 64>}, {pipeline_mode = #tpu.pipeline_mode<synchronous>, transform_indices = @transform_27, window_bounds = array<i64: 1, 64>}, {pipeline_mode = #tpu.pipeline_mode<synchronous>, transform_indices = @transform_28, window_bounds = array<i64: 64, 128>}, {pipeline_mode = #tpu.pipeline_mode<synchronous>, transform_indices = @transform_29, window_bounds = array<i64: 1, 128>}, {pipeline_mode = #tpu.pipeline_mode<synchronous>, transform_indices = @transform_30, window_bounds = array<i64: 128, 64>}, {pipeline_mode = #tpu.pipeline_mode<synchronous>, transform_indices = @transform_31, window_bounds = array<i64: 1, 64>}, {pipeline_mode = #tpu.pipeline_mode<synchronous>, transform_indices = @transform_32, window_bounds = array<i64: 1, 64>}, {pipeline_mode = #tpu.pipeline_mode<synchronous>, transform_indices = @transform_33, window_bounds = array<i64: 1, 64>}, {pipeline_mode = #tpu.pipeline_mode<synchronous>, transform_indices = @transform_34, window_bounds = array<i64: 64, 64>}, {pipeline_mode = #tpu.pipeline_mode<synchronous>, transform_indices = @transform_35, window_bounds = array<i64: 1, 64>}, {pipeline_mode = #tpu.pipeline_mode<synchronous>, transform_indices = @transform_36, window_bounds = array<i64: 64, 64>}, {pipeline_mode = #tpu.pipeline_mode<synchronous>, transform_indices = @transform_37, window_bounds = array<i64: 1, 64>}, {pipeline_mode = #tpu.pipeline_mode<synchronous>, transform_indices = @transform_38, window_bounds = array<i64: 64, 64>}, {pipeline_mode = #tpu.pipeline_mode<synchronous>, transform_indices = @transform_39, window_bounds = array<i64: 1, 64>}, {pipeline_mode = #tpu.pipeline_mode<synchronous>, transform_indices = @transform_40, window_bounds = array<i64: 64, 64>}, {pipeline_mode = #tpu.pipeline_mode<synchronous>, transform_indices = @transform_41, window_bounds = array<i64: 1, 64>}, {pipeline_mode = #tpu.pipeline_mode<synchronous>, transform_indices = @transform_42, window_bounds = array<i64: 1, 64>}, {pipeline_mode = #tpu.pipeline_mode<synchronous>, transform_indices = @transform_43, window_bounds = array<i64: 1, 64>}, {pipeline_mode = #tpu.pipeline_mode<synchronous>, transform_indices = @transform_44, window_bounds = array<i64: 64, 64>}, {pipeline_mode = #tpu.pipeline_mode<synchronous>, transform_indices = @transform_45, window_bounds = array<i64: 1, 64>}, {pipeline_mode = #tpu.pipeline_mode<synchronous>, transform_indices = @transform_46, window_bounds = array<i64: 64, 64>}, {pipeline_mode = #tpu.pipeline_mode<synchronous>, transform_indices = @transform_47, window_bounds = array<i64: 1, 64>}, {pipeline_mode = #tpu.pipeline_mode<synchronous>, transform_indices = @transform_48, window_bounds = array<i64: 64, 64>}, {pipeline_mode = #tpu.pipeline_mode<synchronous>, transform_indices = @transform_49, window_bounds = array<i64: 1, 64>}, {pipeline_mode = #tpu.pipeline_mode<synchronous>, transform_indices = @transform_50, window_bounds = array<i64: 64, 64>}, {pipeline_mode = #tpu.pipeline_mode<synchronous>, transform_indices = @transform_51, window_bounds = array<i64: 1, 64>}, {pipeline_mode = #tpu.pipeline_mode<synchronous>, transform_indices = @transform_52, window_bounds = array<i64: 1, 64>}, {pipeline_mode = #tpu.pipeline_mode<synchronous>, transform_indices = @transform_53, window_bounds = array<i64: 1, 64>}, {pipeline_mode = #tpu.pipeline_mode<synchronous>, transform_indices = @transform_54, window_bounds = array<i64: 64, 128>}, {pipeline_mode = #tpu.pipeline_mode<synchronous>, transform_indices = @transform_55, window_bounds = array<i64: 1, 128>}, {pipeline_mode = #tpu.pipeline_mode<synchronous>, transform_indices = @transform_56, window_bounds = array<i64: 128, 64>}, {pipeline_mode = #tpu.pipeline_mode<synchronous>, transform_indices = @transform_57, window_bounds = array<i64: 1, 64>}, {pipeline_mode = #tpu.pipeline_mode<synchronous>, transform_indices = @transform_58, window_bounds = array<i64: 1, 64>}, {pipeline_mode = #tpu.pipeline_mode<synchronous>, transform_indices = @transform_59, window_bounds = array<i64: 1, 64>}, {transform_indices = @transform_60, window_bounds = array<i64: 1, 8, 128>}, {transform_indices = @transform_61, window_bounds = array<i64: 1, 1, 128>}]} {
    %c0 = arith.constant 0 : index
    %c0_0 = arith.constant 0 : index
    %0 = vector.load %arg7[%c0, %c0_0] : memref<128x64xf32, #tpu.memory_space<vmem>>, vector<128x64xf32>
    %c0_1 = arith.constant 0 : index
    %c0_2 = arith.constant 0 : index
    %c0_3 = arith.constant 0 : index
    %1 = vector.load %arg1[%c0_1, %c0_2, %c0_3] : memref<1x8x32xf32, #tpu.memory_space<vmem>>, vector<1x8x32xf32>
    %2 = vector.shape_cast %1 : vector<1x8x32xf32> to vector<8x32xf32>
    %c0_4 = arith.constant 0 : index
    %c0_5 = arith.constant 0 : index
    %3 = vector.load %arg11[%c0_4, %c0_5] : memref<32x64xf32, #tpu.memory_space<vmem>>, vector<32x64xf32>
    %cst = arith.constant dense<0.000000e+00> : vector<8x64xf32>
    %4 = tpu.matmul %2, %3, %cst {dimension_numbers = #tpu.dot_dimension_numbers<[1], [0], [0], [1], [0, 0, 1, 1], [], []>} : vector<8x32xf32>, vector<32x64xf32>, vector<8x64xf32> -> vector<8x64xf32>
    %c0_6 = arith.constant 0 : index
    %c0_7 = arith.constant 0 : index
    %5 = vector.load %arg12[%c0_6, %c0_7] : memref<1x64xf32, #tpu.memory_space<vmem>>, vector<1x64xf32>
    %6 = vector.broadcast %5 : vector<1x64xf32> to vector<8x64xf32>
    %7 = arith.addf %4, %6 : vector<8x64xf32>
    %cst_8 = arith.constant 0.000000e+00 : f32
    %8 = vector.broadcast %cst_8 : f32 to vector<8x64xf32>
    %9 = arith.maximumf %7, %8 : vector<8x64xf32>
    %c0_9 = arith.constant 0 : index
    %c0_10 = arith.constant 0 : index
    %10 = vector.load %arg13[%c0_9, %c0_10] : memref<64x64xf32, #tpu.memory_space<vmem>>, vector<64x64xf32>
    %cst_11 = arith.constant dense<0.000000e+00> : vector<8x64xf32>
    %11 = tpu.matmul %9, %10, %cst_11 {dimension_numbers = #tpu.dot_dimension_numbers<[1], [0], [0], [1], [0, 0, 1, 1], [], []>} : vector<8x64xf32>, vector<64x64xf32>, vector<8x64xf32> -> vector<8x64xf32>
    %c0_12 = arith.constant 0 : index
    %c0_13 = arith.constant 0 : index
    %12 = vector.load %arg14[%c0_12, %c0_13] : memref<1x64xf32, #tpu.memory_space<vmem>>, vector<1x64xf32>
    %13 = vector.broadcast %12 : vector<1x64xf32> to vector<8x64xf32>
    %14 = arith.addf %11, %13 : vector<8x64xf32>
    %c0_14 = arith.constant 0 : index
    %c0_15 = arith.constant 0 : index
    %c0_16 = arith.constant 0 : index
    %15 = vector.load %arg2[%c0_14, %c0_15, %c0_16] : memref<1x8x1xi32, #tpu.memory_space<vmem>>, vector<1x8x1xi32>
    %16 = vector.shape_cast %15 : vector<1x8x1xi32> to vector<8x1xi32>
    %17 = tpu.iota {dimensions = array<i32: 1>} : vector<8x128xi32>
    %18 = vector.broadcast %16 : vector<8x1xi32> to vector<8x128xi32>
    %19 = arith.cmpi eq, %17, %18 : vector<8x128xi32>
    %20 = arith.extui %19 : vector<8x128xi1> to vector<8x128xi32>
    %21 = arith.sitofp %20 : vector<8x128xi32> to vector<8x128xf32>
    %cst_17 = arith.constant dense<0.000000e+00> : vector<8x64xf32>
    %22 = tpu.matmul %21, %0, %cst_17 {dimension_numbers = #tpu.dot_dimension_numbers<[1], [0], [0], [1], [0, 0, 1, 1], [], []>} : vector<8x128xf32>, vector<128x64xf32>, vector<8x64xf32> -> vector<8x64xf32>
    %cst_18 = arith.constant 8.000000e+00 : f32
    %23 = vector.broadcast %cst_18 : f32 to vector<8x64xf32>
    %24 = arith.mulf %22, %23 : vector<8x64xf32>
    %25 = arith.addf %14, %24 : vector<8x64xf32>
    %c0_19 = arith.constant 0 : index
    %c0_20 = arith.constant 0 : index
    %26 = vector.load %arg9[%c0_19, %c0_20] : memref<8x64xf32, #tpu.memory_space<vmem>>, vector<8x64xf32>
    %27 = arith.addf %25, %26 : vector<8x64xf32>
    %c0_21 = arith.constant 0 : index
    %c0_22 = arith.constant 0 : index
    %28 = vector.load %arg15[%c0_21, %c0_22] : memref<1x64xf32, #tpu.memory_space<vmem>>, vector<1x64xf32>
    %c0_23 = arith.constant 0 : index
    %c0_24 = arith.constant 0 : index
    %29 = vector.load %arg16[%c0_23, %c0_24] : memref<1x64xf32, #tpu.memory_space<vmem>>, vector<1x64xf32>
    %cst_25 = arith.constant dense<0.000000e+00> : vector<8xf32>
    %30 = vector.multi_reduction <add>, %27, %cst_25 [1] : vector<8x64xf32> to vector<8xf32>
    %31 = vector.shape_cast %30 : vector<8xf32> to vector<8x1xf32>
    %cst_26 = arith.constant 6.400000e+01 : f32
    %32 = vector.broadcast %cst_26 : f32 to vector<8x1xf32>
    %33 = arith.divf %31, %32 : vector<8x1xf32>
    %34 = vector.broadcast %33 : vector<8x1xf32> to vector<8x64xf32>
    %35 = arith.subf %27, %34 : vector<8x64xf32>
    %36 = vector.broadcast %33 : vector<8x1xf32> to vector<8x64xf32>
    %37 = arith.subf %27, %36 : vector<8x64xf32>
    %38 = arith.mulf %35, %37 : vector<8x64xf32>
    %cst_27 = arith.constant dense<0.000000e+00> : vector<8xf32>
    %39 = vector.multi_reduction <add>, %38, %cst_27 [1] : vector<8x64xf32> to vector<8xf32>
    %40 = vector.shape_cast %39 : vector<8xf32> to vector<8x1xf32>
    %cst_28 = arith.constant 6.400000e+01 : f32
    %41 = vector.broadcast %cst_28 : f32 to vector<8x1xf32>
    %42 = arith.divf %40, %41 : vector<8x1xf32>
    %43 = vector.broadcast %33 : vector<8x1xf32> to vector<8x64xf32>
    %44 = arith.subf %27, %43 : vector<8x64xf32>
    %cst_29 = arith.constant 9.99999974E-6 : f32
    %45 = vector.broadcast %cst_29 : f32 to vector<8x1xf32>
    %46 = arith.addf %42, %45 : vector<8x1xf32>
    %47 = math.rsqrt %46 : vector<8x1xf32>
    %48 = vector.broadcast %47 : vector<8x1xf32> to vector<8x64xf32>
    %49 = arith.mulf %44, %48 : vector<8x64xf32>
    %50 = vector.broadcast %28 : vector<1x64xf32> to vector<8x64xf32>
    %51 = arith.mulf %49, %50 : vector<8x64xf32>
    %52 = vector.broadcast %29 : vector<1x64xf32> to vector<8x64xf32>
    %53 = arith.addf %51, %52 : vector<8x64xf32>
    %c0_30 = arith.constant 0 : index
    %c0_31 = arith.constant 0 : index
    %c0_32 = arith.constant 0 : index
    %54 = vector.load %arg5[%c0_30, %c0_31, %c0_32] : memref<1x1x8xf32, #tpu.memory_space<vmem>>, vector<1x1x8xf32>
    %55 = vector.shape_cast %54 : vector<1x1x8xf32> to vector<1x8xf32>
    %cst_33 = arith.constant 1.000000e+00 : f32
    %56 = vector.broadcast %cst_33 : f32 to vector<1x8xf32>
    %57 = arith.subf %56, %55 : vector<1x8xf32>
    %cst_34 = arith.constant -1.000000e+09 : f32
    %58 = vector.broadcast %cst_34 : f32 to vector<1x8xf32>
    %59 = arith.mulf %57, %58 : vector<1x8xf32>
    %c0_35 = arith.constant 0 : index
    %c0_36 = arith.constant 0 : index
    %c0_37 = arith.constant 0 : index
    %60 = vector.load %arg6[%c0_35, %c0_36, %c0_37] : memref<1x1x8xf32, #tpu.memory_space<vmem>>, vector<1x1x8xf32>
    %61 = vector.shape_cast %60 : vector<1x1x8xf32> to vector<1x8xf32>
    %cst_38 = arith.constant 1.000000e+00 : f32
    %62 = vector.broadcast %cst_38 : f32 to vector<1x8xf32>
    %63 = arith.subf %62, %61 : vector<1x8xf32>
    %cst_39 = arith.constant -1.000000e+09 : f32
    %64 = vector.broadcast %cst_39 : f32 to vector<1x8xf32>
    %65 = arith.mulf %63, %64 : vector<1x8xf32>
    %66 = tpu.iota {dimensions = array<i32: 0>} : vector<8x8xi32>
    %67 = tpu.iota {dimensions = array<i32: 1>} : vector<8x8xi32>
    %68 = arith.cmpi sge, %66, %67 : vector<8x8xi32>
    %cst_40 = arith.constant 0.000000e+00 : f32
    %cst_41 = arith.constant -1.000000e+09 : f32
    %69 = vector.broadcast %cst_40 : f32 to vector<8x8xf32>
    %70 = vector.broadcast %cst_41 : f32 to vector<8x8xf32>
    %71 = arith.select %68, %69, %70 : vector<8x8xi1>, vector<8x8xf32>
    %72 = vector.broadcast %65 : vector<1x8xf32> to vector<8x8xf32>
    %73 = arith.addf %71, %72 : vector<8x8xf32>
    %c0_42 = arith.constant 0 : index
    %c0_43 = arith.constant 0 : index
    %74 = vector.load %arg19[%c0_42, %c0_43] : memref<64x64xf32, #tpu.memory_space<vmem>>, vector<64x64xf32>
    %cst_44 = arith.constant dense<0.000000e+00> : vector<8x64xf32>
    %75 = tpu.matmul %53, %74, %cst_44 {dimension_numbers = #tpu.dot_dimension_numbers<[1], [0], [0], [1], [0, 0, 1, 1], [], []>} : vector<8x64xf32>, vector<64x64xf32>, vector<8x64xf32> -> vector<8x64xf32>
    %c0_45 = arith.constant 0 : index
    %c0_46 = arith.constant 0 : index
    %76 = vector.load %arg20[%c0_45, %c0_46] : memref<1x64xf32, #tpu.memory_space<vmem>>, vector<1x64xf32>
    %77 = vector.broadcast %76 : vector<1x64xf32> to vector<8x64xf32>
    %78 = arith.addf %75, %77 : vector<8x64xf32>
    %cst_47 = arith.constant 2.500000e-01 : f32
    %79 = vector.broadcast %cst_47 : f32 to vector<8x64xf32>
    %80 = arith.mulf %78, %79 : vector<8x64xf32>
    %c0_48 = arith.constant 0 : index
    %c0_49 = arith.constant 0 : index
    %81 = vector.load %arg21[%c0_48, %c0_49] : memref<64x64xf32, #tpu.memory_space<vmem>>, vector<64x64xf32>
    %cst_50 = arith.constant dense<0.000000e+00> : vector<8x64xf32>
    %82 = tpu.matmul %53, %81, %cst_50 {dimension_numbers = #tpu.dot_dimension_numbers<[1], [0], [0], [1], [0, 0, 1, 1], [], []>} : vector<8x64xf32>, vector<64x64xf32>, vector<8x64xf32> -> vector<8x64xf32>
    %c0_51 = arith.constant 0 : index
    %c0_52 = arith.constant 0 : index
    %83 = vector.load %arg22[%c0_51, %c0_52] : memref<1x64xf32, #tpu.memory_space<vmem>>, vector<1x64xf32>
    %84 = vector.broadcast %83 : vector<1x64xf32> to vector<8x64xf32>
    %85 = arith.addf %82, %84 : vector<8x64xf32>
    %c0_53 = arith.constant 0 : index
    %c0_54 = arith.constant 0 : index
    %86 = vector.load %arg23[%c0_53, %c0_54] : memref<64x64xf32, #tpu.memory_space<vmem>>, vector<64x64xf32>
    %cst_55 = arith.constant dense<0.000000e+00> : vector<8x64xf32>
    %87 = tpu.matmul %53, %86, %cst_55 {dimension_numbers = #tpu.dot_dimension_numbers<[1], [0], [0], [1], [0, 0, 1, 1], [], []>} : vector<8x64xf32>, vector<64x64xf32>, vector<8x64xf32> -> vector<8x64xf32>
    %c0_56 = arith.constant 0 : index
    %c0_57 = arith.constant 0 : index
    %88 = vector.load %arg24[%c0_56, %c0_57] : memref<1x64xf32, #tpu.memory_space<vmem>>, vector<1x64xf32>
    %89 = vector.broadcast %88 : vector<1x64xf32> to vector<8x64xf32>
    %90 = arith.addf %87, %89 : vector<8x64xf32>
    %91 = vector.extract_strided_slice %80 {offsets = [0, 0], sizes = [8, 16], strides = [1, 1]} : vector<8x64xf32> to vector<8x16xf32>
    %92 = vector.extract_strided_slice %85 {offsets = [0, 0], sizes = [8, 16], strides = [1, 1]} : vector<8x64xf32> to vector<8x16xf32>
    %cst_58 = arith.constant dense<0.000000e+00> : vector<8x8xf32>
    %93 = tpu.matmul %91, %92, %cst_58 {dimension_numbers = #tpu.dot_dimension_numbers<[1], [1], [0], [0], [0, 0, 1, 0], [], []>} : vector<8x16xf32>, vector<8x16xf32>, vector<8x8xf32> -> vector<8x8xf32>
    %94 = vector.broadcast %59 : vector<1x8xf32> to vector<8x8xf32>
    %95 = arith.addf %93, %94 : vector<8x8xf32>
    %cst_59 = arith.constant dense<0xFF800000> : vector<8xf32>
    %96 = vector.multi_reduction <maximumf>, %95, %cst_59 [1] : vector<8x8xf32> to vector<8xf32>
    %97 = vector.shape_cast %96 : vector<8xf32> to vector<8x1xf32>
    %98 = vector.broadcast %97 : vector<8x1xf32> to vector<8x8xf32>
    %99 = arith.subf %95, %98 : vector<8x8xf32>
    %100 = math.exp %99 : vector<8x8xf32>
    %cst_60 = arith.constant dense<0.000000e+00> : vector<8xf32>
    %101 = vector.multi_reduction <add>, %100, %cst_60 [1] : vector<8x8xf32> to vector<8xf32>
    %102 = vector.shape_cast %101 : vector<8xf32> to vector<8x1xf32>
    %103 = tpu.reciprocal %102 {approx = true} : vector<8x1xf32> -> vector<8x1xf32>
    %104 = vector.broadcast %103 : vector<8x1xf32> to vector<8x8xf32>
    %105 = arith.mulf %100, %104 : vector<8x8xf32>
    %106 = vector.extract_strided_slice %90 {offsets = [0, 0], sizes = [8, 16], strides = [1, 1]} : vector<8x64xf32> to vector<8x16xf32>
    %cst_61 = arith.constant dense<0.000000e+00> : vector<8x16xf32>
    %107 = tpu.matmul %105, %106, %cst_61 {dimension_numbers = #tpu.dot_dimension_numbers<[1], [0], [0], [1], [0, 0, 1, 1], [], []>} : vector<8x8xf32>, vector<8x16xf32>, vector<8x16xf32> -> vector<8x16xf32>
    %108 = vector.extract_strided_slice %80 {offsets = [0, 16], sizes = [8, 16], strides = [1, 1]} : vector<8x64xf32> to vector<8x16xf32>
    %109 = vector.extract_strided_slice %85 {offsets = [0, 16], sizes = [8, 16], strides = [1, 1]} : vector<8x64xf32> to vector<8x16xf32>
    %cst_62 = arith.constant dense<0.000000e+00> : vector<8x8xf32>
    %110 = tpu.matmul %108, %109, %cst_62 {dimension_numbers = #tpu.dot_dimension_numbers<[1], [1], [0], [0], [0, 0, 1, 0], [], []>} : vector<8x16xf32>, vector<8x16xf32>, vector<8x8xf32> -> vector<8x8xf32>
    %111 = vector.broadcast %59 : vector<1x8xf32> to vector<8x8xf32>
    %112 = arith.addf %110, %111 : vector<8x8xf32>
    %cst_63 = arith.constant dense<0xFF800000> : vector<8xf32>
    %113 = vector.multi_reduction <maximumf>, %112, %cst_63 [1] : vector<8x8xf32> to vector<8xf32>
    %114 = vector.shape_cast %113 : vector<8xf32> to vector<8x1xf32>
    %115 = vector.broadcast %114 : vector<8x1xf32> to vector<8x8xf32>
    %116 = arith.subf %112, %115 : vector<8x8xf32>
    %117 = math.exp %116 : vector<8x8xf32>
    %cst_64 = arith.constant dense<0.000000e+00> : vector<8xf32>
    %118 = vector.multi_reduction <add>, %117, %cst_64 [1] : vector<8x8xf32> to vector<8xf32>
    %119 = vector.shape_cast %118 : vector<8xf32> to vector<8x1xf32>
    %120 = tpu.reciprocal %119 {approx = true} : vector<8x1xf32> -> vector<8x1xf32>
    %121 = vector.broadcast %120 : vector<8x1xf32> to vector<8x8xf32>
    %122 = arith.mulf %117, %121 : vector<8x8xf32>
    %123 = vector.extract_strided_slice %90 {offsets = [0, 16], sizes = [8, 16], strides = [1, 1]} : vector<8x64xf32> to vector<8x16xf32>
    %cst_65 = arith.constant dense<0.000000e+00> : vector<8x16xf32>
    %124 = tpu.matmul %122, %123, %cst_65 {dimension_numbers = #tpu.dot_dimension_numbers<[1], [0], [0], [1], [0, 0, 1, 1], [], []>} : vector<8x8xf32>, vector<8x16xf32>, vector<8x16xf32> -> vector<8x16xf32>
    %125 = vector.extract_strided_slice %80 {offsets = [0, 32], sizes = [8, 16], strides = [1, 1]} : vector<8x64xf32> to vector<8x16xf32>
    %126 = vector.extract_strided_slice %85 {offsets = [0, 32], sizes = [8, 16], strides = [1, 1]} : vector<8x64xf32> to vector<8x16xf32>
    %cst_66 = arith.constant dense<0.000000e+00> : vector<8x8xf32>
    %127 = tpu.matmul %125, %126, %cst_66 {dimension_numbers = #tpu.dot_dimension_numbers<[1], [1], [0], [0], [0, 0, 1, 0], [], []>} : vector<8x16xf32>, vector<8x16xf32>, vector<8x8xf32> -> vector<8x8xf32>
    %128 = vector.broadcast %59 : vector<1x8xf32> to vector<8x8xf32>
    %129 = arith.addf %127, %128 : vector<8x8xf32>
    %cst_67 = arith.constant dense<0xFF800000> : vector<8xf32>
    %130 = vector.multi_reduction <maximumf>, %129, %cst_67 [1] : vector<8x8xf32> to vector<8xf32>
    %131 = vector.shape_cast %130 : vector<8xf32> to vector<8x1xf32>
    %132 = vector.broadcast %131 : vector<8x1xf32> to vector<8x8xf32>
    %133 = arith.subf %129, %132 : vector<8x8xf32>
    %134 = math.exp %133 : vector<8x8xf32>
    %cst_68 = arith.constant dense<0.000000e+00> : vector<8xf32>
    %135 = vector.multi_reduction <add>, %134, %cst_68 [1] : vector<8x8xf32> to vector<8xf32>
    %136 = vector.shape_cast %135 : vector<8xf32> to vector<8x1xf32>
    %137 = tpu.reciprocal %136 {approx = true} : vector<8x1xf32> -> vector<8x1xf32>
    %138 = vector.broadcast %137 : vector<8x1xf32> to vector<8x8xf32>
    %139 = arith.mulf %134, %138 : vector<8x8xf32>
    %140 = vector.extract_strided_slice %90 {offsets = [0, 32], sizes = [8, 16], strides = [1, 1]} : vector<8x64xf32> to vector<8x16xf32>
    %cst_69 = arith.constant dense<0.000000e+00> : vector<8x16xf32>
    %141 = tpu.matmul %139, %140, %cst_69 {dimension_numbers = #tpu.dot_dimension_numbers<[1], [0], [0], [1], [0, 0, 1, 1], [], []>} : vector<8x8xf32>, vector<8x16xf32>, vector<8x16xf32> -> vector<8x16xf32>
    %142 = vector.extract_strided_slice %80 {offsets = [0, 48], sizes = [8, 16], strides = [1, 1]} : vector<8x64xf32> to vector<8x16xf32>
    %143 = vector.extract_strided_slice %85 {offsets = [0, 48], sizes = [8, 16], strides = [1, 1]} : vector<8x64xf32> to vector<8x16xf32>
    %cst_70 = arith.constant dense<0.000000e+00> : vector<8x8xf32>
    %144 = tpu.matmul %142, %143, %cst_70 {dimension_numbers = #tpu.dot_dimension_numbers<[1], [1], [0], [0], [0, 0, 1, 0], [], []>} : vector<8x16xf32>, vector<8x16xf32>, vector<8x8xf32> -> vector<8x8xf32>
    %145 = vector.broadcast %59 : vector<1x8xf32> to vector<8x8xf32>
    %146 = arith.addf %144, %145 : vector<8x8xf32>
    %cst_71 = arith.constant dense<0xFF800000> : vector<8xf32>
    %147 = vector.multi_reduction <maximumf>, %146, %cst_71 [1] : vector<8x8xf32> to vector<8xf32>
    %148 = vector.shape_cast %147 : vector<8xf32> to vector<8x1xf32>
    %149 = vector.broadcast %148 : vector<8x1xf32> to vector<8x8xf32>
    %150 = arith.subf %146, %149 : vector<8x8xf32>
    %151 = math.exp %150 : vector<8x8xf32>
    %cst_72 = arith.constant dense<0.000000e+00> : vector<8xf32>
    %152 = vector.multi_reduction <add>, %151, %cst_72 [1] : vector<8x8xf32> to vector<8xf32>
    %153 = vector.shape_cast %152 : vector<8xf32> to vector<8x1xf32>
    %154 = tpu.reciprocal %153 {approx = true} : vector<8x1xf32> -> vector<8x1xf32>
    %155 = vector.broadcast %154 : vector<8x1xf32> to vector<8x8xf32>
    %156 = arith.mulf %151, %155 : vector<8x8xf32>
    %157 = vector.extract_strided_slice %90 {offsets = [0, 48], sizes = [8, 16], strides = [1, 1]} : vector<8x64xf32> to vector<8x16xf32>
    %cst_73 = arith.constant dense<0.000000e+00> : vector<8x16xf32>
    %158 = tpu.matmul %156, %157, %cst_73 {dimension_numbers = #tpu.dot_dimension_numbers<[1], [0], [0], [1], [0, 0, 1, 1], [], []>} : vector<8x8xf32>, vector<8x16xf32>, vector<8x16xf32> -> vector<8x16xf32>
    %159 = tpu.concatenate %107, %124, %141, %158 in 1 : vector<8x16xf32>, vector<8x16xf32>, vector<8x16xf32>, vector<8x16xf32> -> vector<8x64xf32>
    %c0_74 = arith.constant 0 : index
    %c0_75 = arith.constant 0 : index
    %160 = vector.load %arg25[%c0_74, %c0_75] : memref<64x64xf32, #tpu.memory_space<vmem>>, vector<64x64xf32>
    %cst_76 = arith.constant dense<0.000000e+00> : vector<8x64xf32>
    %161 = tpu.matmul %159, %160, %cst_76 {dimension_numbers = #tpu.dot_dimension_numbers<[1], [0], [0], [1], [0, 0, 1, 1], [], []>} : vector<8x64xf32>, vector<64x64xf32>, vector<8x64xf32> -> vector<8x64xf32>
    %c0_77 = arith.constant 0 : index
    %c0_78 = arith.constant 0 : index
    %162 = vector.load %arg26[%c0_77, %c0_78] : memref<1x64xf32, #tpu.memory_space<vmem>>, vector<1x64xf32>
    %163 = vector.broadcast %162 : vector<1x64xf32> to vector<8x64xf32>
    %164 = arith.addf %161, %163 : vector<8x64xf32>
    %165 = arith.addf %53, %164 : vector<8x64xf32>
    %c0_79 = arith.constant 0 : index
    %c0_80 = arith.constant 0 : index
    %166 = vector.load %arg27[%c0_79, %c0_80] : memref<1x64xf32, #tpu.memory_space<vmem>>, vector<1x64xf32>
    %c0_81 = arith.constant 0 : index
    %c0_82 = arith.constant 0 : index
    %167 = vector.load %arg28[%c0_81, %c0_82] : memref<1x64xf32, #tpu.memory_space<vmem>>, vector<1x64xf32>
    %cst_83 = arith.constant dense<0.000000e+00> : vector<8xf32>
    %168 = vector.multi_reduction <add>, %165, %cst_83 [1] : vector<8x64xf32> to vector<8xf32>
    %169 = vector.shape_cast %168 : vector<8xf32> to vector<8x1xf32>
    %cst_84 = arith.constant 6.400000e+01 : f32
    %170 = vector.broadcast %cst_84 : f32 to vector<8x1xf32>
    %171 = arith.divf %169, %170 : vector<8x1xf32>
    %172 = vector.broadcast %171 : vector<8x1xf32> to vector<8x64xf32>
    %173 = arith.subf %165, %172 : vector<8x64xf32>
    %174 = vector.broadcast %171 : vector<8x1xf32> to vector<8x64xf32>
    %175 = arith.subf %165, %174 : vector<8x64xf32>
    %176 = arith.mulf %173, %175 : vector<8x64xf32>
    %cst_85 = arith.constant dense<0.000000e+00> : vector<8xf32>
    %177 = vector.multi_reduction <add>, %176, %cst_85 [1] : vector<8x64xf32> to vector<8xf32>
    %178 = vector.shape_cast %177 : vector<8xf32> to vector<8x1xf32>
    %cst_86 = arith.constant 6.400000e+01 : f32
    %179 = vector.broadcast %cst_86 : f32 to vector<8x1xf32>
    %180 = arith.divf %178, %179 : vector<8x1xf32>
    %181 = vector.broadcast %171 : vector<8x1xf32> to vector<8x64xf32>
    %182 = arith.subf %165, %181 : vector<8x64xf32>
    %cst_87 = arith.constant 9.99999974E-6 : f32
    %183 = vector.broadcast %cst_87 : f32 to vector<8x1xf32>
    %184 = arith.addf %180, %183 : vector<8x1xf32>
    %185 = math.rsqrt %184 : vector<8x1xf32>
    %186 = vector.broadcast %185 : vector<8x1xf32> to vector<8x64xf32>
    %187 = arith.mulf %182, %186 : vector<8x64xf32>
    %188 = vector.broadcast %166 : vector<1x64xf32> to vector<8x64xf32>
    %189 = arith.mulf %187, %188 : vector<8x64xf32>
    %190 = vector.broadcast %167 : vector<1x64xf32> to vector<8x64xf32>
    %191 = arith.addf %189, %190 : vector<8x64xf32>
    %c0_88 = arith.constant 0 : index
    %c0_89 = arith.constant 0 : index
    %192 = vector.load %arg29[%c0_88, %c0_89] : memref<64x128xf32, #tpu.memory_space<vmem>>, vector<64x128xf32>
    %cst_90 = arith.constant dense<0.000000e+00> : vector<8x128xf32>
    %193 = tpu.matmul %191, %192, %cst_90 {dimension_numbers = #tpu.dot_dimension_numbers<[1], [0], [0], [1], [0, 0, 1, 1], [], []>} : vector<8x64xf32>, vector<64x128xf32>, vector<8x128xf32> -> vector<8x128xf32>
    %c0_91 = arith.constant 0 : index
    %c0_92 = arith.constant 0 : index
    %194 = vector.load %arg30[%c0_91, %c0_92] : memref<1x128xf32, #tpu.memory_space<vmem>>, vector<1x128xf32>
    %195 = vector.broadcast %194 : vector<1x128xf32> to vector<8x128xf32>
    %196 = arith.addf %193, %195 : vector<8x128xf32>
    %cst_93 = arith.constant 5.000000e-01 : f32
    %197 = vector.broadcast %cst_93 : f32 to vector<8x128xf32>
    %198 = arith.mulf %197, %196 : vector<8x128xf32>
    %cst_94 = arith.constant 4.471500e-02 : f32
    %199 = vector.broadcast %cst_94 : f32 to vector<8x128xf32>
    %200 = arith.mulf %199, %196 : vector<8x128xf32>
    %201 = arith.mulf %200, %196 : vector<8x128xf32>
    %202 = arith.mulf %201, %196 : vector<8x128xf32>
    %203 = arith.addf %196, %202 : vector<8x128xf32>
    %cst_95 = arith.constant 0.797884583 : f32
    %204 = vector.broadcast %cst_95 : f32 to vector<8x128xf32>
    %205 = arith.mulf %204, %203 : vector<8x128xf32>
    %206 = math.tanh %205 : vector<8x128xf32>
    %cst_96 = arith.constant 1.000000e+00 : f32
    %207 = vector.broadcast %cst_96 : f32 to vector<8x128xf32>
    %208 = arith.addf %207, %206 : vector<8x128xf32>
    %209 = arith.mulf %198, %208 : vector<8x128xf32>
    %c0_97 = arith.constant 0 : index
    %c0_98 = arith.constant 0 : index
    %210 = vector.load %arg31[%c0_97, %c0_98] : memref<128x64xf32, #tpu.memory_space<vmem>>, vector<128x64xf32>
    %cst_99 = arith.constant dense<0.000000e+00> : vector<8x64xf32>
    %211 = tpu.matmul %209, %210, %cst_99 {dimension_numbers = #tpu.dot_dimension_numbers<[1], [0], [0], [1], [0, 0, 1, 1], [], []>} : vector<8x128xf32>, vector<128x64xf32>, vector<8x64xf32> -> vector<8x64xf32>
    %c0_100 = arith.constant 0 : index
    %c0_101 = arith.constant 0 : index
    %212 = vector.load %arg32[%c0_100, %c0_101] : memref<1x64xf32, #tpu.memory_space<vmem>>, vector<1x64xf32>
    %213 = vector.broadcast %212 : vector<1x64xf32> to vector<8x64xf32>
    %214 = arith.addf %211, %213 : vector<8x64xf32>
    %215 = arith.addf %191, %214 : vector<8x64xf32>
    %c0_102 = arith.constant 0 : index
    %c0_103 = arith.constant 0 : index
    %216 = vector.load %arg33[%c0_102, %c0_103] : memref<1x64xf32, #tpu.memory_space<vmem>>, vector<1x64xf32>
    %c0_104 = arith.constant 0 : index
    %c0_105 = arith.constant 0 : index
    %217 = vector.load %arg34[%c0_104, %c0_105] : memref<1x64xf32, #tpu.memory_space<vmem>>, vector<1x64xf32>
    %cst_106 = arith.constant dense<0.000000e+00> : vector<8xf32>
    %218 = vector.multi_reduction <add>, %215, %cst_106 [1] : vector<8x64xf32> to vector<8xf32>
    %219 = vector.shape_cast %218 : vector<8xf32> to vector<8x1xf32>
    %cst_107 = arith.constant 6.400000e+01 : f32
    %220 = vector.broadcast %cst_107 : f32 to vector<8x1xf32>
    %221 = arith.divf %219, %220 : vector<8x1xf32>
    %222 = vector.broadcast %221 : vector<8x1xf32> to vector<8x64xf32>
    %223 = arith.subf %215, %222 : vector<8x64xf32>
    %224 = vector.broadcast %221 : vector<8x1xf32> to vector<8x64xf32>
    %225 = arith.subf %215, %224 : vector<8x64xf32>
    %226 = arith.mulf %223, %225 : vector<8x64xf32>
    %cst_108 = arith.constant dense<0.000000e+00> : vector<8xf32>
    %227 = vector.multi_reduction <add>, %226, %cst_108 [1] : vector<8x64xf32> to vector<8xf32>
    %228 = vector.shape_cast %227 : vector<8xf32> to vector<8x1xf32>
    %cst_109 = arith.constant 6.400000e+01 : f32
    %229 = vector.broadcast %cst_109 : f32 to vector<8x1xf32>
    %230 = arith.divf %228, %229 : vector<8x1xf32>
    %231 = vector.broadcast %221 : vector<8x1xf32> to vector<8x64xf32>
    %232 = arith.subf %215, %231 : vector<8x64xf32>
    %cst_110 = arith.constant 9.99999974E-6 : f32
    %233 = vector.broadcast %cst_110 : f32 to vector<8x1xf32>
    %234 = arith.addf %230, %233 : vector<8x1xf32>
    %235 = math.rsqrt %234 : vector<8x1xf32>
    %236 = vector.broadcast %235 : vector<8x1xf32> to vector<8x64xf32>
    %237 = arith.mulf %232, %236 : vector<8x64xf32>
    %238 = vector.broadcast %216 : vector<1x64xf32> to vector<8x64xf32>
    %239 = arith.mulf %237, %238 : vector<8x64xf32>
    %240 = vector.broadcast %217 : vector<1x64xf32> to vector<8x64xf32>
    %241 = arith.addf %239, %240 : vector<8x64xf32>
    %c0_111 = arith.constant 0 : index
    %c0_112 = arith.constant 0 : index
    %c0_113 = arith.constant 0 : index
    %242 = vector.load %arg3[%c0_111, %c0_112, %c0_113] : memref<1x8x1xi32, #tpu.memory_space<vmem>>, vector<1x8x1xi32>
    %243 = vector.shape_cast %242 : vector<1x8x1xi32> to vector<8x1xi32>
    %244 = tpu.iota {dimensions = array<i32: 1>} : vector<8x128xi32>
    %245 = vector.broadcast %243 : vector<8x1xi32> to vector<8x128xi32>
    %246 = arith.cmpi eq, %244, %245 : vector<8x128xi32>
    %247 = arith.extui %246 : vector<8x128xi1> to vector<8x128xi32>
    %248 = arith.sitofp %247 : vector<8x128xi32> to vector<8x128xf32>
    %cst_114 = arith.constant dense<0.000000e+00> : vector<8x64xf32>
    %249 = tpu.matmul %248, %0, %cst_114 {dimension_numbers = #tpu.dot_dimension_numbers<[1], [0], [0], [1], [0, 0, 1, 1], [], []>} : vector<8x128xf32>, vector<128x64xf32>, vector<8x64xf32> -> vector<8x64xf32>
    %cst_115 = arith.constant 8.000000e+00 : f32
    %250 = vector.broadcast %cst_115 : f32 to vector<8x64xf32>
    %251 = arith.mulf %249, %250 : vector<8x64xf32>
    %c0_116 = arith.constant 0 : index
    %c0_117 = arith.constant 0 : index
    %252 = vector.load %arg10[%c0_116, %c0_117] : memref<8x64xf32, #tpu.memory_space<vmem>>, vector<8x64xf32>
    %253 = arith.addf %251, %252 : vector<8x64xf32>
    %c0_118 = arith.constant 0 : index
    %c0_119 = arith.constant 0 : index
    %254 = vector.load %arg17[%c0_118, %c0_119] : memref<1x64xf32, #tpu.memory_space<vmem>>, vector<1x64xf32>
    %c0_120 = arith.constant 0 : index
    %c0_121 = arith.constant 0 : index
    %255 = vector.load %arg18[%c0_120, %c0_121] : memref<1x64xf32, #tpu.memory_space<vmem>>, vector<1x64xf32>
    %cst_122 = arith.constant dense<0.000000e+00> : vector<8xf32>
    %256 = vector.multi_reduction <add>, %253, %cst_122 [1] : vector<8x64xf32> to vector<8xf32>
    %257 = vector.shape_cast %256 : vector<8xf32> to vector<8x1xf32>
    %cst_123 = arith.constant 6.400000e+01 : f32
    %258 = vector.broadcast %cst_123 : f32 to vector<8x1xf32>
    %259 = arith.divf %257, %258 : vector<8x1xf32>
    %260 = vector.broadcast %259 : vector<8x1xf32> to vector<8x64xf32>
    %261 = arith.subf %253, %260 : vector<8x64xf32>
    %262 = vector.broadcast %259 : vector<8x1xf32> to vector<8x64xf32>
    %263 = arith.subf %253, %262 : vector<8x64xf32>
    %264 = arith.mulf %261, %263 : vector<8x64xf32>
    %cst_124 = arith.constant dense<0.000000e+00> : vector<8xf32>
    %265 = vector.multi_reduction <add>, %264, %cst_124 [1] : vector<8x64xf32> to vector<8xf32>
    %266 = vector.shape_cast %265 : vector<8xf32> to vector<8x1xf32>
    %cst_125 = arith.constant 6.400000e+01 : f32
    %267 = vector.broadcast %cst_125 : f32 to vector<8x1xf32>
    %268 = arith.divf %266, %267 : vector<8x1xf32>
    %269 = vector.broadcast %259 : vector<8x1xf32> to vector<8x64xf32>
    %270 = arith.subf %253, %269 : vector<8x64xf32>
    %cst_126 = arith.constant 9.99999974E-6 : f32
    %271 = vector.broadcast %cst_126 : f32 to vector<8x1xf32>
    %272 = arith.addf %268, %271 : vector<8x1xf32>
    %273 = math.rsqrt %272 : vector<8x1xf32>
    %274 = vector.broadcast %273 : vector<8x1xf32> to vector<8x64xf32>
    %275 = arith.mulf %270, %274 : vector<8x64xf32>
    %276 = vector.broadcast %254 : vector<1x64xf32> to vector<8x64xf32>
    %277 = arith.mulf %275, %276 : vector<8x64xf32>
    %278 = vector.broadcast %255 : vector<1x64xf32> to vector<8x64xf32>
    %279 = arith.addf %277, %278 : vector<8x64xf32>
    %c0_127 = arith.constant 0 : index
    %c0_128 = arith.constant 0 : index
    %280 = vector.load %arg35[%c0_127, %c0_128] : memref<64x64xf32, #tpu.memory_space<vmem>>, vector<64x64xf32>
    %cst_129 = arith.constant dense<0.000000e+00> : vector<8x64xf32>
    %281 = tpu.matmul %279, %280, %cst_129 {dimension_numbers = #tpu.dot_dimension_numbers<[1], [0], [0], [1], [0, 0, 1, 1], [], []>} : vector<8x64xf32>, vector<64x64xf32>, vector<8x64xf32> -> vector<8x64xf32>
    %c0_130 = arith.constant 0 : index
    %c0_131 = arith.constant 0 : index
    %282 = vector.load %arg36[%c0_130, %c0_131] : memref<1x64xf32, #tpu.memory_space<vmem>>, vector<1x64xf32>
    %283 = vector.broadcast %282 : vector<1x64xf32> to vector<8x64xf32>
    %284 = arith.addf %281, %283 : vector<8x64xf32>
    %cst_132 = arith.constant 2.500000e-01 : f32
    %285 = vector.broadcast %cst_132 : f32 to vector<8x64xf32>
    %286 = arith.mulf %284, %285 : vector<8x64xf32>
    %c0_133 = arith.constant 0 : index
    %c0_134 = arith.constant 0 : index
    %287 = vector.load %arg37[%c0_133, %c0_134] : memref<64x64xf32, #tpu.memory_space<vmem>>, vector<64x64xf32>
    %cst_135 = arith.constant dense<0.000000e+00> : vector<8x64xf32>
    %288 = tpu.matmul %279, %287, %cst_135 {dimension_numbers = #tpu.dot_dimension_numbers<[1], [0], [0], [1], [0, 0, 1, 1], [], []>} : vector<8x64xf32>, vector<64x64xf32>, vector<8x64xf32> -> vector<8x64xf32>
    %c0_136 = arith.constant 0 : index
    %c0_137 = arith.constant 0 : index
    %289 = vector.load %arg38[%c0_136, %c0_137] : memref<1x64xf32, #tpu.memory_space<vmem>>, vector<1x64xf32>
    %290 = vector.broadcast %289 : vector<1x64xf32> to vector<8x64xf32>
    %291 = arith.addf %288, %290 : vector<8x64xf32>
    %c0_138 = arith.constant 0 : index
    %c0_139 = arith.constant 0 : index
    %292 = vector.load %arg39[%c0_138, %c0_139] : memref<64x64xf32, #tpu.memory_space<vmem>>, vector<64x64xf32>
    %cst_140 = arith.constant dense<0.000000e+00> : vector<8x64xf32>
    %293 = tpu.matmul %279, %292, %cst_140 {dimension_numbers = #tpu.dot_dimension_numbers<[1], [0], [0], [1], [0, 0, 1, 1], [], []>} : vector<8x64xf32>, vector<64x64xf32>, vector<8x64xf32> -> vector<8x64xf32>
    %c0_141 = arith.constant 0 : index
    %c0_142 = arith.constant 0 : index
    %294 = vector.load %arg40[%c0_141, %c0_142] : memref<1x64xf32, #tpu.memory_space<vmem>>, vector<1x64xf32>
    %295 = vector.broadcast %294 : vector<1x64xf32> to vector<8x64xf32>
    %296 = arith.addf %293, %295 : vector<8x64xf32>
    %297 = vector.extract_strided_slice %286 {offsets = [0, 0], sizes = [8, 16], strides = [1, 1]} : vector<8x64xf32> to vector<8x16xf32>
    %298 = vector.extract_strided_slice %291 {offsets = [0, 0], sizes = [8, 16], strides = [1, 1]} : vector<8x64xf32> to vector<8x16xf32>
    %cst_143 = arith.constant dense<0.000000e+00> : vector<8x8xf32>
    %299 = tpu.matmul %297, %298, %cst_143 {dimension_numbers = #tpu.dot_dimension_numbers<[1], [1], [0], [0], [0, 0, 1, 0], [], []>} : vector<8x16xf32>, vector<8x16xf32>, vector<8x8xf32> -> vector<8x8xf32>
    %300 = arith.addf %299, %73 : vector<8x8xf32>
    %cst_144 = arith.constant dense<0xFF800000> : vector<8xf32>
    %301 = vector.multi_reduction <maximumf>, %300, %cst_144 [1] : vector<8x8xf32> to vector<8xf32>
    %302 = vector.shape_cast %301 : vector<8xf32> to vector<8x1xf32>
    %303 = vector.broadcast %302 : vector<8x1xf32> to vector<8x8xf32>
    %304 = arith.subf %300, %303 : vector<8x8xf32>
    %305 = math.exp %304 : vector<8x8xf32>
    %cst_145 = arith.constant dense<0.000000e+00> : vector<8xf32>
    %306 = vector.multi_reduction <add>, %305, %cst_145 [1] : vector<8x8xf32> to vector<8xf32>
    %307 = vector.shape_cast %306 : vector<8xf32> to vector<8x1xf32>
    %308 = tpu.reciprocal %307 {approx = true} : vector<8x1xf32> -> vector<8x1xf32>
    %309 = vector.broadcast %308 : vector<8x1xf32> to vector<8x8xf32>
    %310 = arith.mulf %305, %309 : vector<8x8xf32>
    %311 = vector.extract_strided_slice %296 {offsets = [0, 0], sizes = [8, 16], strides = [1, 1]} : vector<8x64xf32> to vector<8x16xf32>
    %cst_146 = arith.constant dense<0.000000e+00> : vector<8x16xf32>
    %312 = tpu.matmul %310, %311, %cst_146 {dimension_numbers = #tpu.dot_dimension_numbers<[1], [0], [0], [1], [0, 0, 1, 1], [], []>} : vector<8x8xf32>, vector<8x16xf32>, vector<8x16xf32> -> vector<8x16xf32>
    %313 = vector.extract_strided_slice %286 {offsets = [0, 16], sizes = [8, 16], strides = [1, 1]} : vector<8x64xf32> to vector<8x16xf32>
    %314 = vector.extract_strided_slice %291 {offsets = [0, 16], sizes = [8, 16], strides = [1, 1]} : vector<8x64xf32> to vector<8x16xf32>
    %cst_147 = arith.constant dense<0.000000e+00> : vector<8x8xf32>
    %315 = tpu.matmul %313, %314, %cst_147 {dimension_numbers = #tpu.dot_dimension_numbers<[1], [1], [0], [0], [0, 0, 1, 0], [], []>} : vector<8x16xf32>, vector<8x16xf32>, vector<8x8xf32> -> vector<8x8xf32>
    %316 = arith.addf %315, %73 : vector<8x8xf32>
    %cst_148 = arith.constant dense<0xFF800000> : vector<8xf32>
    %317 = vector.multi_reduction <maximumf>, %316, %cst_148 [1] : vector<8x8xf32> to vector<8xf32>
    %318 = vector.shape_cast %317 : vector<8xf32> to vector<8x1xf32>
    %319 = vector.broadcast %318 : vector<8x1xf32> to vector<8x8xf32>
    %320 = arith.subf %316, %319 : vector<8x8xf32>
    %321 = math.exp %320 : vector<8x8xf32>
    %cst_149 = arith.constant dense<0.000000e+00> : vector<8xf32>
    %322 = vector.multi_reduction <add>, %321, %cst_149 [1] : vector<8x8xf32> to vector<8xf32>
    %323 = vector.shape_cast %322 : vector<8xf32> to vector<8x1xf32>
    %324 = tpu.reciprocal %323 {approx = true} : vector<8x1xf32> -> vector<8x1xf32>
    %325 = vector.broadcast %324 : vector<8x1xf32> to vector<8x8xf32>
    %326 = arith.mulf %321, %325 : vector<8x8xf32>
    %327 = vector.extract_strided_slice %296 {offsets = [0, 16], sizes = [8, 16], strides = [1, 1]} : vector<8x64xf32> to vector<8x16xf32>
    %cst_150 = arith.constant dense<0.000000e+00> : vector<8x16xf32>
    %328 = tpu.matmul %326, %327, %cst_150 {dimension_numbers = #tpu.dot_dimension_numbers<[1], [0], [0], [1], [0, 0, 1, 1], [], []>} : vector<8x8xf32>, vector<8x16xf32>, vector<8x16xf32> -> vector<8x16xf32>
    %329 = vector.extract_strided_slice %286 {offsets = [0, 32], sizes = [8, 16], strides = [1, 1]} : vector<8x64xf32> to vector<8x16xf32>
    %330 = vector.extract_strided_slice %291 {offsets = [0, 32], sizes = [8, 16], strides = [1, 1]} : vector<8x64xf32> to vector<8x16xf32>
    %cst_151 = arith.constant dense<0.000000e+00> : vector<8x8xf32>
    %331 = tpu.matmul %329, %330, %cst_151 {dimension_numbers = #tpu.dot_dimension_numbers<[1], [1], [0], [0], [0, 0, 1, 0], [], []>} : vector<8x16xf32>, vector<8x16xf32>, vector<8x8xf32> -> vector<8x8xf32>
    %332 = arith.addf %331, %73 : vector<8x8xf32>
    %cst_152 = arith.constant dense<0xFF800000> : vector<8xf32>
    %333 = vector.multi_reduction <maximumf>, %332, %cst_152 [1] : vector<8x8xf32> to vector<8xf32>
    %334 = vector.shape_cast %333 : vector<8xf32> to vector<8x1xf32>
    %335 = vector.broadcast %334 : vector<8x1xf32> to vector<8x8xf32>
    %336 = arith.subf %332, %335 : vector<8x8xf32>
    %337 = math.exp %336 : vector<8x8xf32>
    %cst_153 = arith.constant dense<0.000000e+00> : vector<8xf32>
    %338 = vector.multi_reduction <add>, %337, %cst_153 [1] : vector<8x8xf32> to vector<8xf32>
    %339 = vector.shape_cast %338 : vector<8xf32> to vector<8x1xf32>
    %340 = tpu.reciprocal %339 {approx = true} : vector<8x1xf32> -> vector<8x1xf32>
    %341 = vector.broadcast %340 : vector<8x1xf32> to vector<8x8xf32>
    %342 = arith.mulf %337, %341 : vector<8x8xf32>
    %343 = vector.extract_strided_slice %296 {offsets = [0, 32], sizes = [8, 16], strides = [1, 1]} : vector<8x64xf32> to vector<8x16xf32>
    %cst_154 = arith.constant dense<0.000000e+00> : vector<8x16xf32>
    %344 = tpu.matmul %342, %343, %cst_154 {dimension_numbers = #tpu.dot_dimension_numbers<[1], [0], [0], [1], [0, 0, 1, 1], [], []>} : vector<8x8xf32>, vector<8x16xf32>, vector<8x16xf32> -> vector<8x16xf32>
    %345 = vector.extract_strided_slice %286 {offsets = [0, 48], sizes = [8, 16], strides = [1, 1]} : vector<8x64xf32> to vector<8x16xf32>
    %346 = vector.extract_strided_slice %291 {offsets = [0, 48], sizes = [8, 16], strides = [1, 1]} : vector<8x64xf32> to vector<8x16xf32>
    %cst_155 = arith.constant dense<0.000000e+00> : vector<8x8xf32>
    %347 = tpu.matmul %345, %346, %cst_155 {dimension_numbers = #tpu.dot_dimension_numbers<[1], [1], [0], [0], [0, 0, 1, 0], [], []>} : vector<8x16xf32>, vector<8x16xf32>, vector<8x8xf32> -> vector<8x8xf32>
    %348 = arith.addf %347, %73 : vector<8x8xf32>
    %cst_156 = arith.constant dense<0xFF800000> : vector<8xf32>
    %349 = vector.multi_reduction <maximumf>, %348, %cst_156 [1] : vector<8x8xf32> to vector<8xf32>
    %350 = vector.shape_cast %349 : vector<8xf32> to vector<8x1xf32>
    %351 = vector.broadcast %350 : vector<8x1xf32> to vector<8x8xf32>
    %352 = arith.subf %348, %351 : vector<8x8xf32>
    %353 = math.exp %352 : vector<8x8xf32>
    %cst_157 = arith.constant dense<0.000000e+00> : vector<8xf32>
    %354 = vector.multi_reduction <add>, %353, %cst_157 [1] : vector<8x8xf32> to vector<8xf32>
    %355 = vector.shape_cast %354 : vector<8xf32> to vector<8x1xf32>
    %356 = tpu.reciprocal %355 {approx = true} : vector<8x1xf32> -> vector<8x1xf32>
    %357 = vector.broadcast %356 : vector<8x1xf32> to vector<8x8xf32>
    %358 = arith.mulf %353, %357 : vector<8x8xf32>
    %359 = vector.extract_strided_slice %296 {offsets = [0, 48], sizes = [8, 16], strides = [1, 1]} : vector<8x64xf32> to vector<8x16xf32>
    %cst_158 = arith.constant dense<0.000000e+00> : vector<8x16xf32>
    %360 = tpu.matmul %358, %359, %cst_158 {dimension_numbers = #tpu.dot_dimension_numbers<[1], [0], [0], [1], [0, 0, 1, 1], [], []>} : vector<8x8xf32>, vector<8x16xf32>, vector<8x16xf32> -> vector<8x16xf32>
    %361 = tpu.concatenate %312, %328, %344, %360 in 1 : vector<8x16xf32>, vector<8x16xf32>, vector<8x16xf32>, vector<8x16xf32> -> vector<8x64xf32>
    %c0_159 = arith.constant 0 : index
    %c0_160 = arith.constant 0 : index
    %362 = vector.load %arg41[%c0_159, %c0_160] : memref<64x64xf32, #tpu.memory_space<vmem>>, vector<64x64xf32>
    %cst_161 = arith.constant dense<0.000000e+00> : vector<8x64xf32>
    %363 = tpu.matmul %361, %362, %cst_161 {dimension_numbers = #tpu.dot_dimension_numbers<[1], [0], [0], [1], [0, 0, 1, 1], [], []>} : vector<8x64xf32>, vector<64x64xf32>, vector<8x64xf32> -> vector<8x64xf32>
    %c0_162 = arith.constant 0 : index
    %c0_163 = arith.constant 0 : index
    %364 = vector.load %arg42[%c0_162, %c0_163] : memref<1x64xf32, #tpu.memory_space<vmem>>, vector<1x64xf32>
    %365 = vector.broadcast %364 : vector<1x64xf32> to vector<8x64xf32>
    %366 = arith.addf %363, %365 : vector<8x64xf32>
    %367 = arith.addf %279, %366 : vector<8x64xf32>
    %c0_164 = arith.constant 0 : index
    %c0_165 = arith.constant 0 : index
    %368 = vector.load %arg43[%c0_164, %c0_165] : memref<1x64xf32, #tpu.memory_space<vmem>>, vector<1x64xf32>
    %c0_166 = arith.constant 0 : index
    %c0_167 = arith.constant 0 : index
    %369 = vector.load %arg44[%c0_166, %c0_167] : memref<1x64xf32, #tpu.memory_space<vmem>>, vector<1x64xf32>
    %cst_168 = arith.constant dense<0.000000e+00> : vector<8xf32>
    %370 = vector.multi_reduction <add>, %367, %cst_168 [1] : vector<8x64xf32> to vector<8xf32>
    %371 = vector.shape_cast %370 : vector<8xf32> to vector<8x1xf32>
    %cst_169 = arith.constant 6.400000e+01 : f32
    %372 = vector.broadcast %cst_169 : f32 to vector<8x1xf32>
    %373 = arith.divf %371, %372 : vector<8x1xf32>
    %374 = vector.broadcast %373 : vector<8x1xf32> to vector<8x64xf32>
    %375 = arith.subf %367, %374 : vector<8x64xf32>
    %376 = vector.broadcast %373 : vector<8x1xf32> to vector<8x64xf32>
    %377 = arith.subf %367, %376 : vector<8x64xf32>
    %378 = arith.mulf %375, %377 : vector<8x64xf32>
    %cst_170 = arith.constant dense<0.000000e+00> : vector<8xf32>
    %379 = vector.multi_reduction <add>, %378, %cst_170 [1] : vector<8x64xf32> to vector<8xf32>
    %380 = vector.shape_cast %379 : vector<8xf32> to vector<8x1xf32>
    %cst_171 = arith.constant 6.400000e+01 : f32
    %381 = vector.broadcast %cst_171 : f32 to vector<8x1xf32>
    %382 = arith.divf %380, %381 : vector<8x1xf32>
    %383 = vector.broadcast %373 : vector<8x1xf32> to vector<8x64xf32>
    %384 = arith.subf %367, %383 : vector<8x64xf32>
    %cst_172 = arith.constant 9.99999974E-6 : f32
    %385 = vector.broadcast %cst_172 : f32 to vector<8x1xf32>
    %386 = arith.addf %382, %385 : vector<8x1xf32>
    %387 = math.rsqrt %386 : vector<8x1xf32>
    %388 = vector.broadcast %387 : vector<8x1xf32> to vector<8x64xf32>
    %389 = arith.mulf %384, %388 : vector<8x64xf32>
    %390 = vector.broadcast %368 : vector<1x64xf32> to vector<8x64xf32>
    %391 = arith.mulf %389, %390 : vector<8x64xf32>
    %392 = vector.broadcast %369 : vector<1x64xf32> to vector<8x64xf32>
    %393 = arith.addf %391, %392 : vector<8x64xf32>
    %c0_173 = arith.constant 0 : index
    %c0_174 = arith.constant 0 : index
    %394 = vector.load %arg45[%c0_173, %c0_174] : memref<64x64xf32, #tpu.memory_space<vmem>>, vector<64x64xf32>
    %cst_175 = arith.constant dense<0.000000e+00> : vector<8x64xf32>
    %395 = tpu.matmul %393, %394, %cst_175 {dimension_numbers = #tpu.dot_dimension_numbers<[1], [0], [0], [1], [0, 0, 1, 1], [], []>} : vector<8x64xf32>, vector<64x64xf32>, vector<8x64xf32> -> vector<8x64xf32>
    %c0_176 = arith.constant 0 : index
    %c0_177 = arith.constant 0 : index
    %396 = vector.load %arg46[%c0_176, %c0_177] : memref<1x64xf32, #tpu.memory_space<vmem>>, vector<1x64xf32>
    %397 = vector.broadcast %396 : vector<1x64xf32> to vector<8x64xf32>
    %398 = arith.addf %395, %397 : vector<8x64xf32>
    %cst_178 = arith.constant 2.500000e-01 : f32
    %399 = vector.broadcast %cst_178 : f32 to vector<8x64xf32>
    %400 = arith.mulf %398, %399 : vector<8x64xf32>
    %c0_179 = arith.constant 0 : index
    %c0_180 = arith.constant 0 : index
    %401 = vector.load %arg47[%c0_179, %c0_180] : memref<64x64xf32, #tpu.memory_space<vmem>>, vector<64x64xf32>
    %cst_181 = arith.constant dense<0.000000e+00> : vector<8x64xf32>
    %402 = tpu.matmul %241, %401, %cst_181 {dimension_numbers = #tpu.dot_dimension_numbers<[1], [0], [0], [1], [0, 0, 1, 1], [], []>} : vector<8x64xf32>, vector<64x64xf32>, vector<8x64xf32> -> vector<8x64xf32>
    %c0_182 = arith.constant 0 : index
    %c0_183 = arith.constant 0 : index
    %403 = vector.load %arg48[%c0_182, %c0_183] : memref<1x64xf32, #tpu.memory_space<vmem>>, vector<1x64xf32>
    %404 = vector.broadcast %403 : vector<1x64xf32> to vector<8x64xf32>
    %405 = arith.addf %402, %404 : vector<8x64xf32>
    %c0_184 = arith.constant 0 : index
    %c0_185 = arith.constant 0 : index
    %406 = vector.load %arg49[%c0_184, %c0_185] : memref<64x64xf32, #tpu.memory_space<vmem>>, vector<64x64xf32>
    %cst_186 = arith.constant dense<0.000000e+00> : vector<8x64xf32>
    %407 = tpu.matmul %241, %406, %cst_186 {dimension_numbers = #tpu.dot_dimension_numbers<[1], [0], [0], [1], [0, 0, 1, 1], [], []>} : vector<8x64xf32>, vector<64x64xf32>, vector<8x64xf32> -> vector<8x64xf32>
    %c0_187 = arith.constant 0 : index
    %c0_188 = arith.constant 0 : index
    %408 = vector.load %arg50[%c0_187, %c0_188] : memref<1x64xf32, #tpu.memory_space<vmem>>, vector<1x64xf32>
    %409 = vector.broadcast %408 : vector<1x64xf32> to vector<8x64xf32>
    %410 = arith.addf %407, %409 : vector<8x64xf32>
    %411 = vector.extract_strided_slice %400 {offsets = [0, 0], sizes = [8, 16], strides = [1, 1]} : vector<8x64xf32> to vector<8x16xf32>
    %412 = vector.extract_strided_slice %405 {offsets = [0, 0], sizes = [8, 16], strides = [1, 1]} : vector<8x64xf32> to vector<8x16xf32>
    %cst_189 = arith.constant dense<0.000000e+00> : vector<8x8xf32>
    %413 = tpu.matmul %411, %412, %cst_189 {dimension_numbers = #tpu.dot_dimension_numbers<[1], [1], [0], [0], [0, 0, 1, 0], [], []>} : vector<8x16xf32>, vector<8x16xf32>, vector<8x8xf32> -> vector<8x8xf32>
    %414 = vector.broadcast %59 : vector<1x8xf32> to vector<8x8xf32>
    %415 = arith.addf %413, %414 : vector<8x8xf32>
    %cst_190 = arith.constant dense<0xFF800000> : vector<8xf32>
    %416 = vector.multi_reduction <maximumf>, %415, %cst_190 [1] : vector<8x8xf32> to vector<8xf32>
    %417 = vector.shape_cast %416 : vector<8xf32> to vector<8x1xf32>
    %418 = vector.broadcast %417 : vector<8x1xf32> to vector<8x8xf32>
    %419 = arith.subf %415, %418 : vector<8x8xf32>
    %420 = math.exp %419 : vector<8x8xf32>
    %cst_191 = arith.constant dense<0.000000e+00> : vector<8xf32>
    %421 = vector.multi_reduction <add>, %420, %cst_191 [1] : vector<8x8xf32> to vector<8xf32>
    %422 = vector.shape_cast %421 : vector<8xf32> to vector<8x1xf32>
    %423 = tpu.reciprocal %422 {approx = true} : vector<8x1xf32> -> vector<8x1xf32>
    %424 = vector.broadcast %423 : vector<8x1xf32> to vector<8x8xf32>
    %425 = arith.mulf %420, %424 : vector<8x8xf32>
    %426 = vector.extract_strided_slice %410 {offsets = [0, 0], sizes = [8, 16], strides = [1, 1]} : vector<8x64xf32> to vector<8x16xf32>
    %cst_192 = arith.constant dense<0.000000e+00> : vector<8x16xf32>
    %427 = tpu.matmul %425, %426, %cst_192 {dimension_numbers = #tpu.dot_dimension_numbers<[1], [0], [0], [1], [0, 0, 1, 1], [], []>} : vector<8x8xf32>, vector<8x16xf32>, vector<8x16xf32> -> vector<8x16xf32>
    %428 = vector.extract_strided_slice %400 {offsets = [0, 16], sizes = [8, 16], strides = [1, 1]} : vector<8x64xf32> to vector<8x16xf32>
    %429 = vector.extract_strided_slice %405 {offsets = [0, 16], sizes = [8, 16], strides = [1, 1]} : vector<8x64xf32> to vector<8x16xf32>
    %cst_193 = arith.constant dense<0.000000e+00> : vector<8x8xf32>
    %430 = tpu.matmul %428, %429, %cst_193 {dimension_numbers = #tpu.dot_dimension_numbers<[1], [1], [0], [0], [0, 0, 1, 0], [], []>} : vector<8x16xf32>, vector<8x16xf32>, vector<8x8xf32> -> vector<8x8xf32>
    %431 = vector.broadcast %59 : vector<1x8xf32> to vector<8x8xf32>
    %432 = arith.addf %430, %431 : vector<8x8xf32>
    %cst_194 = arith.constant dense<0xFF800000> : vector<8xf32>
    %433 = vector.multi_reduction <maximumf>, %432, %cst_194 [1] : vector<8x8xf32> to vector<8xf32>
    %434 = vector.shape_cast %433 : vector<8xf32> to vector<8x1xf32>
    %435 = vector.broadcast %434 : vector<8x1xf32> to vector<8x8xf32>
    %436 = arith.subf %432, %435 : vector<8x8xf32>
    %437 = math.exp %436 : vector<8x8xf32>
    %cst_195 = arith.constant dense<0.000000e+00> : vector<8xf32>
    %438 = vector.multi_reduction <add>, %437, %cst_195 [1] : vector<8x8xf32> to vector<8xf32>
    %439 = vector.shape_cast %438 : vector<8xf32> to vector<8x1xf32>
    %440 = tpu.reciprocal %439 {approx = true} : vector<8x1xf32> -> vector<8x1xf32>
    %441 = vector.broadcast %440 : vector<8x1xf32> to vector<8x8xf32>
    %442 = arith.mulf %437, %441 : vector<8x8xf32>
    %443 = vector.extract_strided_slice %410 {offsets = [0, 16], sizes = [8, 16], strides = [1, 1]} : vector<8x64xf32> to vector<8x16xf32>
    %cst_196 = arith.constant dense<0.000000e+00> : vector<8x16xf32>
    %444 = tpu.matmul %442, %443, %cst_196 {dimension_numbers = #tpu.dot_dimension_numbers<[1], [0], [0], [1], [0, 0, 1, 1], [], []>} : vector<8x8xf32>, vector<8x16xf32>, vector<8x16xf32> -> vector<8x16xf32>
    %445 = vector.extract_strided_slice %400 {offsets = [0, 32], sizes = [8, 16], strides = [1, 1]} : vector<8x64xf32> to vector<8x16xf32>
    %446 = vector.extract_strided_slice %405 {offsets = [0, 32], sizes = [8, 16], strides = [1, 1]} : vector<8x64xf32> to vector<8x16xf32>
    %cst_197 = arith.constant dense<0.000000e+00> : vector<8x8xf32>
    %447 = tpu.matmul %445, %446, %cst_197 {dimension_numbers = #tpu.dot_dimension_numbers<[1], [1], [0], [0], [0, 0, 1, 0], [], []>} : vector<8x16xf32>, vector<8x16xf32>, vector<8x8xf32> -> vector<8x8xf32>
    %448 = vector.broadcast %59 : vector<1x8xf32> to vector<8x8xf32>
    %449 = arith.addf %447, %448 : vector<8x8xf32>
    %cst_198 = arith.constant dense<0xFF800000> : vector<8xf32>
    %450 = vector.multi_reduction <maximumf>, %449, %cst_198 [1] : vector<8x8xf32> to vector<8xf32>
    %451 = vector.shape_cast %450 : vector<8xf32> to vector<8x1xf32>
    %452 = vector.broadcast %451 : vector<8x1xf32> to vector<8x8xf32>
    %453 = arith.subf %449, %452 : vector<8x8xf32>
    %454 = math.exp %453 : vector<8x8xf32>
    %cst_199 = arith.constant dense<0.000000e+00> : vector<8xf32>
    %455 = vector.multi_reduction <add>, %454, %cst_199 [1] : vector<8x8xf32> to vector<8xf32>
    %456 = vector.shape_cast %455 : vector<8xf32> to vector<8x1xf32>
    %457 = tpu.reciprocal %456 {approx = true} : vector<8x1xf32> -> vector<8x1xf32>
    %458 = vector.broadcast %457 : vector<8x1xf32> to vector<8x8xf32>
    %459 = arith.mulf %454, %458 : vector<8x8xf32>
    %460 = vector.extract_strided_slice %410 {offsets = [0, 32], sizes = [8, 16], strides = [1, 1]} : vector<8x64xf32> to vector<8x16xf32>
    %cst_200 = arith.constant dense<0.000000e+00> : vector<8x16xf32>
    %461 = tpu.matmul %459, %460, %cst_200 {dimension_numbers = #tpu.dot_dimension_numbers<[1], [0], [0], [1], [0, 0, 1, 1], [], []>} : vector<8x8xf32>, vector<8x16xf32>, vector<8x16xf32> -> vector<8x16xf32>
    %462 = vector.extract_strided_slice %400 {offsets = [0, 48], sizes = [8, 16], strides = [1, 1]} : vector<8x64xf32> to vector<8x16xf32>
    %463 = vector.extract_strided_slice %405 {offsets = [0, 48], sizes = [8, 16], strides = [1, 1]} : vector<8x64xf32> to vector<8x16xf32>
    %cst_201 = arith.constant dense<0.000000e+00> : vector<8x8xf32>
    %464 = tpu.matmul %462, %463, %cst_201 {dimension_numbers = #tpu.dot_dimension_numbers<[1], [1], [0], [0], [0, 0, 1, 0], [], []>} : vector<8x16xf32>, vector<8x16xf32>, vector<8x8xf32> -> vector<8x8xf32>
    %465 = vector.broadcast %59 : vector<1x8xf32> to vector<8x8xf32>
    %466 = arith.addf %464, %465 : vector<8x8xf32>
    %cst_202 = arith.constant dense<0xFF800000> : vector<8xf32>
    %467 = vector.multi_reduction <maximumf>, %466, %cst_202 [1] : vector<8x8xf32> to vector<8xf32>
    %468 = vector.shape_cast %467 : vector<8xf32> to vector<8x1xf32>
    %469 = vector.broadcast %468 : vector<8x1xf32> to vector<8x8xf32>
    %470 = arith.subf %466, %469 : vector<8x8xf32>
    %471 = math.exp %470 : vector<8x8xf32>
    %cst_203 = arith.constant dense<0.000000e+00> : vector<8xf32>
    %472 = vector.multi_reduction <add>, %471, %cst_203 [1] : vector<8x8xf32> to vector<8xf32>
    %473 = vector.shape_cast %472 : vector<8xf32> to vector<8x1xf32>
    %474 = tpu.reciprocal %473 {approx = true} : vector<8x1xf32> -> vector<8x1xf32>
    %475 = vector.broadcast %474 : vector<8x1xf32> to vector<8x8xf32>
    %476 = arith.mulf %471, %475 : vector<8x8xf32>
    %477 = vector.extract_strided_slice %410 {offsets = [0, 48], sizes = [8, 16], strides = [1, 1]} : vector<8x64xf32> to vector<8x16xf32>
    %cst_204 = arith.constant dense<0.000000e+00> : vector<8x16xf32>
    %478 = tpu.matmul %476, %477, %cst_204 {dimension_numbers = #tpu.dot_dimension_numbers<[1], [0], [0], [1], [0, 0, 1, 1], [], []>} : vector<8x8xf32>, vector<8x16xf32>, vector<8x16xf32> -> vector<8x16xf32>
    %479 = tpu.concatenate %427, %444, %461, %478 in 1 : vector<8x16xf32>, vector<8x16xf32>, vector<8x16xf32>, vector<8x16xf32> -> vector<8x64xf32>
    %c0_205 = arith.constant 0 : index
    %c0_206 = arith.constant 0 : index
    %480 = vector.load %arg51[%c0_205, %c0_206] : memref<64x64xf32, #tpu.memory_space<vmem>>, vector<64x64xf32>
    %cst_207 = arith.constant dense<0.000000e+00> : vector<8x64xf32>
    %481 = tpu.matmul %479, %480, %cst_207 {dimension_numbers = #tpu.dot_dimension_numbers<[1], [0], [0], [1], [0, 0, 1, 1], [], []>} : vector<8x64xf32>, vector<64x64xf32>, vector<8x64xf32> -> vector<8x64xf32>
    %c0_208 = arith.constant 0 : index
    %c0_209 = arith.constant 0 : index
    %482 = vector.load %arg52[%c0_208, %c0_209] : memref<1x64xf32, #tpu.memory_space<vmem>>, vector<1x64xf32>
    %483 = vector.broadcast %482 : vector<1x64xf32> to vector<8x64xf32>
    %484 = arith.addf %481, %483 : vector<8x64xf32>
    %485 = arith.addf %393, %484 : vector<8x64xf32>
    %c0_210 = arith.constant 0 : index
    %c0_211 = arith.constant 0 : index
    %486 = vector.load %arg53[%c0_210, %c0_211] : memref<1x64xf32, #tpu.memory_space<vmem>>, vector<1x64xf32>
    %c0_212 = arith.constant 0 : index
    %c0_213 = arith.constant 0 : index
    %487 = vector.load %arg54[%c0_212, %c0_213] : memref<1x64xf32, #tpu.memory_space<vmem>>, vector<1x64xf32>
    %cst_214 = arith.constant dense<0.000000e+00> : vector<8xf32>
    %488 = vector.multi_reduction <add>, %485, %cst_214 [1] : vector<8x64xf32> to vector<8xf32>
    %489 = vector.shape_cast %488 : vector<8xf32> to vector<8x1xf32>
    %cst_215 = arith.constant 6.400000e+01 : f32
    %490 = vector.broadcast %cst_215 : f32 to vector<8x1xf32>
    %491 = arith.divf %489, %490 : vector<8x1xf32>
    %492 = vector.broadcast %491 : vector<8x1xf32> to vector<8x64xf32>
    %493 = arith.subf %485, %492 : vector<8x64xf32>
    %494 = vector.broadcast %491 : vector<8x1xf32> to vector<8x64xf32>
    %495 = arith.subf %485, %494 : vector<8x64xf32>
    %496 = arith.mulf %493, %495 : vector<8x64xf32>
    %cst_216 = arith.constant dense<0.000000e+00> : vector<8xf32>
    %497 = vector.multi_reduction <add>, %496, %cst_216 [1] : vector<8x64xf32> to vector<8xf32>
    %498 = vector.shape_cast %497 : vector<8xf32> to vector<8x1xf32>
    %cst_217 = arith.constant 6.400000e+01 : f32
    %499 = vector.broadcast %cst_217 : f32 to vector<8x1xf32>
    %500 = arith.divf %498, %499 : vector<8x1xf32>
    %501 = vector.broadcast %491 : vector<8x1xf32> to vector<8x64xf32>
    %502 = arith.subf %485, %501 : vector<8x64xf32>
    %cst_218 = arith.constant 9.99999974E-6 : f32
    %503 = vector.broadcast %cst_218 : f32 to vector<8x1xf32>
    %504 = arith.addf %500, %503 : vector<8x1xf32>
    %505 = math.rsqrt %504 : vector<8x1xf32>
    %506 = vector.broadcast %505 : vector<8x1xf32> to vector<8x64xf32>
    %507 = arith.mulf %502, %506 : vector<8x64xf32>
    %508 = vector.broadcast %486 : vector<1x64xf32> to vector<8x64xf32>
    %509 = arith.mulf %507, %508 : vector<8x64xf32>
    %510 = vector.broadcast %487 : vector<1x64xf32> to vector<8x64xf32>
    %511 = arith.addf %509, %510 : vector<8x64xf32>
    %c0_219 = arith.constant 0 : index
    %c0_220 = arith.constant 0 : index
    %512 = vector.load %arg55[%c0_219, %c0_220] : memref<64x128xf32, #tpu.memory_space<vmem>>, vector<64x128xf32>
    %cst_221 = arith.constant dense<0.000000e+00> : vector<8x128xf32>
    %513 = tpu.matmul %511, %512, %cst_221 {dimension_numbers = #tpu.dot_dimension_numbers<[1], [0], [0], [1], [0, 0, 1, 1], [], []>} : vector<8x64xf32>, vector<64x128xf32>, vector<8x128xf32> -> vector<8x128xf32>
    %c0_222 = arith.constant 0 : index
    %c0_223 = arith.constant 0 : index
    %514 = vector.load %arg56[%c0_222, %c0_223] : memref<1x128xf32, #tpu.memory_space<vmem>>, vector<1x128xf32>
    %515 = vector.broadcast %514 : vector<1x128xf32> to vector<8x128xf32>
    %516 = arith.addf %513, %515 : vector<8x128xf32>
    %cst_224 = arith.constant 5.000000e-01 : f32
    %517 = vector.broadcast %cst_224 : f32 to vector<8x128xf32>
    %518 = arith.mulf %517, %516 : vector<8x128xf32>
    %cst_225 = arith.constant 4.471500e-02 : f32
    %519 = vector.broadcast %cst_225 : f32 to vector<8x128xf32>
    %520 = arith.mulf %519, %516 : vector<8x128xf32>
    %521 = arith.mulf %520, %516 : vector<8x128xf32>
    %522 = arith.mulf %521, %516 : vector<8x128xf32>
    %523 = arith.addf %516, %522 : vector<8x128xf32>
    %cst_226 = arith.constant 0.797884583 : f32
    %524 = vector.broadcast %cst_226 : f32 to vector<8x128xf32>
    %525 = arith.mulf %524, %523 : vector<8x128xf32>
    %526 = math.tanh %525 : vector<8x128xf32>
    %cst_227 = arith.constant 1.000000e+00 : f32
    %527 = vector.broadcast %cst_227 : f32 to vector<8x128xf32>
    %528 = arith.addf %527, %526 : vector<8x128xf32>
    %529 = arith.mulf %518, %528 : vector<8x128xf32>
    %c0_228 = arith.constant 0 : index
    %c0_229 = arith.constant 0 : index
    %530 = vector.load %arg57[%c0_228, %c0_229] : memref<128x64xf32, #tpu.memory_space<vmem>>, vector<128x64xf32>
    %cst_230 = arith.constant dense<0.000000e+00> : vector<8x64xf32>
    %531 = tpu.matmul %529, %530, %cst_230 {dimension_numbers = #tpu.dot_dimension_numbers<[1], [0], [0], [1], [0, 0, 1, 1], [], []>} : vector<8x128xf32>, vector<128x64xf32>, vector<8x64xf32> -> vector<8x64xf32>
    %c0_231 = arith.constant 0 : index
    %c0_232 = arith.constant 0 : index
    %532 = vector.load %arg58[%c0_231, %c0_232] : memref<1x64xf32, #tpu.memory_space<vmem>>, vector<1x64xf32>
    %533 = vector.broadcast %532 : vector<1x64xf32> to vector<8x64xf32>
    %534 = arith.addf %531, %533 : vector<8x64xf32>
    %535 = arith.addf %511, %534 : vector<8x64xf32>
    %c0_233 = arith.constant 0 : index
    %c0_234 = arith.constant 0 : index
    %536 = vector.load %arg59[%c0_233, %c0_234] : memref<1x64xf32, #tpu.memory_space<vmem>>, vector<1x64xf32>
    %c0_235 = arith.constant 0 : index
    %c0_236 = arith.constant 0 : index
    %537 = vector.load %arg60[%c0_235, %c0_236] : memref<1x64xf32, #tpu.memory_space<vmem>>, vector<1x64xf32>
    %cst_237 = arith.constant dense<0.000000e+00> : vector<8xf32>
    %538 = vector.multi_reduction <add>, %535, %cst_237 [1] : vector<8x64xf32> to vector<8xf32>
    %539 = vector.shape_cast %538 : vector<8xf32> to vector<8x1xf32>
    %cst_238 = arith.constant 6.400000e+01 : f32
    %540 = vector.broadcast %cst_238 : f32 to vector<8x1xf32>
    %541 = arith.divf %539, %540 : vector<8x1xf32>
    %542 = vector.broadcast %541 : vector<8x1xf32> to vector<8x64xf32>
    %543 = arith.subf %535, %542 : vector<8x64xf32>
    %544 = vector.broadcast %541 : vector<8x1xf32> to vector<8x64xf32>
    %545 = arith.subf %535, %544 : vector<8x64xf32>
    %546 = arith.mulf %543, %545 : vector<8x64xf32>
    %cst_239 = arith.constant dense<0.000000e+00> : vector<8xf32>
    %547 = vector.multi_reduction <add>, %546, %cst_239 [1] : vector<8x64xf32> to vector<8xf32>
    %548 = vector.shape_cast %547 : vector<8xf32> to vector<8x1xf32>
    %cst_240 = arith.constant 6.400000e+01 : f32
    %549 = vector.broadcast %cst_240 : f32 to vector<8x1xf32>
    %550 = arith.divf %548, %549 : vector<8x1xf32>
    %551 = vector.broadcast %541 : vector<8x1xf32> to vector<8x64xf32>
    %552 = arith.subf %535, %551 : vector<8x64xf32>
    %cst_241 = arith.constant 9.99999974E-6 : f32
    %553 = vector.broadcast %cst_241 : f32 to vector<8x1xf32>
    %554 = arith.addf %550, %553 : vector<8x1xf32>
    %555 = math.rsqrt %554 : vector<8x1xf32>
    %556 = vector.broadcast %555 : vector<8x1xf32> to vector<8x64xf32>
    %557 = arith.mulf %552, %556 : vector<8x64xf32>
    %558 = vector.broadcast %536 : vector<1x64xf32> to vector<8x64xf32>
    %559 = arith.mulf %557, %558 : vector<8x64xf32>
    %560 = vector.broadcast %537 : vector<1x64xf32> to vector<8x64xf32>
    %561 = arith.addf %559, %560 : vector<8x64xf32>
    %cst_242 = arith.constant dense<0.000000e+00> : vector<8x128xf32>
    %562 = tpu.matmul %561, %0, %cst_242 {dimension_numbers = #tpu.dot_dimension_numbers<[1], [1], [0], [0], [0, 0, 1, 0], [], []>} : vector<8x64xf32>, vector<128x64xf32>, vector<8x128xf32> -> vector<8x128xf32>
    %c0_243 = arith.constant 0 : index
    %c0_244 = arith.constant 0 : index
    %563 = vector.load %arg8[%c0_243, %c0_244] : memref<1x128xf32, #tpu.memory_space<vmem>>, vector<1x128xf32>
    %564 = vector.broadcast %563 : vector<1x128xf32> to vector<8x128xf32>
    %565 = arith.addf %562, %564 : vector<8x128xf32>
    %c0_245 = arith.constant 0 : index
    %c0_246 = arith.constant 0 : index
    %c0_247 = arith.constant 0 : index
    %566 = vector.load %arg61[%c0_245, %c0_246, %c0_247] : memref<1x8x128xf32, #tpu.memory_space<vmem>>, vector<1x8x128xf32>
    %567 = vector.shape_cast %566 : vector<1x8x128xf32> to vector<8x128xf32>
    %568 = vector.shape_cast %565 : vector<8x128xf32> to vector<1x8x128xf32>
    tpu.vector_store %arg61[%c0_245, %c0_246, %c0_247], %568 {strides = array<i32>} : memref<1x8x128xf32, #tpu.memory_space<vmem>>, vector<1x8x128xf32>,
    %cst_248 = arith.constant dense<0xFF800000> : vector<8xf32>
    %569 = vector.multi_reduction <maximumf>, %565, %cst_248 [1] : vector<8x128xf32> to vector<8xf32>
    %570 = vector.shape_cast %569 : vector<8xf32> to vector<8x1xf32>
    %571 = vector.broadcast %570 : vector<8x1xf32> to vector<8x128xf32>
    %572 = arith.subf %565, %571 : vector<8x128xf32>
    %573 = math.exp %572 : vector<8x128xf32>
    %cst_249 = arith.constant dense<0.000000e+00> : vector<8xf32>
    %574 = vector.multi_reduction <add>, %573, %cst_249 [1] : vector<8x128xf32> to vector<8xf32>
    %575 = vector.shape_cast %574 : vector<8xf32> to vector<8x1xf32>
    %576 = math.log %575 : vector<8x1xf32>
    %577 = arith.addf %576, %570 : vector<8x1xf32>
    %c0_250 = arith.constant 0 : index
    %c0_251 = arith.constant 0 : index
    %c0_252 = arith.constant 0 : index
    %578 = vector.load %arg4[%c0_250, %c0_251, %c0_252] : memref<1x8x1xi32, #tpu.memory_space<vmem>>, vector<1x8x1xi32>
    %579 = vector.shape_cast %578 : vector<1x8x1xi32> to vector<8x1xi32>
    %580 = tpu.iota {dimensions = array<i32: 1>} : vector<8x128xi32>
    %581 = vector.broadcast %579 : vector<8x1xi32> to vector<8x128xi32>
    %582 = arith.cmpi eq, %580, %581 : vector<8x128xi32>
    %cst_253 = arith.constant 0.000000e+00 : f32
    %583 = vector.broadcast %cst_253 : f32 to vector<8x128xf32>
    %584 = arith.select %582, %565, %583 : vector<8x128xi1>, vector<8x128xf32>
    %cst_254 = arith.constant dense<0.000000e+00> : vector<8xf32>
    %585 = vector.multi_reduction <add>, %584, %cst_254 [1] : vector<8x128xf32> to vector<8xf32>
    %586 = vector.shape_cast %585 : vector<8xf32> to vector<8x1xf32>
    %c0_i32 = arith.constant 0 : i32
    %587 = vector.broadcast %c0_i32 : i32 to vector<8x1xi32>
    %588 = arith.cmpi sge, %579, %587 : vector<8x1xi32>
    %589 = arith.extui %588 : vector<8x1xi1> to vector<8x1xi32>
    %590 = arith.sitofp %589 : vector<8x1xi32> to vector<8x1xf32>
    %591 = arith.subf %577, %586 : vector<8x1xf32>
    %592 = arith.mulf %591, %590 : vector<8x1xf32>
    %cst_255 = arith.constant dense<0.000000e+00> : vector<1xf32>
    %593 = vector.multi_reduction <add>, %592, %cst_255 [0] : vector<8x1xf32> to vector<1xf32>
    %594 = vector.shape_cast %593 : vector<1xf32> to vector<1x1xf32>
    %cst_256 = arith.constant dense<0.000000e+00> : vector<1xf32>
    %595 = vector.multi_reduction <add>, %590, %cst_256 [0] : vector<8x1xf32> to vector<1xf32>
    %596 = vector.shape_cast %595 : vector<1xf32> to vector<1x1xf32>
    %597 = tpu.iota {dimensions = array<i32: 1>} : vector<1x128xi32>
    %c0_i32_257 = arith.constant 0 : i32
    %598 = vector.broadcast %c0_i32_257 : i32 to vector<1x128xi32>
    %599 = arith.cmpi eq, %597, %598 : vector<1x128xi32>
    %c1_i32 = arith.constant 1 : i32
    %600 = vector.broadcast %c1_i32 : i32 to vector<1x128xi32>
    %601 = arith.cmpi eq, %597, %600 : vector<1x128xi32>
    %cst_258 = arith.constant 0.000000e+00 : f32
    %602 = vector.shape_cast %596 : vector<1x1xf32> to vector<1x1xf32>
    %603 = vector.broadcast %602 : vector<1x1xf32> to vector<1x128xf32>
    %604 = vector.broadcast %cst_258 : f32 to vector<1x128xf32>
    %605 = arith.select %601, %603, %604 : vector<1x128xi1>, vector<1x128xf32>
    %606 = vector.shape_cast %594 : vector<1x1xf32> to vector<1x1xf32>
    %607 = vector.broadcast %606 : vector<1x1xf32> to vector<1x128xf32>
    %608 = arith.select %599, %607, %605 : vector<1x128xi1>, vector<1x128xf32>
    %c0_259 = arith.constant 0 : index
    %c0_260 = arith.constant 0 : index
    %c0_261 = arith.constant 0 : index
    %609 = vector.load %arg62[%c0_259, %c0_260, %c0_261] : memref<1x1x128xf32, #tpu.memory_space<vmem>>, vector<1x1x128xf32>
    %610 = vector.shape_cast %609 : vector<1x1x128xf32> to vector<1x128xf32>
    %611 = vector.shape_cast %608 : vector<1x128xf32> to vector<1x1x128xf32>
    tpu.vector_store %arg62[%c0_259, %c0_260, %c0_261], %611 {strides = array<i32>} : memref<1x1x128xf32, #tpu.memory_space<vmem>>, vector<1x1x128xf32>,
    return
  }
  func.func @transform_0(%arg0: i32) -> (i32, i32, i32) {
    %c0_i32 = arith.constant 0 : i32
    %c0_i32_0 = arith.constant 0 : i32
    %c0_i32_1 = arith.constant 0 : i32
    return %arg0, %c0_i32, %c0_i32_0 : i32, i32, i32
  }
  func.func @transform_1(%arg0: i32) -> (i32, i32, i32) {
    %c0_i32 = arith.constant 0 : i32
    %c0_i32_0 = arith.constant 0 : i32
    %c0_i32_1 = arith.constant 0 : i32
    return %arg0, %c0_i32, %c0_i32_0 : i32, i32, i32
  }
  func.func @transform_2(%arg0: i32) -> (i32, i32, i32) {
    %c0_i32 = arith.constant 0 : i32
    %c0_i32_0 = arith.constant 0 : i32
    %c0_i32_1 = arith.constant 0 : i32
    return %arg0, %c0_i32, %c0_i32_0 : i32, i32, i32
  }
  func.func @transform_3(%arg0: i32) -> (i32, i32, i32) {
    %c0_i32 = arith.constant 0 : i32
    %c0_i32_0 = arith.constant 0 : i32
    %c0_i32_1 = arith.constant 0 : i32
    return %arg0, %c0_i32, %c0_i32_0 : i32, i32, i32
  }
  func.func @transform_4(%arg0: i32) -> (i32, i32, i32) {
    %c0_i32 = arith.constant 0 : i32
    %c0_i32_0 = arith.constant 0 : i32
    %c0_i32_1 = arith.constant 0 : i32
    return %arg0, %c0_i32, %c0_i32_0 : i32, i32, i32
  }
  func.func @transform_5(%arg0: i32) -> (i32, i32, i32) {
    %c0_i32 = arith.constant 0 : i32
    %c0_i32_0 = arith.constant 0 : i32
    %c0_i32_1 = arith.constant 0 : i32
    return %arg0, %c0_i32, %c0_i32_0 : i32, i32, i32
  }
  func.func @transform_6(%arg0: i32) -> (i32, i32) {
    %c0_i32 = arith.constant 0 : i32
    %c0_i32_0 = arith.constant 0 : i32
    %c0_i32_1 = arith.constant 0 : i32
    return %c0_i32, %c0_i32_0 : i32, i32
  }
  func.func @transform_7(%arg0: i32) -> (i32, i32) {
    %c0_i32 = arith.constant 0 : i32
    %c0_i32_0 = arith.constant 0 : i32
    %c0_i32_1 = arith.constant 0 : i32
    return %c0_i32, %c0_i32_0 : i32, i32
  }
  func.func @transform_8(%arg0: i32) -> (i32, i32) {
    %c0_i32 = arith.constant 0 : i32
    %c0_i32_0 = arith.constant 0 : i32
    %c0_i32_1 = arith.constant 0 : i32
    return %c0_i32, %c0_i32_0 : i32, i32
  }
  func.func @transform_9(%arg0: i32) -> (i32, i32) {
    %c0_i32 = arith.constant 0 : i32
    %c0_i32_0 = arith.constant 0 : i32
    %c0_i32_1 = arith.constant 0 : i32
    return %c0_i32, %c0_i32_0 : i32, i32
  }
  func.func @transform_10(%arg0: i32) -> (i32, i32) {
    %c0_i32 = arith.constant 0 : i32
    %c0_i32_0 = arith.constant 0 : i32
    %c0_i32_1 = arith.constant 0 : i32
    return %c0_i32, %c0_i32_0 : i32, i32
  }
  func.func @transform_11(%arg0: i32) -> (i32, i32) {
    %c0_i32 = arith.constant 0 : i32
    %c0_i32_0 = arith.constant 0 : i32
    %c0_i32_1 = arith.constant 0 : i32
    return %c0_i32, %c0_i32_0 : i32, i32
  }
  func.func @transform_12(%arg0: i32) -> (i32, i32) {
    %c0_i32 = arith.constant 0 : i32
    %c0_i32_0 = arith.constant 0 : i32
    %c0_i32_1 = arith.constant 0 : i32
    return %c0_i32, %c0_i32_0 : i32, i32
  }
  func.func @transform_13(%arg0: i32) -> (i32, i32) {
    %c0_i32 = arith.constant 0 : i32
    %c0_i32_0 = arith.constant 0 : i32
    %c0_i32_1 = arith.constant 0 : i32
    return %c0_i32, %c0_i32_0 : i32, i32
  }
  func.func @transform_14(%arg0: i32) -> (i32, i32) {
    %c0_i32 = arith.constant 0 : i32
    %c0_i32_0 = arith.constant 0 : i32
    %c0_i32_1 = arith.constant 0 : i32
    return %c0_i32, %c0_i32_0 : i32, i32
  }
  func.func @transform_15(%arg0: i32) -> (i32, i32) {
    %c0_i32 = arith.constant 0 : i32
    %c0_i32_0 = arith.constant 0 : i32
    %c0_i32_1 = arith.constant 0 : i32
    return %c0_i32, %c0_i32_0 : i32, i32
  }
  func.func @transform_16(%arg0: i32) -> (i32, i32) {
    %c0_i32 = arith.constant 0 : i32
    %c0_i32_0 = arith.constant 0 : i32
    %c0_i32_1 = arith.constant 0 : i32
    return %c0_i32, %c0_i32_0 : i32, i32
  }
  func.func @transform_17(%arg0: i32) -> (i32, i32) {
    %c0_i32 = arith.constant 0 : i32
    %c0_i32_0 = arith.constant 0 : i32
    %c0_i32_1 = arith.constant 0 : i32
    return %c0_i32, %c0_i32_0 : i32, i32
  }
  func.func @transform_18(%arg0: i32) -> (i32, i32) {
    %c0_i32 = arith.constant 0 : i32
    %c0_i32_0 = arith.constant 0 : i32
    %c0_i32_1 = arith.constant 0 : i32
    return %c0_i32, %c0_i32_0 : i32, i32
  }
  func.func @transform_19(%arg0: i32) -> (i32, i32) {
    %c0_i32 = arith.constant 0 : i32
    %c0_i32_0 = arith.constant 0 : i32
    %c0_i32_1 = arith.constant 0 : i32
    return %c0_i32, %c0_i32_0 : i32, i32
  }
  func.func @transform_20(%arg0: i32) -> (i32, i32) {
    %c0_i32 = arith.constant 0 : i32
    %c0_i32_0 = arith.constant 0 : i32
    %c0_i32_1 = arith.constant 0 : i32
    return %c0_i32, %c0_i32_0 : i32, i32
  }
  func.func @transform_21(%arg0: i32) -> (i32, i32) {
    %c0_i32 = arith.constant 0 : i32
    %c0_i32_0 = arith.constant 0 : i32
    %c0_i32_1 = arith.constant 0 : i32
    return %c0_i32, %c0_i32_0 : i32, i32
  }
  func.func @transform_22(%arg0: i32) -> (i32, i32) {
    %c0_i32 = arith.constant 0 : i32
    %c0_i32_0 = arith.constant 0 : i32
    %c0_i32_1 = arith.constant 0 : i32
    return %c0_i32, %c0_i32_0 : i32, i32
  }
  func.func @transform_23(%arg0: i32) -> (i32, i32) {
    %c0_i32 = arith.constant 0 : i32
    %c0_i32_0 = arith.constant 0 : i32
    %c0_i32_1 = arith.constant 0 : i32
    return %c0_i32, %c0_i32_0 : i32, i32
  }
  func.func @transform_24(%arg0: i32) -> (i32, i32) {
    %c0_i32 = arith.constant 0 : i32
    %c0_i32_0 = arith.constant 0 : i32
    %c0_i32_1 = arith.constant 0 : i32
    return %c0_i32, %c0_i32_0 : i32, i32
  }
  func.func @transform_25(%arg0: i32) -> (i32, i32) {
    %c0_i32 = arith.constant 0 : i32
    %c0_i32_0 = arith.constant 0 : i32
    %c0_i32_1 = arith.constant 0 : i32
    return %c0_i32, %c0_i32_0 : i32, i32
  }
  func.func @transform_26(%arg0: i32) -> (i32, i32) {
    %c0_i32 = arith.constant 0 : i32
    %c0_i32_0 = arith.constant 0 : i32
    %c0_i32_1 = arith.constant 0 : i32
    return %c0_i32, %c0_i32_0 : i32, i32
  }
  func.func @transform_27(%arg0: i32) -> (i32, i32) {
    %c0_i32 = arith.constant 0 : i32
    %c0_i32_0 = arith.constant 0 : i32
    %c0_i32_1 = arith.constant 0 : i32
    return %c0_i32, %c0_i32_0 : i32, i32
  }
  func.func @transform_28(%arg0: i32) -> (i32, i32) {
    %c0_i32 = arith.constant 0 : i32
    %c0_i32_0 = arith.constant 0 : i32
    %c0_i32_1 = arith.constant 0 : i32
    return %c0_i32, %c0_i32_0 : i32, i32
  }
  func.func @transform_29(%arg0: i32) -> (i32, i32) {
    %c0_i32 = arith.constant 0 : i32
    %c0_i32_0 = arith.constant 0 : i32
    %c0_i32_1 = arith.constant 0 : i32
    return %c0_i32, %c0_i32_0 : i32, i32
  }
  func.func @transform_30(%arg0: i32) -> (i32, i32) {
    %c0_i32 = arith.constant 0 : i32
    %c0_i32_0 = arith.constant 0 : i32
    %c0_i32_1 = arith.constant 0 : i32
    return %c0_i32, %c0_i32_0 : i32, i32
  }
  func.func @transform_31(%arg0: i32) -> (i32, i32) {
    %c0_i32 = arith.constant 0 : i32
    %c0_i32_0 = arith.constant 0 : i32
    %c0_i32_1 = arith.constant 0 : i32
    return %c0_i32, %c0_i32_0 : i32, i32
  }
  func.func @transform_32(%arg0: i32) -> (i32, i32) {
    %c0_i32 = arith.constant 0 : i32
    %c0_i32_0 = arith.constant 0 : i32
    %c0_i32_1 = arith.constant 0 : i32
    return %c0_i32, %c0_i32_0 : i32, i32
  }
  func.func @transform_33(%arg0: i32) -> (i32, i32) {
    %c0_i32 = arith.constant 0 : i32
    %c0_i32_0 = arith.constant 0 : i32
    %c0_i32_1 = arith.constant 0 : i32
    return %c0_i32, %c0_i32_0 : i32, i32
  }
  func.func @transform_34(%arg0: i32) -> (i32, i32) {
    %c0_i32 = arith.constant 0 : i32
    %c0_i32_0 = arith.constant 0 : i32
    %c0_i32_1 = arith.constant 0 : i32
    return %c0_i32, %c0_i32_0 : i32, i32
  }
  func.func @transform_35(%arg0: i32) -> (i32, i32) {
    %c0_i32 = arith.constant 0 : i32
    %c0_i32_0 = arith.constant 0 : i32
    %c0_i32_1 = arith.constant 0 : i32
    return %c0_i32, %c0_i32_0 : i32, i32
  }
  func.func @transform_36(%arg0: i32) -> (i32, i32) {
    %c0_i32 = arith.constant 0 : i32
    %c0_i32_0 = arith.constant 0 : i32
    %c0_i32_1 = arith.constant 0 : i32
    return %c0_i32, %c0_i32_0 : i32, i32
  }
  func.func @transform_37(%arg0: i32) -> (i32, i32) {
    %c0_i32 = arith.constant 0 : i32
    %c0_i32_0 = arith.constant 0 : i32
    %c0_i32_1 = arith.constant 0 : i32
    return %c0_i32, %c0_i32_0 : i32, i32
  }
  func.func @transform_38(%arg0: i32) -> (i32, i32) {
    %c0_i32 = arith.constant 0 : i32
    %c0_i32_0 = arith.constant 0 : i32
    %c0_i32_1 = arith.constant 0 : i32
    return %c0_i32, %c0_i32_0 : i32, i32
  }
  func.func @transform_39(%arg0: i32) -> (i32, i32) {
    %c0_i32 = arith.constant 0 : i32
    %c0_i32_0 = arith.constant 0 : i32
    %c0_i32_1 = arith.constant 0 : i32
    return %c0_i32, %c0_i32_0 : i32, i32
  }
  func.func @transform_40(%arg0: i32) -> (i32, i32) {
    %c0_i32 = arith.constant 0 : i32
    %c0_i32_0 = arith.constant 0 : i32
    %c0_i32_1 = arith.constant 0 : i32
    return %c0_i32, %c0_i32_0 : i32, i32
  }
  func.func @transform_41(%arg0: i32) -> (i32, i32) {
    %c0_i32 = arith.constant 0 : i32
    %c0_i32_0 = arith.constant 0 : i32
    %c0_i32_1 = arith.constant 0 : i32
    return %c0_i32, %c0_i32_0 : i32, i32
  }
  func.func @transform_42(%arg0: i32) -> (i32, i32) {
    %c0_i32 = arith.constant 0 : i32
    %c0_i32_0 = arith.constant 0 : i32
    %c0_i32_1 = arith.constant 0 : i32
    return %c0_i32, %c0_i32_0 : i32, i32
  }
  func.func @transform_43(%arg0: i32) -> (i32, i32) {
    %c0_i32 = arith.constant 0 : i32
    %c0_i32_0 = arith.constant 0 : i32
    %c0_i32_1 = arith.constant 0 : i32
    return %c0_i32, %c0_i32_0 : i32, i32
  }
  func.func @transform_44(%arg0: i32) -> (i32, i32) {
    %c0_i32 = arith.constant 0 : i32
    %c0_i32_0 = arith.constant 0 : i32
    %c0_i32_1 = arith.constant 0 : i32
    return %c0_i32, %c0_i32_0 : i32, i32
  }
  func.func @transform_45(%arg0: i32) -> (i32, i32) {
    %c0_i32 = arith.constant 0 : i32
    %c0_i32_0 = arith.constant 0 : i32
    %c0_i32_1 = arith.constant 0 : i32
    return %c0_i32, %c0_i32_0 : i32, i32
  }
  func.func @transform_46(%arg0: i32) -> (i32, i32) {
    %c0_i32 = arith.constant 0 : i32
    %c0_i32_0 = arith.constant 0 : i32
    %c0_i32_1 = arith.constant 0 : i32
    return %c0_i32, %c0_i32_0 : i32, i32
  }
  func.func @transform_47(%arg0: i32) -> (i32, i32) {
    %c0_i32 = arith.constant 0 : i32
    %c0_i32_0 = arith.constant 0 : i32
    %c0_i32_1 = arith.constant 0 : i32
    return %c0_i32, %c0_i32_0 : i32, i32
  }
  func.func @transform_48(%arg0: i32) -> (i32, i32) {
    %c0_i32 = arith.constant 0 : i32
    %c0_i32_0 = arith.constant 0 : i32
    %c0_i32_1 = arith.constant 0 : i32
    return %c0_i32, %c0_i32_0 : i32, i32
  }
  func.func @transform_49(%arg0: i32) -> (i32, i32) {
    %c0_i32 = arith.constant 0 : i32
    %c0_i32_0 = arith.constant 0 : i32
    %c0_i32_1 = arith.constant 0 : i32
    return %c0_i32, %c0_i32_0 : i32, i32
  }
  func.func @transform_50(%arg0: i32) -> (i32, i32) {
    %c0_i32 = arith.constant 0 : i32
    %c0_i32_0 = arith.constant 0 : i32
    %c0_i32_1 = arith.constant 0 : i32
    return %c0_i32, %c0_i32_0 : i32, i32
  }
  func.func @transform_51(%arg0: i32) -> (i32, i32) {
    %c0_i32 = arith.constant 0 : i32
    %c0_i32_0 = arith.constant 0 : i32
    %c0_i32_1 = arith.constant 0 : i32
    return %c0_i32, %c0_i32_0 : i32, i32
  }
  func.func @transform_52(%arg0: i32) -> (i32, i32) {
    %c0_i32 = arith.constant 0 : i32
    %c0_i32_0 = arith.constant 0 : i32
    %c0_i32_1 = arith.constant 0 : i32
    return %c0_i32, %c0_i32_0 : i32, i32
  }
  func.func @transform_53(%arg0: i32) -> (i32, i32) {
    %c0_i32 = arith.constant 0 : i32
    %c0_i32_0 = arith.constant 0 : i32
    %c0_i32_1 = arith.constant 0 : i32
    return %c0_i32, %c0_i32_0 : i32, i32
  }
  func.func @transform_54(%arg0: i32) -> (i32, i32) {
    %c0_i32 = arith.constant 0 : i32
    %c0_i32_0 = arith.constant 0 : i32
    %c0_i32_1 = arith.constant 0 : i32
    return %c0_i32, %c0_i32_0 : i32, i32
  }
  func.func @transform_55(%arg0: i32) -> (i32, i32) {
    %c0_i32 = arith.constant 0 : i32
    %c0_i32_0 = arith.constant 0 : i32
    %c0_i32_1 = arith.constant 0 : i32
    return %c0_i32, %c0_i32_0 : i32, i32
  }
  func.func @transform_56(%arg0: i32) -> (i32, i32) {
    %c0_i32 = arith.constant 0 : i32
    %c0_i32_0 = arith.constant 0 : i32
    %c0_i32_1 = arith.constant 0 : i32
    return %c0_i32, %c0_i32_0 : i32, i32
  }
  func.func @transform_57(%arg0: i32) -> (i32, i32) {
    %c0_i32 = arith.constant 0 : i32
    %c0_i32_0 = arith.constant 0 : i32
    %c0_i32_1 = arith.constant 0 : i32
    return %c0_i32, %c0_i32_0 : i32, i32
  }
  func.func @transform_58(%arg0: i32) -> (i32, i32) {
    %c0_i32 = arith.constant 0 : i32
    %c0_i32_0 = arith.constant 0 : i32
    %c0_i32_1 = arith.constant 0 : i32
    return %c0_i32, %c0_i32_0 : i32, i32
  }
  func.func @transform_59(%arg0: i32) -> (i32, i32) {
    %c0_i32 = arith.constant 0 : i32
    %c0_i32_0 = arith.constant 0 : i32
    %c0_i32_1 = arith.constant 0 : i32
    return %c0_i32, %c0_i32_0 : i32, i32
  }
  func.func @transform_60(%arg0: i32) -> (i32, i32, i32) {
    %c0_i32 = arith.constant 0 : i32
    %c0_i32_0 = arith.constant 0 : i32
    %c0_i32_1 = arith.constant 0 : i32
    return %arg0, %c0_i32, %c0_i32_0 : i32, i32, i32
  }
  func.func @transform_61(%arg0: i32) -> (i32, i32, i32) {
    %c0_i32 = arith.constant 0 : i32
    %c0_i32_0 = arith.constant 0 : i32
    %c0_i32_1 = arith.constant 0 : i32
    return %arg0, %c0_i32, %c0_i32_0 : i32, i32, i32
  }
}

</mosaic_0001>

<bundles_post_ra>
// kernel: bart_aac_forward.1
= control target key start
LH: loop header
LB: loop body
LE: loop exit
PB: predicated region body
PF: predicated region fallthrough
CT: control target
= control target key end

     0   :  { %s5785_s6 = smov 1   ;;  %s5786_s10 = smov 2   ;;  %s7075_s0 = inlined_call_operand.smem [shape: u32[62], index: -1, kind: input, shape index: {}] }
   0x1   :  { %s5887_s5 = sld [smem:[%s7075_s0]]   ;;  %s5787_s14 = smov 3  }
   0x2   :  { %s5892_s9 = sld [smem:[%s7075_s0 + %s5785_s6]]   ;;  %s5788_s18 = smov 4  }
   0x3   :  { %s5897_s13 = sld [smem:[%s7075_s0 + %s5786_s10]]   ;;  %s5789_s22 = smov 5  }
   0x4   :  { %s5902_s17 = sld [smem:[%s7075_s0 + %s5787_s14]]   ;;  %s5790_s26 = smov 6  }
   0x5   :  { %s5907_s21 = sld [smem:[%s7075_s0 + %s5788_s18]]   ;;  %s5791_s30 = smov 7  }
   0x6   :  { %s5912_s25 = sld [smem:[%s7075_s0 + %s5789_s22]]   ;;  %s5792_s4 = smov 8  }
   0x7   :  { %7136 = sst [smem:[#allocation47_spill]] %s5887_s5  ;;  %s5793_s10 = smov 9  }
   0x8   :  { %7137 = sst [smem:[#allocation48_spill]] %s5892_s9  ;;  %s5794_s15 = smov 10  }
   0x9   :  { %7138 = sst [smem:[#allocation49_spill]] %s5897_s13  ;;  %s5795_s20 = smov 11  }
   0xa   :  { %7139 = sst [smem:[#allocation50_spill]] %s5902_s17  ;;  %s5797_s1 = smov 13  }
   0xb   :  { %7140 = sst [smem:[#allocation51_spill]] %s5907_s21  ;;  %s5798_s7 = smov 14  }
   0xc   :  { %7141 = sst [smem:[#allocation52_spill]] %s5912_s25  ;;  %s5800_s22 = smov 16  }
   0xd   :  { %s5917_s29 = sld [smem:[%s7075_s0 + %s5790_s26]]   ;;  %s5796_s26 = smov 12  }
   0xe   :  { %s5922_s3 = sld [smem:[%s7075_s0 + %s5791_s30]]   ;;  %s5801_s28 = smov 17  }
   0xf   :  { %s5927_s8 = sld [smem:[%s7075_s0 + %s5792_s4]]  }
  0x10   :  { %s5932_s14 = sld [smem:[%s7075_s0 + %s5793_s10]]  }
  0x11   :  { %s5937_s19 = sld [smem:[%s7075_s0 + %s5794_s15]]   ;;  %s5799_s15 = smov 15  }
  0x12   :  { %s5942_s24 = sld [smem:[%s7075_s0 + %s5795_s20]]  }
  0x13   :  { %7142 = sst [smem:[#allocation53_spill]] %s5917_s29 }
  0x14   :  { %7143 = sst [smem:[#allocation54_spill]] %s5922_s3 }
  0x15   :  { %7144 = sst [smem:[#allocation55_spill]] %s5927_s8 }
  0x16   :  { %7145 = sst [smem:[#allocation56_spill]] %s5932_s14 }
  0x17   :  { %7146 = sst [smem:[#allocation57_spill]] %s5937_s19 }
  0x18   :  { %7147 = sst [smem:[#allocation58_spill]] %s5942_s24 }
  0x19   :  { %s5947_s30 = sld [smem:[%s7075_s0 + %s5796_s26]]  }
  0x1a   :  { %s5952_s6 = sld [smem:[%s7075_s0 + %s5797_s1]]  }
  0x1b   :  { %s5957_s12 = sld [smem:[%s7075_s0 + %s5798_s7]]   ;;  %s5802_s7 = smov 18  }
  0x1c   :  { %s5962_s20 = sld [smem:[%s7075_s0 + %s5799_s15]]   ;;  %s5803_s15 = smov 19  }
  0x1d   :  { %s5967_s27 = sld [smem:[%s7075_s0 + %s5800_s22]]   ;;  %s5804_s22 = smov 20  }
  0x1e   :  { %s5972_s4 = sld [smem:[%s7075_s0 + %s5801_s28]]   ;;  %s5805_s28 = smov 21  }
  0x1f   :  { %7148 = sst [smem:[#allocation59_spill]] %s5947_s30 }
  0x20   :  { %7149 = sst [smem:[#allocation60_spill]] %s5952_s6 }
  0x21   :  { %7150 = sst [smem:[#allocation61_spill]] %s5957_s12 }
  0x22   :  { %7151 = sst [smem:[#allocation62_spill]] %s5962_s20 }
  0x23   :  { %7152 = sst [smem:[#allocation63_spill]] %s5967_s27 }
  0x24   :  { %7153 = sst [smem:[#allocation64_spill]] %s5972_s4 }
  0x25   :  { %s5977_s3 = sld [smem:[%s7075_s0 + %s5802_s7]]   ;;  %s5806_s7 = smov 22  }
  0x26   :  { %s5982_s17 = sld [smem:[%s7075_s0 + %s5803_s15]]   ;;  %s5807_s15 = smov 23  }
  0x27   :  { %s5987_s25 = sld [smem:[%s7075_s0 + %s5804_s22]]   ;;  %s5808_s22 = smov 24  }
  0x28   :  { %s5992_s4 = sld [smem:[%s7075_s0 + %s5805_s28]]   ;;  %s5809_s28 = smov 25  }
  0x29   :  { %s5997_s27 = sld [smem:[%s7075_s0 + %s5806_s7]]   ;;  %s5810_s7 = smov 26  }
  0x2a   :  { %s6002_s14 = sld [smem:[%s7075_s0 + %s5807_s15]]   ;;  %s5811_s15 = smov 27  }
  0x2b   :  { %7154 = sst [smem:[#allocation65_spill]] %s5977_s3 }
  0x2c   :  { %7155 = sst [smem:[#allocation66_spill]] %s5982_s17 }
  0x2d   :  { %7156 = sst [smem:[#allocation67_spill]] %s5987_s25 }
  0x2e   :  { %7157 = sst [smem:[#allocation68_spill]] %s5992_s4 }
  0x2f   :  { %7158 = sst [smem:[#allocation69_spill]] %s5997_s27 }
  0x30   :  { %7159 = sst [smem:[#allocation70_spill]] %s6002_s14 }
  0x31   :  { %s6007_s13 = sld [smem:[%s7075_s0 + %s5808_s22]]   ;;  %s5812_s22 = smov 28  }
  0x32   :  { %s6012_s21 = sld [smem:[%s7075_s0 + %s5809_s28]]   ;;  %s5813_s28 = smov 29  }
  0x33   :  { %s6017_s4 = sld [smem:[%s7075_s0 + %s5810_s7]]   ;;  %s5814_s7 = smov 30  }
  0x34   :  { %s6022_s14 = sld [smem:[%s7075_s0 + %s5811_s15]]   ;;  %s5815_s15 = smov 31  }
  0x37   :  { %7160 = sst [smem:[#allocation71_spill]] %s6007_s13 }
  0x38   :  { %7161 = sst [smem:[#allocation72_spill]] %s6012_s21 }
  0x39   :  { %7162 = sst [smem:[#allocation73_spill]] %s6017_s4 }
  0x3a   :  { %7163 = sst [smem:[#allocation74_spill]] %s6022_s14 }
  0x3b   :  { %s6027_s13 = sld [smem:[%s7075_s0 + %s5812_s22]]   ;;  %s5816_s22 = smov 32  }
  0x3c   :  { %s6032_s21 = sld [smem:[%s7075_s0 + %s5813_s28]]   ;;  %s5817_s28 = smov 33  }
  0x3d   :  { %s6037_s4 = sld [smem:[%s7075_s0 + %s5814_s7]]   ;;  %s5818_s7 = smov 34  }
  0x3e   :  { %s6042_s14 = sld [smem:[%s7075_s0 + %s5815_s15]]   ;;  %s5819_s15 = smov 35  }
  0x41   :  { %7164 = sst [smem:[#allocation75_spill]] %s6027_s13 }
  0x42   :  { %7165 = sst [smem:[#allocation76_spill]] %s6032_s21 }
  0x43   :  { %7166 = sst [smem:[#allocation77_spill]] %s6037_s4 }
  0x44   :  { %7167 = sst [smem:[#allocation78_spill]] %s6042_s14 }
  0x45   :  { %s6047_s13 = sld [smem:[%s7075_s0 + %s5816_s22]]   ;;  %s5820_s22 = smov 36  }
  0x46   :  { %s6052_s21 = sld [smem:[%s7075_s0 + %s5817_s28]]   ;;  %s5821_s28 = smov 37  }
  0x47   :  { %s6057_s4 = sld [smem:[%s7075_s0 + %s5818_s7]]   ;;  %s5822_s7 = smov 38  }
  0x48   :  { %s6062_s14 = sld [smem:[%s7075_s0 + %s5819_s15]]   ;;  %s5823_s15 = smov 39  }
  0x49   :  { %s6082_s17 = sld [smem:[%s7075_s0 + %s5823_s15]]   ;;  %s5827_s15 = smov 43  }
  0x4a   :  { %s6102_s12 = sld [smem:[%s7075_s0 + %s5827_s15]]   ;;  %s5831_s15 = smov 47  }
  0x4b   :  { %7168 = sst [smem:[#allocation79_spill]] %s6047_s13 }
  0x4c   :  { %7169 = sst [smem:[#allocation80_spill]] %s6052_s21 }
  0x4d   :  { %7170 = sst [smem:[#allocation81_spill]] %s6057_s4 }
  0x4e   :  { %s6067_s13 = sld [smem:[%s7075_s0 + %s5820_s22]]   ;;  %s5824_s22 = smov 40  }
  0x4f   :  { %s6072_s21 = sld [smem:[%s7075_s0 + %s5821_s28]]   ;;  %s5825_s28 = smov 41  }
  0x50   :  { %s6077_s4 = sld [smem:[%s7075_s0 + %s5822_s7]]   ;;  %s5826_s7 = smov 42  }
  0x51   :  { %s6092_s20 = sld [smem:[%s7075_s0 + %s5825_s28]]   ;;  %s5829_s28 = smov 45  }
  0x52   :  { %7175 = sst [smem:[#allocation86_spill]] %s6102_s12 }
  0x53   :  { %s6112_s25 = sld [smem:[%s7075_s0 + %s5829_s28]]   ;;  %s5833_s28 = smov 49  }
  0x54   :  { %7171 = sst [smem:[#allocation82_spill]] %s6067_s13 }
  0x55   :  { %s6087_s13 = sld [smem:[%s7075_s0 + %s5824_s22]]   ;;  %s5828_s22 = smov 44  }
  0x56   :  { %7172 = sst [smem:[#allocation83_spill]] %s6077_s4 }
  0x57   :  { %s6097_s4 = sld [smem:[%s7075_s0 + %s5826_s7]]   ;;  %s5830_s7 = smov 46  }
  0x58   :  { %s6117_s27 = sld [smem:[%s7075_s0 + %s5830_s7]]   ;;  %s5834_s7 = smov 50  }
  0x59   :  { %s6122_s3 = sld [smem:[%s7075_s0 + %s5831_s15]]   ;;  %s5835_s15 = smov 51  }
  0x5a   :  { %s6132_s8 = sld [smem:[%s7075_s0 + %s5833_s28]]   ;;  %s5837_s28 = smov 53  }
  0x5b   :  { %7173 = sst [smem:[#allocation84_spill]] %s6087_s13 }
  0x5c   :  { %s6107_s13 = sld [smem:[%s7075_s0 + %s5828_s22]]   ;;  %s5832_s22 = smov 48  }
  0x5d   :  { %7174 = sst [smem:[#allocation85_spill]] %s6097_s4 }
  0x5e   :  { %s6137_s6 = sld [smem:[%s7075_s0 + %s5834_s7]]   ;;  %s5838_s7 = smov 54  }
  0x5f   :  { %7177 = sst [smem:[#allocation88_spill]] %s6122_s3 }
  0x60   :  { %7178 = sst [smem:[#allocation89_spill]] %s6132_s8 }
  0x61   :  { %s6142_s24 = sld [smem:[%s7075_s0 + %s5835_s15]]   ;;  %s5839_s15 = smov 55  }
  0x62   :  { %7176 = sst [smem:[#allocation87_spill]] %s6107_s13 }
  0x63   :  { %s6127_s13 = sld [smem:[%s7075_s0 + %s5832_s22]]   ;;  %s5836_s22 = smov 52  }
  0x64   :  { %7179 = sst [smem:[#allocation90_spill]] %s6137_s6 }
  0x65   :  { %s6147_s30 = sld [smem:[%s7075_s0 + %s5836_s22]]   ;;  %s5840_s22 = smov 56  }
  0x66   :  { %s6152_s29 = sld [smem:[%s7075_s0 + %s5837_s28]]   ;;  %s5841_s28 = smov 57  }
  0x67   :  { %7180 = sst [smem:[#allocation91_spill]] %s6142_s24 }
  0x68   :  { %s6157_s5 = sld [smem:[%s7075_s0 + %s5838_s7]]   ;;  %s5842_s7 = smov 58  }
  0x69   :  { %s6162_s19 = sld [smem:[%s7075_s0 + %s5839_s15]]   ;;  %s5843_s15 = smov 59  }
  0x6a   :  { %s6167_s9 = sld [smem:[%s7075_s0 + %s5840_s22]]   ;;  %s5844_s22 = smov 60  }
  0x6b   :  { %s6177_s24 = sld [smem:[%s7075_s0 + %s5842_s7]]  }
  0x6c   :  { %7181 = sst [smem:[#allocation92_spill]] %s6152_s29 }
  0x6d   :  { %s6172_s29 = sld [smem:[%s7075_s0 + %s5841_s28]]   ;;  %s5845_s28 = smov 61  }
  0x6e   :  { %7182 = sst [smem:[#allocation93_spill]] %s6157_s5 }
  0x6f   :  { %7183 = sst [smem:[#allocation94_spill]] %s6162_s19 }
  0x70   :  { %7184 = sst [smem:[#allocation95_spill]] %s6167_s9 }
  0x71   :  { %s6182_s19 = sld [smem:[%s7075_s0 + %s5843_s15]]  }
  0x72   :  { %s6187_s9 = sld [smem:[%s7075_s0 + %s5844_s22]]  }
  0x73   :  { %s6192_s8 = sld [smem:[%s7075_s0 + %s5845_s28]]  }
  0x78   :  { %7185 = sst [smem:[#allocation96_spill]] %s6187_s9 }
  0x79   :  { %7186 = sst [smem:[#allocation97_spill]] %s6192_s8 }
  0x7a   :  { %129 = vsyncpa [#allocation3], 0 }
  0x7b   :  { %130 = vsyncpa [#allocation6], 0 }
  0x7c   :  { %131 = vsyncpa [#allocation9], 0 }
  0x7d   :  { %132 = vsyncpa [#allocation12], 0 }
  0x7e   :  { %133 = vsyncpa [#allocation15], 0 }
  0x7f   :  { %134 = vsyncpa [#allocation18], 0 }
  0x80   :  { %135 = vsyncpa [#allocation21], 0 }
  0x81   :  { %136 = vsyncpa [#allocation24], 0 }
  0x82   :  { %137 = vsyncpa [#allocation27], 0 }
  0x83   :  { %138 = vsyncpa [#allocation30], 0 }
  0x84   :  { %139 = vsyncpa [#allocation33], 0 }
  0x85   :  { %140 = vsyncpa [#allocation4], 0 }
  0x86   :  { %142 = vsyncpa [#allocation4 + $0x1], 0  ;;  %s6194_s7 = smov 0   ;;  %s6196_s10 = smov 0  }
  0x87   :  { %s6198_s11 = smov 0   ;;  %s6200_s0 = smov 0  }
  0x88   :  { %7187 = sst [smem:[#allocation98_spill]] %s6198_s11 }
  0x89 LB: > { %s7189_s6 = sld [smem:[#allocation90_spill]]  ;;  %s6215_s15 = sadd.s32 4294967295, %s5783_s0   ;;  %s5771_s7 = sphi %s6194_s7, %s7273_s7   ;;  %s5783_s0 = sphi %s6200_s0, %s7270_s0   ;;  %s5775_s10 = sphi %s6196_s10, %s7274_s10  }
  0x8a   : > { %s7190_s5 = sld [smem:[#allocation93_spill]]  ;;  %s4512_s16 = sadd.s32 4294967294, %s5783_s0  }
  0x8b   : > { %s7191_s3 = sld [smem:[#allocation88_spill]]  ;;  %s6219_s18 = sadd.s32 1, %s5783_s0  }
  0x8c   : > { %s7192_s4 = sld [smem:[#allocation85_spill]]  ;;  %s1442_s23 = ssub.s32 %s5783_s0, %s6219_s18 }
  0x8d   : > { %s7193_s12 = sld [smem:[#allocation86_spill]]  ;;  %p1443_p1 = scmp.eq.s32.totalorder %s1442_s23, 0 }
  0x8e   : > { %s7194_s11 = sld [smem:[#allocation98_spill]]  ;;  %p1456_p2 = scmp.eq.s32.totalorder %s6215_s15, 1 }
  0x8f   : > { %7195 = sst [smem:[#allocation98_spill]] %s5771_s7  ;;  %p1461_p3 = scmp.ne.s32.totalorder %s5775_s10, %s5771_s7 }
  0x90   : > { %7197 = sst [smem:[#allocation100_spill]] %s5783_s0  ;;  %p1462_p4 = scmp.eq.s32.totalorder %s4512_s16, 1 }
  0x91   : > { %7198 = sst [smem:[#allocation101_spill]] %s6219_s18  ;;  %p4513_p7 = scmp.ge.s32.totalorder %s5783_s0, 1 }
  0x92   : > { %p6236_p6 = por %p1462_p4, %p1461_p3  ;;  %p1495_p8 = scmp.lt.s32.totalorder %s5783_s0, 3 }
  0x93   : > { %p4786_p9 = scmp.eq.s32.totalorder %s6215_s15, 0  ;;  %s1609_s16 = sshll.u32 %s6072_s21, 4  ;;  %s1610_s16 = int_to_ptr.hbm [resolvable:$true] %s1609_s16 }
  0x94   : > { %7196 = sst [smem:[#allocation99_spill]] %s7194_s11  ;;  %s1445_s22 = sadd.s32 1, %s7194_s11 }
  0x95   : > { %p1455_p0 = scmp.ne.s32.totalorder %s7194_s11, %s5775_s10  ;;  %p6243_p10 = pnand %p4513_p7, %p1495_p8 }
  0x96   : > { %s6230_s26 = scalar_select %p1443_p1, %s7194_s11, %s1445_s22  }
  0x97   : > { %p6232_p5 = por %p1456_p2, %p1455_p0  ;;  %p4721_p11 = pneg %p6243_p10 }
  0x98   : > { %7199 = sst [smem:[#allocation102_spill]] %s6230_s26  ;;  %s5846_s22 = smov [#allocation5]  }
  0x99   : > { %s7200_s28 = scalar_select %p6232_p5, 1, 0 }
  0x9a   : > { %s7202_s1 = scalar_select %p6236_p6, 1, 0 }
  0x9b   : > { %7201 = sst [smem:[#allocation103_spill]] %s7200_s28  ;;  %s1611_s23 = sshll.u32 %s5846_s22, 4  ;;  %s1612_s23 = int_to_ptr.vmem [resolvable:$true] %s1611_s23 }
  0x9c   : > { %7203 = sst [smem:[#allocation104_spill]] %s7202_s1  ;;  %s1639_s26 = sshll.u32 %s6092_s20, 4  ;;  %s6257_s26 = int_to_ptr.hbm [resolvable:$true] %s1639_s26 }
  0x9d   : > { %p6253_p12 = pnand %p4786_p9, %p4721_p11  ;;  %s1663_s18 = sshll.u32 %s7193_s12, 4  ;;  %s6275_s18 = int_to_ptr.hbm [resolvable:$true] %s1663_s18 }
  0x9e   : > { %s5847_s1 = smov [#allocation8]   ;;  %s5077_s0 = sshra.s32 %s1610_s16, 4  ;;  %s5078_s0 = int_to_ptr.hbm [resolvable:$true] %s5077_s0 }
  0x9f   : > { %s6260_s7 = sshll.u32 %s5847_s1, 4  ;;  %s5079_s8 = scalar_lea.hbm %s5078_s0, 1  ;;  %s1642_s7 = int_to_ptr.vmem [resolvable:$true] %s6260_s7 }
  0xa0   : > { %p5080_p13 = scmp.ne.s32.totalorder %s5078_s0, %s5079_s8  ;;  %p6264_p0 = pneg %p6253_p12 }
  0xa1   : > { %s5084_s28 = scalar_lea.hbm %s6072_s21, 1  ;;  %p5085_p3 = scmp.lt.s32.totalorder %s5078_s0, %s6072_s21 }
  0xa2   : > { %p5082_p1 = pnand %p6264_p0, %p5080_p13  ;;  %p5086_p4 = scmp.lt.s32.totalorder %s5084_s28, %s5079_s8 }
  0xa4   : > { %p5083_p2 = pneg %p5082_p1  ;;  %p5087_p7 = por %p5086_p4, %p5085_p3 }
  0xa6   : > { %p5088_p8 = pnand %p5087_p7, %p5083_p2 }
  0xa8   : > { %5091 = shalt.err (!%p5088_p8)
}
  0xa9   : > { %4727 = dma.hbm_to_vmem [thread:$0]  (!%p6253_p12), %s1610_s16, 16, %s1612_s23, [#allocation6]  }
  0xaa   : > { %s5107_s1 = sshra.s32 %s6257_s26, 4  ;;  %s5114_s8 = scalar_lea.hbm %s6092_s20, 1  ;;  %s5108_s1 = int_to_ptr.hbm [resolvable:$true] %s5107_s1 }
  0xab   : > { %s5109_s9 = scalar_lea.hbm %s5108_s1, 1  ;;  %p5115_p2 = scmp.lt.s32.totalorder %s5108_s1, %s6092_s20 }
  0xac   : > { %p5110_p11 = scmp.ne.s32.totalorder %s5108_s1, %s5109_s9  ;;  %p5116_p3 = scmp.lt.s32.totalorder %s5114_s8, %s5109_s9 }
  0xae   : > { %p5112_p13 = pnand %p5110_p11, %p6264_p0  ;;  %p5117_p4 = por %p5116_p3, %p5115_p2 }
  0xb0   : > { %p5113_p1 = pneg %p5112_p13 }
  0xb2   : > { %p5118_p7 = pnand %p5117_p4, %p5113_p1 }
  0xb4   : > { %5121 = shalt.err (!%p5118_p7)
}
  0xb5   : > { %4733 = dma.hbm_to_vmem [thread:$0]  (!%p6253_p12), %s6257_s26, 16, %s1642_s7, [#allocation9]  }
  0xb6   : > { %s1689_s0 = sshll.u32 %s6117_s27, 4  ;;  %s5848_s28 = smov [#allocation11]   ;;  %s6286_s0 = int_to_ptr.hbm [resolvable:$true] %s1689_s0 }
  0xb7   : > { %s1665_s16 = sshll.u32 %s5848_s28, 4  ;;  %s5137_s23 = sshra.s32 %s6275_s18, 4  ;;  %s1666_s16 = int_to_ptr.vmem [resolvable:$true] %s1665_s16  ;;  %s5138_s23 = int_to_ptr.hbm [resolvable:$true] %s5137_s23 }
  0xb8   : > { %s5139_s9 = scalar_lea.hbm %s5138_s23, 1  ;;  %s5144_s1 = scalar_lea.hbm %s7193_s12, 1 }
  0xb9   : > { %p5140_p8 = scmp.ne.s32.totalorder %s5138_s23, %s5139_s9  ;;  %p5145_p1 = scmp.lt.s32.totalorder %s5138_s23, %s7193_s12 }
  0xba   : > { %p5146_p2 = scmp.lt.s32.totalorder %s5144_s1, %s5139_s9 }
  0xbb   : > { %p5142_p11 = pnand %p5140_p8, %p6264_p0 }
  0xbc   : > { %p5147_p3 = por %p5146_p2, %p5145_p1 }
  0xbd   : > { %p5143_p13 = pneg %p5142_p11 }
  0xbf   : > { %p5148_p4 = pnand %p5147_p3, %p5143_p13 }
  0xc1   : > { %5151 = shalt.err (!%p5148_p4)
}
  0xc2   : > { %4739 = dma.hbm_to_vmem [thread:$0]  (!%p6253_p12), %s6275_s18, 16, %s1666_s16, [#allocation12]  }
  0xc3   : > { %s5849_s7 = smov [#allocation14]   ;;  %s5167_s8 = sshra.s32 %s6286_s0, 4  ;;  %s5168_s8 = int_to_ptr.hbm [resolvable:$true] %s5167_s8 }
  0xc4   : > { %s1691_s26 = sshll.u32 %s5849_s7, 4  ;;  %s5169_s28 = scalar_lea.hbm %s5168_s8, 64  ;;  %s1692_s26 = int_to_ptr.vmem [resolvable:$true] %s1691_s26 }
  0xc5   : > { %p5170_p7 = scmp.ne.s32.totalorder %s5168_s8, %s5169_s28  ;;  %s5174_s23 = scalar_lea.hbm %s6117_s27, 64 }
  0xc6   : > { %p5175_p13 = scmp.lt.s32.totalorder %s5168_s8, %s6117_s27  ;;  %p5176_p1 = scmp.lt.s32.totalorder %s5174_s23, %s5169_s28 }
  0xc7   : > { %p5172_p8 = pnand %p5170_p7, %p6264_p0 }
  0xc8   : > { %p5177_p2 = por %p5176_p1, %p5175_p13 }
  0xc9   : > { %p5173_p11 = pneg %p5172_p8 }
  0xcb   : > { %p5178_p3 = pnand %p5177_p2, %p5173_p11 }
  0xcd   : > { %5181 = shalt.err (!%p5178_p3)
}
  0xce   : > { %s5850_s9 = smov 128   ;;  %s5851_s18 = smov 8  }
  0xcf   : > { %4745 = dma.hbm_to_vmem [thread:$0]  (!%p6253_p12), %s6286_s0, 1024, %s1692_s26, [#allocation15], %s5850_s9, %s5850_s9, %s5851_s18  }
  0xd0   : > { %s1715_s16 = sshll.u32 %s6127_s13, 4  ;;  %s5852_s1 = smov [#allocation17]   ;;  %s1716_s16 = int_to_ptr.hbm [resolvable:$true] %s1715_s16 }
  0xd1   : > { %s1717_s7 = sshll.u32 %s5852_s1, 4  ;;  %s1741_s8 = sshll.u32 %s7189_s6, 4  ;;  %s1718_s7 = int_to_ptr.vmem [resolvable:$true] %s1717_s7  ;;  %s1742_s8 = int_to_ptr.hbm [resolvable:$true] %s1741_s8 }
  0xd2   : > { %s5197_s28 = sshra.s32 %s1716_s16, 4  ;;  %s5204_s12 = scalar_lea.hbm %s6127_s13, 64  ;;  %s5198_s28 = int_to_ptr.hbm [resolvable:$true] %s5197_s28 }
  0xd3   : > { %s5199_s23 = scalar_lea.hbm %s5198_s28, 64  ;;  %p5205_p11 = scmp.lt.s32.totalorder %s5198_s28, %s6127_s13 }
  0xd4   : > { %p5200_p4 = scmp.ne.s32.totalorder %s5198_s28, %s5199_s23  ;;  %p5206_p13 = scmp.lt.s32.totalorder %s5204_s12, %s5199_s23 }
  0xd6   : > { %p5202_p7 = pnand %p5200_p4, %p6264_p0  ;;  %p5207_p1 = por %p5206_p13, %p5205_p11 }
  0xd8   : > { %p5203_p8 = pneg %p5202_p7 }
  0xda   : > { %p5208_p2 = pnand %p5207_p1, %p5203_p8 }
  0xdc   : > { %5211 = shalt.err (!%p5208_p2)
}
  0xdd   : > { %4751 = dma.hbm_to_vmem [thread:$0]  (!%p6253_p12), %s1716_s16, 1024, %s1718_s7, [#allocation18], %s5850_s9, %s5850_s9, %s5851_s18  }
  0xde   : > { %s5853_s0 = smov [#allocation20]   ;;  %s1768_s1 = sshll.u32 %s6147_s30, 4  ;;  %s6319_s1 = int_to_ptr.hbm [resolvable:$true] %s1768_s1 }
  0xdf   : > { %s1743_s26 = sshll.u32 %s5853_s0, 4  ;;  %s5227_s12 = sshra.s32 %s1742_s8, 4  ;;  %s1744_s26 = int_to_ptr.vmem [resolvable:$true] %s1743_s26  ;;  %s5228_s12 = int_to_ptr.hbm [resolvable:$true] %s5227_s12 }
  0xe0   : > { %s5229_s28 = scalar_lea.hbm %s5228_s12, 64  ;;  %s5234_s23 = scalar_lea.hbm %s7189_s6, 64 }
  0xe1   : > { %p5230_p3 = scmp.ne.s32.totalorder %s5228_s12, %s5229_s28  ;;  %p5235_p8 = scmp.lt.s32.totalorder %s5228_s12, %s7189_s6 }
  0xe2   : > { %p5236_p11 = scmp.lt.s32.totalorder %s5234_s23, %s5229_s28 }
  0xe3   : > { %p5232_p4 = pnand %p5230_p3, %p6264_p0 }
  0xe4   : > { %p5237_p13 = por %p5236_p11, %p5235_p8 }
  0xe5   : > { %p5233_p7 = pneg %p5232_p4 }
  0xe7   : > { %p5238_p1 = pnand %p5237_p13, %p5233_p7 }
  0xe9   : > { %5241 = shalt.err (!%p5238_p1)
}
  0xea   : > { %4757 = dma.hbm_to_vmem [thread:$0]  (!%p6253_p12), %s1742_s8, 1024, %s1744_s26, [#allocation21], %s5850_s9, %s5850_s9, %s5851_s18  }
  0xeb   : > { %s1791_s16 = sshll.u32 %s7190_s5, 4  ;;  %s5854_s7 = smov [#allocation23]   ;;  %s6331_s16 = int_to_ptr.hbm [resolvable:$true] %s1791_s16 }
  0xec   : > { %s1770_s0 = sshll.u32 %s5854_s7, 4  ;;  %s5257_s12 = sshra.s32 %s6319_s1, 4  ;;  %s1771_s0 = int_to_ptr.vmem [resolvable:$true] %s1770_s0  ;;  %s5258_s12 = int_to_ptr.hbm [resolvable:$true] %s5257_s12 }
  0xed   : > { %s5259_s28 = scalar_lea.hbm %s5258_s12, 1  ;;  %s5264_s23 = scalar_lea.hbm %s6147_s30, 1 }
  0xee   : > { %p5260_p2 = scmp.ne.s32.totalorder %s5258_s12, %s5259_s28  ;;  %p5265_p7 = scmp.lt.s32.totalorder %s5258_s12, %s6147_s30 }
  0xef   : > { %p5266_p8 = scmp.lt.s32.totalorder %s5264_s23, %s5259_s28 }
  0xf0   : > { %p5262_p3 = pnand %p5260_p2, %p6264_p0 }
  0xf1   : > { %p5267_p11 = por %p5266_p8, %p5265_p7 }
  0xf2   : > { %p5263_p4 = pneg %p5262_p3 }
  0xf4   : > { %p5268_p13 = pnand %p5267_p11, %p5263_p4 }
  0xf6   : > { %5271 = shalt.err (!%p5268_p13)
}
  0xf7   : > { %4763 = dma.hbm_to_vmem [thread:$0]  (!%p6253_p12), %s6319_s1, 16, %s1771_s0, [#allocation24]  }
  0xf8   : > { %s5855_s8 = smov [#allocation26]   ;;  %s1821_s7 = sshll.u32 %s6172_s29, 4  ;;  %s6342_s7 = int_to_ptr.hbm [resolvable:$true] %s1821_s7 }
  0xf9   : > { %s1793_s26 = sshll.u32 %s5855_s8, 4  ;;  %s5287_s12 = sshra.s32 %s6331_s16, 4  ;;  %s1794_s26 = int_to_ptr.vmem [resolvable:$true] %s1793_s26  ;;  %s5288_s12 = int_to_ptr.hbm [resolvable:$true] %s5287_s12 }
  0xfa   : > { %s5289_s28 = scalar_lea.hbm %s5288_s12, 64  ;;  %s5294_s23 = scalar_lea.hbm %s7190_s5, 64 }
  0xfb   : > { %p5290_p1 = scmp.ne.s32.totalorder %s5288_s12, %s5289_s28  ;;  %p5295_p4 = scmp.lt.s32.totalorder %s5288_s12, %s7190_s5 }
  0xfc   : > { %p5296_p7 = scmp.lt.s32.totalorder %s5294_s23, %s5289_s28 }
  0xfd   : > { %p5292_p2 = pnand %p5290_p1, %p6264_p0 }
  0xfe   : > { %p5297_p8 = por %p5296_p7, %p5295_p4 }
  0xff   : > { %p5293_p3 = pneg %p5292_p2 }
 0x101   : > { %p5298_p11 = pnand %p5297_p8, %p5293_p3 }
 0x103   : > { %5301 = shalt.err (!%p5298_p11)
}
 0x104   : > { %4769 = dma.hbm_to_vmem [thread:$0]  (!%p6253_p12), %s6331_s16, 1024, %s1794_s26, [#allocation27], %s5850_s9, %s5850_s9, %s5851_s18  }
 0x105   : > { %s1594_s1 = sshll.u32 %s6062_s14, 4  ;;  %s5856_s0 = smov [#allocation29]   ;;  %s6356_s1 = int_to_ptr.hbm [resolvable:$true] %s1594_s1 }
 0x106   : > { %s1823_s8 = sshll.u32 %s5856_s0, 4  ;;  %s5317_s12 = sshra.s32 %s6342_s7, 4  ;;  %s1824_s8 = int_to_ptr.vmem [resolvable:$true] %s1823_s8  ;;  %s5318_s12 = int_to_ptr.hbm [resolvable:$true] %s5317_s12 }
 0x107   : > { %s5319_s28 = scalar_lea.hbm %s5318_s12, 1  ;;  %s5324_s23 = scalar_lea.hbm %s6172_s29, 1 }
 0x108   : > { %p5320_p13 = scmp.ne.s32.totalorder %s5318_s12, %s5319_s28  ;;  %p5325_p3 = scmp.lt.s32.totalorder %s5318_s12, %s6172_s29 }
 0x109   : > { %p5326_p4 = scmp.lt.s32.totalorder %s5324_s23, %s5319_s28 }
 0x10a   : > { %p5322_p1 = pnand %p5320_p13, %p6264_p0 }
 0x10b   : > { %p5327_p7 = por %p5326_p4, %p5325_p3 }
 0x10c   : > { %p5323_p2 = pneg %p5322_p1 }
 0x10e   : > { %p5328_p8 = pnand %p5327_p7, %p5323_p2 }
 0x110   : > { %5331 = shalt.err (!%p5328_p8)
}
 0x111   : > { %4775 = dma.hbm_to_vmem [thread:$0]  (!%p6253_p12), %s6342_s7, 16, %s1824_s8, [#allocation30]  }
 0x112   : > { %s5857_s9 = smov [#allocation2]   ;;  %s1624_s16 = sshll.u32 %s6082_s17, 4  ;;  %s6367_s16 = int_to_ptr.hbm [resolvable:$true] %s1624_s16 }
 0x113   : > { %s1596_s18 = sshll.u32 %s5857_s9, 4  ;;  %s5347_s26 = sshra.s32 %s6356_s1, 4  ;;  %s1597_s18 = int_to_ptr.vmem [resolvable:$true] %s1596_s18  ;;  %s5348_s26 = int_to_ptr.hbm [resolvable:$true] %s5347_s26 }
 0x114   : > { %s5349_s0 = scalar_lea.hbm %s5348_s26, 1  ;;  %s5354_s12 = scalar_lea.hbm %s6062_s14, 1 }
 0x115   : > { %p5350_p11 = scmp.ne.s32.totalorder %s5348_s26, %s5349_s0  ;;  %p5355_p2 = scmp.lt.s32.totalorder %s5348_s26, %s6062_s14 }
 0x116   : > { %p5356_p3 = scmp.lt.s32.totalorder %s5354_s12, %s5349_s0 }
 0x117   : > { %p5352_p13 = pnand %p5350_p11, %p6264_p0 }
 0x118   : > { %p5357_p4 = por %p5356_p3, %p5355_p2 }
 0x119   : > { %p5353_p1 = pneg %p5352_p13 }
 0x11b   : > { %p5358_p7 = pnand %p5357_p4, %p5353_p1 }
 0x11d   : > { %5361 = shalt.err (!%p5358_p7)
}
 0x11e   : > { %4724 = dma.hbm_to_vmem [thread:$0]  (!%p6253_p12), %s6356_s1, 16, %s1597_s18, [#allocation3]  }
 0x11f   : > { %s1651_s7 = sshll.u32 %s7192_s4, 4  ;;  %s5858_s8 = smov [#allocation7]   ;;  %s6378_s7 = int_to_ptr.hbm [resolvable:$true] %s1651_s7 }
 0x120   : > { %s1626_s28 = sshll.u32 %s5858_s8, 4  ;;  %s5377_s23 = sshra.s32 %s6367_s16, 4  ;;  %s1627_s28 = int_to_ptr.vmem [resolvable:$true] %s1626_s28  ;;  %s5378_s23 = int_to_ptr.hbm [resolvable:$true] %s5377_s23 }
 0x121   : > { %s5379_s9 = scalar_lea.hbm %s5378_s23, 1  ;;  %s5384_s26 = scalar_lea.hbm %s6082_s17, 1 }
 0x122   : > { %p5380_p8 = scmp.ne.s32.totalorder %s5378_s23, %s5379_s9  ;;  %p5385_p1 = scmp.lt.s32.totalorder %s5378_s23, %s6082_s17 }
 0x123   : > { %p5386_p2 = scmp.lt.s32.totalorder %s5384_s26, %s5379_s9 }
 0x124   : > { %p5382_p11 = pnand %p5380_p8, %p6264_p0 }
 0x125   : > { %p5387_p3 = por %p5386_p2, %p5385_p1 }
 0x126   : > { %p5383_p13 = pneg %p5382_p11 }
 0x128   : > { %p5388_p4 = pnand %p5387_p3, %p5383_p13 }
 0x12a   : > { %5391 = shalt.err (!%p5388_p4)
}
 0x12b   : > { %4730 = dma.hbm_to_vmem [thread:$0]  (!%p6253_p12), %s6367_s16, 16, %s1627_s28, [#allocation6]  }
 0x12c   : > { %s5859_s1 = smov [#allocation10]   ;;  %s1678_s0 = sshll.u32 %s6112_s25, 4  ;;  %s6389_s0 = int_to_ptr.hbm [resolvable:$true] %s1678_s0 }
 0x12d   : > { %s1653_s18 = sshll.u32 %s5859_s1, 4  ;;  %s5407_s12 = sshra.s32 %s6378_s7, 4  ;;  %s1654_s18 = int_to_ptr.vmem [resolvable:$true] %s1653_s18  ;;  %s5408_s12 = int_to_ptr.hbm [resolvable:$true] %s5407_s12 }
 0x12e   : > { %s5409_s8 = scalar_lea.hbm %s5408_s12, 1  ;;  %s5414_s23 = scalar_lea.hbm %s7192_s4, 1 }
 0x12f   : > { %p5410_p7 = scmp.ne.s32.totalorder %s5408_s12, %s5409_s8  ;;  %p5415_p13 = scmp.lt.s32.totalorder %s5408_s12, %s7192_s4 }
 0x130   : > { %p5416_p1 = scmp.lt.s32.totalorder %s5414_s23, %s5409_s8 }
 0x131   : > { %p5412_p8 = pnand %p5410_p7, %p6264_p0 }
 0x132   : > { %p5417_p2 = por %p5416_p1, %p5415_p13 }
 0x133   : > { %p5413_p11 = pneg %p5412_p8 }
 0x135   : > { %p5418_p3 = pnand %p5417_p2, %p5413_p11 }
 0x137   : > { %5421 = shalt.err (!%p5418_p3)
}
 0x138   : > { %4736 = dma.hbm_to_vmem [thread:$0]  (!%p6253_p12), %s6378_s7, 16, %s1654_s18, [#allocation9]  }
 0x139   : > { %s1704_s16 = sshll.u32 %s7191_s3, 4  ;;  %s5860_s28 = smov [#allocation13]   ;;  %s6400_s16 = int_to_ptr.hbm [resolvable:$true] %s1704_s16 }
 0x13a   : > { %s1680_s9 = sshll.u32 %s5860_s28, 4  ;;  %s5437_s26 = sshra.s32 %s6389_s0, 4  ;;  %s1681_s9 = int_to_ptr.vmem [resolvable:$true] %s1680_s9  ;;  %s5438_s26 = int_to_ptr.hbm [resolvable:$true] %s5437_s26 }
 0x13b   : > { %s5439_s1 = scalar_lea.hbm %s5438_s26, 1  ;;  %s5444_s12 = scalar_lea.hbm %s6112_s25, 1 }
 0x13c   : > { %p5440_p4 = scmp.ne.s32.totalorder %s5438_s26, %s5439_s1  ;;  %p5445_p11 = scmp.lt.s32.totalorder %s5438_s26, %s6112_s25 }
 0x13d   : > { %p5446_p13 = scmp.lt.s32.totalorder %s5444_s12, %s5439_s1 }
 0x13e   : > { %p5442_p7 = pnand %p5440_p4, %p6264_p0 }
 0x13f   : > { %p5447_p1 = por %p5446_p13, %p5445_p11 }
 0x140   : > { %p5443_p8 = pneg %p5442_p7 }
 0x142   : > { %p5448_p2 = pnand %p5447_p1, %p5443_p8 }
 0x144   : > { %5451 = shalt.err (!%p5448_p2)
}
 0x145   : > { %s7207_s7 = sld [smem:[#allocation89_spill]]  ;;  %s5861_s8 = smov [#allocation16]  }
 0x146   : > { %4742 = dma.hbm_to_vmem [thread:$0]  (!%p6253_p12), %s6389_s0, 16, %s1681_s9, [#allocation12]  }
 0x147   : > { %s1706_s23 = sshll.u32 %s5861_s8, 4  ;;  %s5467_s26 = sshra.s32 %s6400_s16, 4  ;;  %s1707_s23 = int_to_ptr.vmem [resolvable:$true] %s1706_s23  ;;  %s5468_s26 = int_to_ptr.hbm [resolvable:$true] %s5467_s26 }
 0x148   : > { %s5469_s1 = scalar_lea.hbm %s5468_s26, 1  ;;  %s5474_s12 = scalar_lea.hbm %s7191_s3, 1 }
 0x149   : > { %p5470_p3 = scmp.ne.s32.totalorder %s5468_s26, %s5469_s1  ;;  %p5475_p8 = scmp.lt.s32.totalorder %s5468_s26, %s7191_s3 }
 0x14a   : > { %p5476_p11 = scmp.lt.s32.totalorder %s5474_s12, %s5469_s1 }
 0x14b   : > { %s7208_s18 = smov %s7207_s7  ;;  %s1730_s28 = sshll.u32 %s7207_s7, 4  ;;  %s6411_s28 = int_to_ptr.hbm [resolvable:$true] %s1730_s28 }
 0x14c   : > { %p5472_p4 = pnand %p5470_p3, %p6264_p0  ;;  %p5477_p13 = por %p5476_p11, %p5475_p8 }
 0x14e   : > { %p5473_p7 = pneg %p5472_p4 }
 0x150   : > { %p5478_p1 = pnand %p5477_p13, %p5473_p7 }
 0x152   : > { %5481 = shalt.err (!%p5478_p1)
}
 0x153   : > { %s7209_s0 = sld [smem:[#allocation91_spill]]  ;;  %s5862_s8 = smov [#allocation19]  }
 0x154   : > { %4748 = dma.hbm_to_vmem [thread:$0]  (!%p6253_p12), %s6400_s16, 16, %s1707_s23, [#allocation15]  }
 0x155   : > { %s1732_s4 = sshll.u32 %s5862_s8, 4  ;;  %s5497_s26 = sshra.s32 %s6411_s28, 4  ;;  %s1733_s4 = int_to_ptr.vmem [resolvable:$true] %s1732_s4  ;;  %s5498_s26 = int_to_ptr.hbm [resolvable:$true] %s5497_s26 }
 0x156   : > { %s5499_s1 = scalar_lea.hbm %s5498_s26, 1  ;;  %s5504_s12 = scalar_lea.hbm %s7208_s18, 1 }
 0x157   : > { %p5500_p2 = scmp.ne.s32.totalorder %s5498_s26, %s5499_s1  ;;  %p5505_p7 = scmp.lt.s32.totalorder %s5498_s26, %s7208_s18 }
 0x158   : > { %p5506_p8 = scmp.lt.s32.totalorder %s5504_s12, %s5499_s1 }
 0x159   : > { %s7210_s9 = smov %s7209_s0  ;;  %s1756_s7 = sshll.u32 %s7209_s0, 4  ;;  %s6422_s7 = int_to_ptr.hbm [resolvable:$true] %s1756_s7 }
 0x15a   : > { %p5502_p3 = pnand %p5500_p2, %p6264_p0  ;;  %p5507_p11 = por %p5506_p8, %p5505_p7 }
 0x15c   : > { %p5503_p4 = pneg %p5502_p3 }
 0x15e   : > { %p5508_p13 = pnand %p5507_p11, %p5503_p4 }
 0x160   : > { %5511 = shalt.err (!%p5508_p13)
}
 0x161   : > { %s7211_s16 = sld [smem:[#allocation92_spill]]  ;;  %s5863_s23 = smov [#allocation22]  }
 0x162   : > { %4754 = dma.hbm_to_vmem [thread:$0]  (!%p6253_p12), %s6411_s28, 16, %s1733_s4, [#allocation18]  }
 0x163   : > { %s1758_s0 = sshll.u32 %s5863_s23, 4  ;;  %s5527_s26 = sshra.s32 %s6422_s7, 4  ;;  %s1759_s0 = int_to_ptr.vmem [resolvable:$true] %s1758_s0  ;;  %s5528_s26 = int_to_ptr.hbm [resolvable:$true] %s5527_s26 }
 0x164   : > { %s5529_s1 = scalar_lea.hbm %s5528_s26, 1  ;;  %s5534_s12 = scalar_lea.hbm %s7210_s9, 1 }
 0x165   : > { %p5530_p1 = scmp.ne.s32.totalorder %s5528_s26, %s5529_s1  ;;  %p5535_p4 = scmp.lt.s32.totalorder %s5528_s26, %s7210_s9 }
 0x166   : > { %p5536_p7 = scmp.lt.s32.totalorder %s5534_s12, %s5529_s1 }
 0x167   : > { %s1780_s8 = sshll.u32 %s7211_s16, 4  ;;  %p5532_p2 = pnand %p5530_p1, %p6264_p0  ;;  %s6433_s8 = int_to_ptr.hbm [resolvable:$true] %s1780_s8 }
 0x168   : > { %p5537_p8 = por %p5536_p7, %p5535_p4 }
 0x169   : > { %p5533_p3 = pneg %p5532_p2 }
 0x16b   : > { %p5538_p11 = pnand %p5537_p8, %p5533_p3 }
 0x16d   : > { %5541 = shalt.err (!%p5538_p11)
}
 0x16e   : > { %s7212_s4 = sld [smem:[#allocation94_spill]]  ;;  %s5864_s23 = smov [#allocation25]  }
 0x16f   : > { %4760 = dma.hbm_to_vmem [thread:$0]  (!%p6253_p12), %s6422_s7, 16, %s1759_s0, [#allocation21]  }
 0x170   : > { %s1782_s3 = sshll.u32 %s5864_s23, 4  ;;  %s5557_s26 = sshra.s32 %s6433_s8, 4  ;;  %s1783_s3 = int_to_ptr.vmem [resolvable:$true] %s1782_s3  ;;  %s5558_s26 = int_to_ptr.hbm [resolvable:$true] %s5557_s26 }
 0x171   : > { %s5559_s1 = scalar_lea.hbm %s5558_s26, 1  ;;  %s5564_s12 = scalar_lea.hbm %s7211_s16, 1 }
 0x172   : > { %p5560_p13 = scmp.ne.s32.totalorder %s5558_s26, %s5559_s1  ;;  %p5565_p3 = scmp.lt.s32.totalorder %s5558_s26, %s7211_s16 }
 0x173   : > { %p5566_p4 = scmp.lt.s32.totalorder %s5564_s12, %s5559_s1 }
 0x174   : > { %s1806_s28 = sshll.u32 %s7212_s4, 4  ;;  %p5562_p1 = pnand %p5560_p13, %p6264_p0  ;;  %s6444_s28 = int_to_ptr.hbm [resolvable:$true] %s1806_s28 }
 0x175   : > { %p5567_p7 = por %p5566_p4, %p5565_p3 }
 0x176   : > { %p5563_p2 = pneg %p5562_p1 }
 0x178   : > { %p5568_p8 = pnand %p5567_p7, %p5563_p2 }
 0x17a   : > { %5571 = shalt.err (!%p5568_p8)
}
 0x17b   : > { %4766 = dma.hbm_to_vmem [thread:$0]  (!%p6253_p12), %s6433_s8, 16, %s1783_s3, [#allocation24]  }
 0x17c   : > { %s5865_s7 = smov [#allocation28]   ;;  %s1833_s23 = sshll.u32 %s6177_s24, 4  ;;  %s6455_s23 = int_to_ptr.hbm [resolvable:$true] %s1833_s23 }
 0x17d   : > { %s1808_s0 = sshll.u32 %s5865_s7, 4  ;;  %s5587_s26 = sshra.s32 %s6444_s28, 4  ;;  %s1809_s0 = int_to_ptr.vmem [resolvable:$true] %s1808_s0  ;;  %s5588_s26 = int_to_ptr.hbm [resolvable:$true] %s5587_s26 }
 0x17e   : > { %s5589_s1 = scalar_lea.hbm %s5588_s26, 1  ;;  %s5594_s12 = scalar_lea.hbm %s7212_s4, 1 }
 0x17f   : > { %p5590_p11 = scmp.ne.s32.totalorder %s5588_s26, %s5589_s1  ;;  %p5595_p2 = scmp.lt.s32.totalorder %s5588_s26, %s7212_s4 }
 0x180   : > { %p5596_p3 = scmp.lt.s32.totalorder %s5594_s12, %s5589_s1 }
 0x181   : > { %p5592_p13 = pnand %p5590_p11, %p6264_p0 }
 0x182   : > { %p5597_p4 = por %p5596_p3, %p5595_p2 }
 0x183   : > { %p5593_p1 = pneg %p5592_p13 }
 0x185   : > { %p5598_p7 = pnand %p5597_p4, %p5593_p1 }
 0x187   : > { %5601 = shalt.err (!%p5598_p7)
}
 0x188   : > { %4772 = dma.hbm_to_vmem [thread:$0]  (!%p6253_p12), %s6444_s28, 16, %s1809_s0, [#allocation27]  }
 0x189   : > { %s1845_s3 = sshll.u32 %s6182_s19, 4  ;;  %s5866_s8 = smov [#allocation31]   ;;  %s6466_s3 = int_to_ptr.hbm [resolvable:$true] %s1845_s3 }
 0x18a   : > { %s1835_s7 = sshll.u32 %s5866_s8, 4  ;;  %s5617_s26 = sshra.s32 %s6455_s23, 4  ;;  %s1836_s7 = int_to_ptr.vmem [resolvable:$true] %s1835_s7  ;;  %s5618_s26 = int_to_ptr.hbm [resolvable:$true] %s5617_s26 }
 0x18b   : > { %s5619_s1 = scalar_lea.hbm %s5618_s26, 1  ;;  %s5624_s12 = scalar_lea.hbm %s6177_s24, 1 }
 0x18c   : > { %p5620_p8 = scmp.ne.s32.totalorder %s5618_s26, %s5619_s1  ;;  %p5625_p1 = scmp.lt.s32.totalorder %s5618_s26, %s6177_s24 }
 0x18d   : > { %p5626_p2 = scmp.lt.s32.totalorder %s5624_s12, %s5619_s1 }
 0x18e   : > { %p5622_p11 = pnand %p5620_p8, %p6264_p0 }
 0x18f   : > { %p5627_p3 = por %p5626_p2, %p5625_p1 }
 0x190   : > { %p5623_p13 = pneg %p5622_p11 }
 0x192   : > { %p5628_p4 = pnand %p5627_p3, %p5623_p13 }
 0x194   : > { %5631 = shalt.err (!%p5628_p4)
}
 0x195   : > { %4778 = dma.hbm_to_vmem [thread:$0]  (!%p6253_p12), %s6455_s23, 16, %s1836_s7, [#allocation30]  }
 0x196   : > { %s5867_s28 = smov [#allocation32]   ;;  %s5647_s8 = sshra.s32 %s6466_s3, 4  ;;  %s5648_s8 = int_to_ptr.hbm [resolvable:$true] %s5647_s8 }
 0x197   : > { %s1847_s0 = sshll.u32 %s5867_s28, 4  ;;  %s5649_s4 = scalar_lea.hbm %s5648_s8, 1  ;;  %s1848_s0 = int_to_ptr.vmem [resolvable:$true] %s1847_s0 }
 0x198   : > { %p5650_p7 = scmp.ne.s32.totalorder %s5648_s8, %s5649_s4  ;;  %s5654_s26 = scalar_lea.hbm %s6182_s19, 1 }
 0x199   : > { %p5655_p13 = scmp.lt.s32.totalorder %s5648_s8, %s6182_s19  ;;  %p5656_p1 = scmp.lt.s32.totalorder %s5654_s26, %s5649_s4 }
 0x19a   : > { %p5652_p8 = pnand %p5650_p7, %p6264_p0 }
 0x19b   : > { %p5657_p2 = por %p5656_p1, %p5655_p13 }
 0x19c   : > { %p5653_p11 = pneg %p5652_p8 }
 0x19e   : > { %p5658_p3 = pnand %p5657_p2, %p5653_p11 }
 0x1a0   : > { %5661 = shalt.err (!%p5658_p3)
}
 0x1a1   : > { %4781 = dma.hbm_to_vmem [thread:$0]  (!%p6253_p12), %s6466_s3, 16, %s1848_s0, [#allocation33]  }
 0x1a2   : > { %1900 = sbr.rel (%p6243_p10) target bundleno = 6246 (0x1866), region = 260 }
 0x1a7   : > { %5722 = dma.done.wait (%p4786_p9), [#allocation3], 16  }
 0x1a8   : > { %5724 = vsyncadd (%p4786_p9), [#allocation3], 4294967280 }
 0x1a9   : > { %5726 = dma.done.wait (%p4786_p9), [#allocation6], 32  }
 0x1aa   : > { %5728 = vsyncadd (%p4786_p9), [#allocation6], 4294967264 }
 0x1ab   : > { %5730 = dma.done.wait (%p4786_p9), [#allocation9], 32  }
 0x1ac   : > { %5732 = vsyncadd (%p4786_p9), [#allocation9], 4294967264 }
 0x1ad   : > { %5734 = dma.done.wait (%p4786_p9), [#allocation12], 32  }
 0x1ae   : > { %5736 = vsyncadd (%p4786_p9), [#allocation12], 4294967264 }
 0x1af   : > { %5738 = dma.done.wait (%p4786_p9), [#allocation15], 1040  }
 0x1b0   : > { %5740 = vsyncadd (%p4786_p9), [#allocation15], 4294966256 }
 0x1b1   : > { %5742 = dma.done.wait (%p4786_p9), [#allocation18], 1040  }
 0x1b2   : > { %5744 = vsyncadd (%p4786_p9), [#allocation18], 4294966256 }
 0x1b3   : > { %5746 = dma.done.wait (%p4786_p9), [#allocation21], 1040  }
 0x1b4   : > { %5748 = vsyncadd (%p4786_p9), [#allocation21], 4294966256 }
 0x1b5   : > { %5750 = dma.done.wait (%p4786_p9), [#allocation24], 32  }
 0x1b6   : > { %5752 = vsyncadd (%p4786_p9), [#allocation24], 4294967264 }
 0x1b7   : > { %5754 = dma.done.wait (%p4786_p9), [#allocation27], 1040  }
 0x1b8   : > { %5756 = vsyncadd (%p4786_p9), [#allocation27], 4294966256 }
 0x1b9   : > { %5758 = dma.done.wait (%p4786_p9), [#allocation30], 32  }
 0x1ba   : > { %5760 = vsyncadd (%p4786_p9), [#allocation30], 4294967264 }
 0x1bb   : > { %5762 = dma.done.wait (%p4786_p9), [#allocation33], 16  }
 0x1bc   : > { %5764 = vsyncadd (%p4786_p9), [#allocation33], 4294967280  ;;  %s7213_s11 = sld [smem:[#allocation48_spill]]  ;;  %p2156_p10 = scmp.lt.s32.totalorder %s6215_s15, 1  ;;  %v5868_v0 = vmov 0   ;;  %vm2206_vm0 = vcmask 261120   ;;  %v2268_v31 = vlaneseq }
 0x1bd   : > { %s7214_s2 = sld [smem:[#allocation57_spill]]  ;;  %4953 = vset.pattern.permute.xlu0 %v5868_v0  ;;  %4954 = vset.pattern.permute.xlu2 %v5868_v0  ;;  %v5869_v34 = vmov 1.0   ;;  %vm2243_vm2 = vcmask 523264   ;;  %v5870_v48 = vmov 64.0   ;;  %vm2456_vm7 = vcmask 130048   ;;  %s7256_s9 = smov 32  }
 0x1be   : > { %s7215_s22 = sld [smem:[#allocation47_spill]]  ;;  %4955 = vset.pattern.permute.xlu1 %v5868_v0  ;;  %v6619_v32 = vand.u32 127, %v2268_v31  ;;  %4989 = vrcp.f32 %v5870_v48  ;;  %vm2483_vm8 = vcmask 64512   ;;  %vm2728_vm10 = vcmask 392192  }
 0x1bf   : > { %s7216_s4 = sld [smem:[#allocation53_spill]] }
 0x1c0   : > { %s6532_s23 = scalar_select %p2156_p10, %s6215_s15, 1 }
 0x1c1   : > { %s7217_s1 = sld [smem:[#allocation59_spill]] }
 0x1c2   : > { %s6535_s3 = sshll.u32 %s6532_s23, 3  ;;  %s7218_s28 = sld [smem:[#allocation58_spill]] }
 0x1c3   : > { %s2163_s7 = scalar_lea.vmem %s7213_s11, %s6535_s3  ;;  %v2201_v1 = vld [vmem:[%s7214_s2 + $0x18] sm:$0xff]  ;;  %v2200_v2 = vld [vmem:[%s7214_s2 + $0x10] sm:$0xff]  ;;  %v2199_v3 = vld [vmem:[%s7214_s2 + $0x8] sm:$0xff]  ;;  %s7219_s0 = sld [smem:[#allocation60_spill]] }
 0x1c4   : > { %2222 = vmatpush.msra.mxu0 %v2201_v1  ;;  %s2159_s12 = scalar_lea.vmem %s7215_s22, %s6535_s3  ;;  %v2267_v4 = vld [vmem:[%s2163_s7] sm:$0xff]  ;;  %s7220_s8 = sld [smem:[#allocation55_spill]]  ;;  %v4990_v49 = vpop.eup %4989 }
 0x1c5   : > { %v6545_v5 = vld [vmem:[%s7216_s4 + $0x78] sm:$0xff]  ;;  %2271 = vperm.xlu0 %4953, %v2267_v4   ;;  %v6548_v6 = vld [vmem:[%s7216_s4 + $0x70] sm:$0xff]  ;;  %v2198_v7 = vld [vmem:[%s7214_s2] sm:$0xff]  ;;  %s7221_s26 = sld [smem:[#allocation65_spill]]  ;;  %v2306_v50 = vmul.f32 64.0, %v4990_v49  ;;  %vm2310_vm3 = vweird.f32 %v4990_v49 }
 0x1c6   : > { %2223 = vmatpush.msra.mxu0 %v2200_v2  ;;  %2276 = vmatpush.msra.mxu3 %v6545_v5  ;;  %v2197_v8 = vld [vmem:[%s2159_s12] sm:$0xff]  ;;  %v6553_v9 = vld [vmem:[%s7216_s4 + $0x68] sm:$0xff]  ;;  %v6562_v13 = vld [vmem:[%s7216_s4 + $0x58] sm:$0xff]  ;;  %s7222_s11 = sld [smem:[#allocation69_spill]] }
 0x1c7   : > { %v2238_v10 = vld [vmem:[%s7217_s1 + $0x38] sm:$0xff]  ;;  %v2237_v11 = vld [vmem:[%s7217_s1 + $0x30] sm:$0xff]  ;;  %v6559_v12 = vld [vmem:[%s7216_s4 + $0x60] sm:$0xff]  ;;  %v2307_v51 = vsub.f32 1.0, %v2306_v50  ;;  %s7224_s7 = sld [smem:[#allocation67_spill]] }
 0x1c8   : > { %2224 = vmatpush.msra.mxu0 %v2199_v3  ;;  %2277 = vmatpush.msra.mxu3 %v6548_v6  ;;  %v2236_v14 = vld [vmem:[%s7217_s1 + $0x28] sm:$0xff]  ;;  %v2235_v15 = vld [vmem:[%s7217_s1 + $0x20] sm:$0xff]  ;;  %v6569_v16 = vld [vmem:[%s7216_s4 + $0x50] sm:$0xff]  ;;  %s7242_s2 = sld [smem:[#allocation77_spill]] }
 0x1c9   : > { %2255 = vmatpush.msra.mxu1 %v2238_v10  ;;  %v6573_v17 = vld [vmem:[%s7216_s4 + $0x48] sm:$0xff]  ;;  %v6577_v18 = vld [vmem:[%s7216_s4 + $0x40] sm:$0xff]  ;;  %v6581_v19 = vld [vmem:[%s7216_s4 + $0x38] sm:$0xff]  ;;  %v2308_v52 = vmul.f32 %v4990_v49, %v2307_v51  ;;  %s7254_s6 = sld [smem:[#allocation84_spill]] }
 0x1ca   : > { %2225 = vmatpush.msra.mxu0 %v2198_v7  ;;  %2278 = vmatpush.msra.mxu3 %v6553_v9  ;;  %v6586_v20 = vld [vmem:[%s7216_s4 + $0x30] sm:$0xff]  ;;  %v6590_v21 = vld [vmem:[%s7216_s4 + $0x28] sm:$0xff]  ;;  %v6594_v22 = vld [vmem:[%s7216_s4 + $0x20] sm:$0xff] }
 0x1cb   : > { %4561 = vmatmul.msk.f32.vlgmr.msra.gmra.mxu0 %vm2206_vm0, %v2197_v8  ;;  %2256 = vmatpush.msra.mxu1 %v2237_v11  ;;  %v6598_v23 = vld [vmem:[%s7216_s4 + $0x18] sm:$0xff]  ;;  %v6602_v24 = vld [vmem:[%s7216_s4 + $0x10] sm:$0xff]  ;;  %v6606_v25 = vld [vmem:[%s7216_s4 + $0x8] sm:$0xff]  ;;  %v2309_v53 = vadd.f32 %v4990_v49, %v2308_v52 }
 0x1cc   : > { %2279 = vmatpush.msra.mxu3 %v6559_v12  ;;  %v2234_v26 = vld [vmem:[%s7217_s1 + $0x18] sm:$0xff]  ;;  %v6612_v27 = vld [vmem:[%s7216_s4] sm:$0xff]  ;;  %v2233_v28 = vld [vmem:[%s7217_s1 + $0x10] sm:$0xff]  ;;  %s7223_s22 = smov %s7222_s11 }
 0x1cd   : > { %2257 = vmatpush.msra.mxu1 %v2236_v14  ;;  %v2232_v29 = vld [vmem:[%s7217_s1 + $0x8] sm:$0xff]  ;;  %v2231_v30 = vld [vmem:[%s7217_s1] sm:$0xff]  ;;  %v6628_v54 = vsel %vm2310_vm3, %v4990_v49, %v2309_v53  ;;  %v2360_v60 = vld [vmem:[%s7221_s26 + $0x38] sm:$0xff]  ;;  %s7225_s12 = smov %s7224_s7  ;;  %s7241_s1 = sld [smem:[#allocation75_spill]] }
 0x1ce   : > { %2280 = vmatpush.msra.mxu3 %v6562_v13  ;;  %v4956_v35 = vld [vmem:[%s7218_s28] ss:$0 sm:$0xff]  ;;  %2376 = vmatpush.msrb.mxu0 %v2360_v60  ;;  %v2359_v61 = vld [vmem:[%s7221_s26 + $0x30] sm:$0xff]  ;;  %v2358_v62 = vld [vmem:[%s7221_s26 + $0x28] sm:$0xff]  ;;  %s7226_s28 = sld [smem:[#allocation61_spill]] }
 0x1cf   : > { %2258 = vmatpush.msra.mxu1 %v2235_v15  ;;  %v4957_v40 = vld [vmem:[%s7219_s0] ss:$0 sm:$0xff]  ;;  %v2428_v0 = vld [vmem:[%s7222_s11 + $0x38] sm:$0xff]  ;;  %v2427_v2 = vld [vmem:[%s7223_s22 + $0x30] sm:$0xff]  ;;  %s7227_s0 = sld [smem:[#allocation62_spill]] }
 0x1d0   : > { %2281 = vmatpush.msra.mxu3 %v6569_v16  ;;  %v2298_v44 = vld [vmem:[%s7220_s8] sm:$0xff]  ;;  %2377 = vmatpush.msrb.mxu0 %v2359_v61  ;;  %v2356_v1 = vld [vmem:[%s7221_s26 + $0x18] sm:$0xff]  ;;  %v2355_v3 = vld [vmem:[%s7221_s26 + $0x10] sm:$0xff]  ;;  %s7228_s8 = sld [smem:[#allocation66_spill]] }
 0x1d1   : > { %2259 = vmatpush.msra.mxu1 %v2234_v26  ;;  %v2357_v63 = vld [vmem:[%s7221_s26 + $0x20] sm:$0xff]  ;;  %v2426_v4 = vld [vmem:[%s7223_s22 + $0x28] sm:$0xff]  ;;  %v2396_v11 = vld [vmem:[%s7224_s7 + $0x38] sm:$0xff]  ;;  %s7229_s11 = sld [smem:[#allocation70_spill]] }
 0x1d2   : > { %2282 = vmatpush.msra.mxu3 %v6573_v17  ;;  %2378 = vmatpush.msrb.mxu0 %v2358_v62  ;;  %v2354_v7 = vld [vmem:[%s7221_s26 + $0x8] sm:$0xff]  ;;  %v2425_v8 = vld [vmem:[%s7223_s22 + $0x20] sm:$0xff]  ;;  %v2424_v14 = vld [vmem:[%s7223_s22 + $0x18] sm:$0xff]  ;;  %s7230_s7 = sld [smem:[#allocation68_spill]] }
 0x1d3   : > { %2260 = vmatpush.msra.mxu1 %v2233_v28  ;;  %v2353_v10 = vld [vmem:[%s7221_s26] sm:$0xff]  ;;  %v2395_v15 = vld [vmem:[%s7225_s12 + $0x30] sm:$0xff]  ;;  %v2394_v28 = vld [vmem:[%s7225_s12 + $0x28] sm:$0xff] }
 0x1d4   : > { %2283 = vmatpush.msra.mxu3 %v6577_v18  ;;  %2379 = vmatpush.msrb.mxu0 %v2357_v63  ;;  %v2423_v26 = vld [vmem:[%s7223_s22 + $0x10] sm:$0xff]  ;;  %v4958_v48 = vld [vmem:[%s7226_s28] ss:$0 sm:$0xff]  ;;  %s7110_s28 = smov 112  }
 0x1d5   : > { %2261 = vmatpush.msra.mxu1 %v2232_v29  ;;  %v2422_v29 = vld [vmem:[%s7223_s22 + $0x8] sm:$0xff]  ;;  %v4959_v51 = vld [vmem:[%s7227_s0] ss:$0 sm:$0xff]  ;;  %s7112_s0 = smov 96  }
 0x1d6   : > { %2284 = vmatpush.msra.mxu3 %v6581_v19  ;;  %2380 = vmatpush.msrb.mxu0 %v2356_v1 }
 0x1d7   : > { %2262 = vmatpush.msra.mxu1 %v2231_v30  ;;  %v2393_v30 = vld [vmem:[%s7225_s12 + $0x20] sm:$0xff] }
 0x1d8   : > { %2285 = vmatpush.msra.mxu3 %v6586_v20  ;;  %2381 = vmatpush.msrb.mxu0 %v2355_v3  ;;  %v4962_v62 = vld [vmem:[%s7230_s7] ss:$0 sm:$0xff] }
 0x1d9   : > { %2441 = vmatpush.msrb.mxu1 %v2428_v0 }
 0x1da   : > { %2286 = vmatpush.msra.mxu3 %v6590_v21  ;;  %2382 = vmatpush.msrb.mxu0 %v2354_v7 }
 0x1db   : > { %2442 = vmatpush.msrb.mxu1 %v2427_v2 }
 0x1dc   : > { %2287 = vmatpush.msra.mxu3 %v6594_v22  ;;  %2383 = vmatpush.msrb.mxu0 %v2353_v10 }
 0x1dd   : > { %2443 = vmatpush.msrb.mxu1 %v2426_v4 }
 0x1de   : > { %2288 = vmatpush.msra.mxu3 %v6598_v23  ;;  %2409 = vmatpush.msra.mxu0 %v2396_v11 }
 0x1df   : > { %2444 = vmatpush.msrb.mxu1 %v2425_v8 }
 0x1e0   : > { %2289 = vmatpush.msra.mxu3 %v6602_v24  ;;  %2410 = vmatpush.msra.mxu0 %v2395_v15 }
 0x1e1   : > { %2445 = vmatpush.msrb.mxu1 %v2424_v14 }
 0x1e2   : > { %2290 = vmatpush.msra.mxu3 %v6606_v25  ;;  %2411 = vmatpush.msra.mxu0 %v2394_v28 }
 0x1e3   : > { %2446 = vmatpush.msrb.mxu1 %v2423_v26 }
 0x1e4   : > { %2291 = vmatpush.msra.mxu3 %v6612_v27  ;;  %2412 = vmatpush.msra.mxu0 %v2393_v30 }
 0x1e5   : > { %2447 = vmatpush.msrb.mxu1 %v2422_v29 }
 0x237   : > { %v2272_v33 = vpop.permute.xlu0 %2271 }
 0x238   : > { %vm2273_vm1 = vcmp.eq.s32.totalorder %v6619_v32, %v2272_v33  ;;  %v2421_v33 = vld [vmem:[%s7223_s22] sm:$0xff] }
 0x239   : > { %4564 = vmatmul.msk.f32.vlgmr.msra.gmra.mxu3 %vm2273_vm1, %v5869_v34  ;;  %2448 = vmatpush.msrb.mxu1 %v2421_v33 }
 0x248   : > { %v2227_v36 = vpop.f32.mrf.mxu0 }
 0x249   : > { %v2228_v37 = vadd.f32 %v4956_v35, %v2227_v36  ;;  %v2392_v35 = vld [vmem:[%s7225_s12 + $0x18] sm:$0xff]  ;;  %v2391_v36 = vld [vmem:[%s7225_s12 + $0x10] sm:$0xff] }
 0x24a   : > { %2413 = vmatpush.msra.mxu0 %v2392_v35 }
 0x24b   : > { %v2230_v38 = vmax.f32 %v2228_v37, 0.0  ;;  %v2390_v37 = vld [vmem:[%s7225_s12 + $0x8] sm:$0xff] }
 0x24c   : > { %2414 = vmatpush.msra.mxu0 %v2391_v36 }
 0x24d   : > { %4562 = vmatmul.msk.f32.vlgmr.msra.gmra.mxu1 %vm2243_vm2, %v2230_v38 }
 0x24e   : > { %2415 = vmatpush.msra.mxu0 %v2390_v37 }
 0x2bc   : > { %v2293_v39 = vpop.f32.mrf.mxu3 }
 0x2bd   : > { %v2296_v41 = vmul.f32 8.0, %v2293_v39 }
 0x2ca   : > { %v2264_v42 = vpop.f32.mrf.mxu1 }
 0x2cb   : > { %v2265_v43 = vadd.f32 %v4957_v40, %v2264_v42  ;;  %v2389_v40 = vld [vmem:[%s7225_s12] sm:$0xff] }
 0x2cc   : > { %2416 = vmatpush.msra.mxu0 %v2389_v40 }
 0x2cd   : > { %v2297_v45 = vadd.f32 %v2296_v41, %v2265_v43 }
 0x2cf   : > { %v2299_v46 = vadd.f32 %v2298_v44, %v2297_v45 }
 0x2d1   : > { %v2302_v47 = vsel %vm2243_vm2, %v2299_v46, 0.0 }
 0x2d2   : > { %2303 = vadd.xlane.f32.xlu0 %v2302_v47 }
 0x345   : > { %v2304_v55 = vpop.xlane.xlu0 %2303 }
 0x346   : > { %v2312_v56 = vmul.f32 %v6628_v54, %v2304_v55  ;;  %v4960_v55 = vld [vmem:[%s7228_s8] ss:$0 sm:$0xff]  ;;  %s7231_s8 = sld [smem:[#allocation51_spill]] }
 0x348   : > { %v6631_v57 = vsub.f32 %v2299_v46, %v2312_v56  ;;  %v4961_v56 = vld [vmem:[%s7229_s11] ss:$0 sm:$0xff]  ;;  %s7108_s11 = smov 80  }
 0x34a   : > { %v2314_v58 = vmul.f32 %v6631_v57, %v6631_v57 }
 0x34c   : > { %v2315_v59 = vsel %vm2243_vm2, %v2314_v58, 0.0  ;;  %s2174_s7 = scalar_lea.vmem %s7231_s8, %s6532_s23  ;;  %s7232_s8 = sld [smem:[#allocation49_spill]] }
 0x34d   : > { %2316 = vadd.xlane.f32.xlu1 %v2315_v59  ;;  %v2339_v8 = vld [vmem:[%s2174_s7] sm:$0x1] }
 0x34e   : > { %v2340_v10 = vsub.f32 1.0, %v2339_v8 }
 0x350   : > { %v2341_v14 = vmul.f32 -1e+09, %v2340_v10 }
 0x352   : > { %v6694_v15 = vperm.slane %v2341_v14, 0  ;;  %s2167_s7 = scalar_lea.vmem %s7232_s8, %s6535_s3  ;;  %s7233_s8 = sld [smem:[#allocation71_spill]] }
 0x3c0   : > { %v2317_v38 = vpop.xlane.xlu1 %2316 }
 0x3c1   : > { %v2318_v39 = vmul.f32 %v2317_v38, %v6628_v54 }
 0x3c3   : > { %v2319_v41 = vadd.f32 1e-05, %v2318_v39 }
 0x3c5   : > { %4991 = vrsqrt.f32 %v2319_v41  ;;  %vm2326_vm5 = vweird.f32 %v2319_v41 }
 0x3cb   : > { %v4992_v42 = vpop.eup %4991 }
 0x3cc   : > { %v2321_v43 = vmul.f32 %v4992_v42, %v2319_v41  ;;  %vm2327_vm4 = vweird.f32 %v4992_v42 }
 0x3cd   : > { %vm2328_vm6 = vmor %vm2326_vm5, %vm2327_vm4 }
 0x3ce   : > { %v2322_v44 = vmul.f32 %v4992_v42, %v2321_v43 }
 0x3d0   : > { %v2323_v45 = vmul.f32 0.5, %v2322_v44 }
 0x3d2   : > { %v2324_v46 = vsub.f32 1.5, %v2323_v45 }
 0x3d4   : > { %v2325_v47 = vmul.f32 %v4992_v42, %v2324_v46 }
 0x3d6   : > { %v2329_v49 = vsel %vm2328_vm6, %v4992_v42, %v2325_v47 }
 0x3d7   : > { %v2330_v50 = vmul.f32 %v2329_v49, %v6631_v57 }
 0x3d9   : > { %v2334_v52 = vmul.f32 %v4958_v48, %v2330_v50 }
 0x3db   : > { %v6664_v53 = vadd.f32 %v4959_v51, %v2334_v52 }
 0x3dd   : > { %4565 = vmatmul.msk.f32.vlgmr.msrb.gmra.mxu0 %vm2243_vm2, %v6664_v53  ;;  %4567 = vmatmul.msk.f32.vlgmr.msrb.gmra.mxu1 %vm2243_vm2, %v6664_v53 }
 0x3e5   : > { %4566 = vmatmul.msk.f32.vlgmr.msra.gmra.mxu0 %vm2243_vm2, %v6664_v53 }
 0x45a   : > { %v2385_v58 = vpop.f32.mrf.mxu0  ;;  %v2450_v59 = vpop.f32.mrf.mxu1 }
 0x45b   : > { %v2386_v60 = vadd.f32 %v4960_v55, %v2385_v58  ;;  %v6674_v57 = vadd.f32 %v4961_v56, %v2450_v59 }
 0x45d   : > { %v2388_v61 = vmul.f32 0.25, %v2386_v60  ;;  %2513 = vmatpush.msrb.mxu0 %v6674_v57 }
 0x45f   : > { %2518 = vrot.lane.b32.xlu2 %v2388_v61, %s7110_s28 }
 0x462   : > { %v2418_v63 = vpop.f32.mrf.mxu0 }
 0x463   : > { %v2419_v0 = vadd.f32 %v4962_v62, %v2418_v63 }
 0x465   : > { %2520 = vrot.lane.b32.xlu1 %v2419_v0, %s7110_s28  ;;  %4568 = vmatpush.xpose.msk.msrb.mxu3 %vm2456_vm7, %v2419_v0 }
 0x467   : > { %2584 = vrot.lane.b32.xlu2 %v2388_v61, %s7112_s0 }
 0x468   : > { %4569 = vmatmul.msk.f32.vlgmr.msrb.gmra.mxu3 %vm2456_vm7, %v2388_v61 }
 0x46f   : > { %2586 = vrot.lane.b32.xlu2 %v2419_v0, %s7112_s0 }
 0x477   : > { %2651 = vrot.lane.b32.xlu2 %v2419_v0, %s7108_s11 }
 0x47f   : > { %2649 = vrot.lane.b32.xlu2 %v2388_v61, %s7108_s11 }
 0x4b9   : > { %v2519_v1 = vpop.permute.xlu2 %2518 }
 0x4c1   : > { %v2585_v2 = vpop.permute.xlu2 %2584 }
 0x4c9   : > { %v2587_v3 = vpop.permute.xlu2 %2586 }
 0x4ca   : > { %4574 = vmatpush.xpose.msk.msra.mxu1 %vm2456_vm7, %v2587_v3 }
 0x4cd   : > { %4575 = vmatmul.msk.f32.vlgmr.msra.gmra.mxu1 %vm2456_vm7, %v2585_v2 }
 0x4d1   : > { %v2652_v7 = vpop.permute.xlu2 %2651 }
 0x4d7   : > { %v2521_v4 = vpop.permute.xlu1 %2520 }
 0x4d8   : > { %4571 = vmatpush.xpose.msk.msra.mxu3 %vm2456_vm7, %v2521_v4 }
 0x4d9   : > { %v2650_v11 = vpop.permute.xlu2 %2649 }
 0x4db   : > { %4572 = vmatmul.msk.f32.vlgmr.msra.gmra.mxu3 %vm2456_vm7, %v2519_v1 }
 0x4dc   : > { %4577 = vmatpush.xpose.msk.msrb.mxu3 %vm2456_vm7, %v2652_v7  ;;  %v2915_v7 = vld [vmem:[%s2167_s7] sm:$0xff]  ;;  %s7114_s7 = smov 32  }
 0x4e3   : > { %4578 = vmatmul.msk.f32.vlgmr.msrb.gmra.mxu3 %vm2456_vm7, %v2650_v11 }
 0x4eb   : > { %v2480_v26 = vpop.f32.mrf.mxu3 }
 0x4ec   : > { %v2481_v28 = vadd.f32 %v2480_v26, %v6694_v15 }
 0x4ee   : > { %v2484_v29 = vsel %vm2483_vm8, %v2481_v28, -inf }
 0x4ef   : > { %2485 = vmax.xlane.f32.xlu1 %v2484_v29 }
 0x54a   : > { %v2609_v30 = vpop.f32.mrf.mxu1 }
 0x54b   : > { %v2610_v33 = vadd.f32 %v2609_v30, %v6694_v15 }
 0x54d   : > { %v2612_v35 = vsel %vm2483_vm8, %v2610_v33, -inf }
 0x54e   : > { %2613 = vmax.xlane.f32.xlu0 %v2612_v35 }
 0x55e   : > { %v2543_v36 = vpop.f32.mrf.mxu3 }
 0x55f   : > { %v2544_v37 = vadd.f32 %v2543_v36, %v6694_v15 }
 0x561   : > { %v2546_v38 = vsel %vm2483_vm8, %v2544_v37, -inf }
 0x562   : > { %2547 = vmax.xlane.f32.xlu2 %v2546_v38  ;;  %v2486_v39 = vpop.xlane.xlu1 %2485 }
 0x563   : > { %v2487_v40 = vsub.f32 %v2481_v28, %v2486_v39 }
 0x565   : > { %v2488_v41 = vmul.f32 1.442695, %v2487_v40 }
 0x566   : > { %v2674_v42 = vpop.f32.mrf.mxu3 }
 0x567   : > { %v2675_v43 = vadd.f32 %v2674_v42, %v6694_v15  ;;  %4993 = vpow2.f32 %v2488_v41 }
 0x569   : > { %v2677_v44 = vsel %vm2483_vm8, %v2675_v43, -inf }
 0x56a   : > { %2678 = vmax.xlane.f32.xlu0 %v2677_v44 }
 0x56d   : > { %v4994_v45 = vpop.eup %4993 }
 0x56e   : > { %v2490_v46 = vsel %vm2483_vm8, %v4994_v45, 0.0 }
 0x572   : > { %2491 = vadd.xlane.f32.xlu0 %v2490_v46 }
 0x5c1   : > { %v2614_v47 = vpop.xlane.xlu0 %2613 }
 0x5c2   : > { %v2615_v48 = vsub.f32 %v2610_v33, %v2614_v47 }
 0x5c4   : > { %v2616_v49 = vmul.f32 1.442695, %v2615_v48 }
 0x5c6   : > { %4995 = vpow2.f32 %v2616_v49 }
 0x5cc   : > { %v4996_v50 = vpop.eup %4995 }
 0x5cd   : > { %v2618_v51 = vsel %vm2483_vm8, %v4996_v50, 0.0 }
 0x5ce   : > { %2619 = vadd.xlane.f32.xlu1 %v2618_v51 }
 0x5d5   : > { %v2548_v52 = vpop.xlane.xlu2 %2547 }
 0x5d6   : > { %v2549_v55 = vsub.f32 %v2544_v37, %v2548_v52 }
 0x5d8   : > { %v2550_v56 = vmul.f32 1.442695, %v2549_v55 }
 0x5da   : > { %4997 = vpow2.f32 %v2550_v56 }
 0x5dd   : > { %v2679_v58 = vpop.xlane.xlu0 %2678 }
 0x5de   : > { %v2680_v59 = vsub.f32 %v2675_v43, %v2679_v58 }
 0x5e0   : > { %v4998_v60 = vpop.eup %4997  ;;  %v2681_v61 = vmul.f32 1.442695, %v2680_v59 }
 0x5e1   : > { %v2552_v62 = vsel %vm2483_vm8, %v4998_v60, 0.0 }
 0x5e2   : > { %4999 = vpow2.f32 %v2681_v61  ;;  %2553 = vadd.xlane.f32.xlu0 %v2552_v62 }
 0x5e5   : > { %v2492_v63 = vpop.xlane.xlu0 %2491 }
 0x5e6   : > { %5001 = vrcp.f32 %v2492_v63 }
 0x5e7   : > { %2623 = vrot.lane.b32.xlu1 %v6674_v57, %s7112_s0  ;;  %s7234_s0 = sld [smem:[#allocation56_spill]] }
 0x5e8   : > { %v5000_v0 = vpop.eup %4999 }
 0x5e9   : > { %v2683_v1 = vsel %vm2483_vm8, %v5000_v0, 0.0 }
 0x5ea   : > { %2684 = vadd.xlane.f32.xlu2 %v2683_v1 }
 0x5ec   : > { %v5002_v2 = vpop.eup %5001 }
 0x5ed   : > { %v2494_v3 = vmul.f32 %v5002_v2, %v4994_v45 }
 0x5ef   : > { %4570 = vmatmul.msk.f32.vlgmr.msrb.gmra.mxu0 %vm2483_vm8, %v2494_v3 }
 0x5f6   : > { %2558 = vrot.lane.b32.xlu0 %v6674_v57, %s7110_s28  ;;  %s7116_s28 = smov 48  }
 0x602   : > { %2688 = vrot.lane.b32.xlu2 %v6674_v57, %s7108_s11  ;;  %s7118_s11 = smov 16  }
 0x60a   : > { %2917 = vperm.xlu2 %4954, %v2915_v7  }
 0x641   : > { %v2620_v4 = vpop.xlane.xlu1 %2619 }
 0x642   : > { %5003 = vrcp.f32 %v2620_v4 }
 0x648   : > { %v5004_v8 = vpop.eup %5003 }
 0x649   : > { %v2622_v11 = vmul.f32 %v5004_v8, %v4996_v50 }
 0x655   : > { %v2554_v14 = vpop.xlane.xlu0 %2553 }
 0x656   : > { %5005 = vrcp.f32 %v2554_v14 }
 0x659   : > { %v2624_v10 = vpop.permute.xlu1 %2623 }
 0x65a   : > { %2644 = vmatpush.msra.mxu2 %v2624_v10 }
 0x65b   : > { %4576 = vmatmul.msk.f32.vlgmr.msra.gmra.mxu2 %vm2483_vm8, %v2622_v11 }
 0x65c   : > { %v5006_v28 = vpop.eup %5005 }
 0x65d   : > { %v2685_v26 = vpop.xlane.xlu2 %2684  ;;  %v2556_v29 = vmul.f32 %v5006_v28, %v4998_v60 }
 0x65e   : > { %5007 = vrcp.f32 %v2685_v26 }
 0x664   : > { %v5008_v33 = vpop.eup %5007 }
 0x665   : > { %v2689_v57 = vpop.permute.xlu2 %2688  ;;  %v2687_v35 = vmul.f32 %v5008_v33, %v5000_v0 }
 0x668   : > { %v2559_v30 = vpop.permute.xlu0 %2558 }
 0x669   : > { %2579 = vmatpush.msra.mxu0 %v2559_v30 }
 0x66a   : > { %4573 = vmatmul.msk.f32.vlgmr.msra.gmra.mxu0 %vm2483_vm8, %v2556_v29 }
 0x66b   : > { %2709 = vmatpush.msrb.mxu0 %v2689_v57 }
 0x66d   : > { %2922 = vmatpush.msra.mxu0 %v6545_v5  ;;  %v2918_v5 = vpop.permute.xlu2 %2917 }
 0x66e   : > { %vm2919_vm9 = vcmp.eq.s32.totalorder %v6619_v32, %v2918_v5 }
 0x66f   : > { %2923 = vmatpush.msra.mxu0 %v6548_v6 }
 0x671   : > { %2924 = vmatpush.msra.mxu0 %v6553_v9  ;;  %v2515_v9 = vpop.f32.mrf.mxu0 }
 0x672   : > { %4579 = vmatmul.msk.f32.vlgmr.msrb.gmra.mxu0 %vm2483_vm8, %v2687_v35 }
 0x673   : > { %2925 = vmatpush.msra.mxu0 %v6559_v12 }
 0x675   : > { %2926 = vmatpush.msra.mxu0 %v6562_v13 }
 0x677   : > { %2927 = vmatpush.msra.mxu0 %v6569_v16  ;;  %v2737_v16 = vld [vmem:[%s7233_s8 + $0x38] sm:$0xff] }
 0x678   : > { %2753 = vmatpush.msrb.mxu1 %v2737_v16 }
 0x679   : > { %2928 = vmatpush.msra.mxu0 %v6573_v17  ;;  %v2736_v17 = vld [vmem:[%s7233_s8 + $0x30] sm:$0xff] }
 0x67a   : > { %2754 = vmatpush.msrb.mxu1 %v2736_v17 }
 0x67b   : > { %2929 = vmatpush.msra.mxu0 %v6577_v18  ;;  %v2735_v18 = vld [vmem:[%s7233_s8 + $0x28] sm:$0xff] }
 0x67c   : > { %2755 = vmatpush.msrb.mxu1 %v2735_v18 }
 0x67d   : > { %2930 = vmatpush.msra.mxu0 %v6581_v19  ;;  %v2734_v19 = vld [vmem:[%s7233_s8 + $0x20] sm:$0xff] }
 0x67e   : > { %2756 = vmatpush.msrb.mxu1 %v2734_v19 }
 0x67f   : > { %2931 = vmatpush.msra.mxu0 %v6586_v20  ;;  %v2733_v20 = vld [vmem:[%s7233_s8 + $0x18] sm:$0xff] }
 0x680   : > { %2757 = vmatpush.msrb.mxu1 %v2733_v20 }
 0x681   : > { %2932 = vmatpush.msra.mxu0 %v6590_v21  ;;  %v2732_v21 = vld [vmem:[%s7233_s8 + $0x10] sm:$0xff] }
 0x682   : > { %2758 = vmatpush.msrb.mxu1 %v2732_v21  ;;  %v2805_v21 = vld [vmem:[%s7241_s1 + $0x38] sm:$0xff] }
 0x683   : > { %2933 = vmatpush.msra.mxu0 %v6594_v22  ;;  %v2731_v22 = vld [vmem:[%s7233_s8 + $0x8] sm:$0xff]  ;;  %2821 = vmatpush.msrb.mxu2 %v2805_v21 }
 0x684   : > { %2759 = vmatpush.msrb.mxu1 %v2731_v22  ;;  %v2804_v22 = vld [vmem:[%s7241_s1 + $0x30] sm:$0xff] }
 0x685   : > { %2934 = vmatpush.msra.mxu0 %v6598_v23  ;;  %v2730_v23 = vld [vmem:[%s7233_s8] sm:$0xff]  ;;  %2822 = vmatpush.msrb.mxu2 %v2804_v22  ;;  %s7255_s8 = smov 48  }
 0x686   : > { %2760 = vmatpush.msrb.mxu1 %v2730_v23  ;;  %v2803_v23 = vld [vmem:[%s7241_s1 + $0x28] sm:$0xff] }
 0x687   : > { %2935 = vmatpush.msra.mxu0 %v6602_v24  ;;  %2823 = vmatpush.msrb.mxu2 %v2803_v23 }
 0x689   : > { %2936 = vmatpush.msra.mxu0 %v6606_v25  ;;  %v2943_v25 = vld [vmem:[%s7234_s0] sm:$0xff]  ;;  %s7237_s0 = sld [smem:[#allocation83_spill]] }
 0x68b   : > { %2937 = vmatpush.msra.mxu0 %v6612_v27 }
 0x68c   : > { %4583 = vmatmul.msk.f32.vlgmr.msra.gmra.mxu0 %vm2919_vm9, %v5869_v34 }
 0x68f   : > { %v3052_v63 = vld [vmem:[%s7237_s0 + $0x38] sm:$0xff] }
 0x6de   : > { %v2646_v6 = vpop.f32.mrf.mxu2 }
 0x6df   : > { %2719 = vrot.lane.b32.xlu1 %v2646_v6, %s7114_s7  ;;  %s7235_s7 = sld [smem:[#allocation72_spill]] }
 0x6e5   : > { %v4963_v44 = vld [vmem:[%s7235_s7] ss:$0 sm:$0xff]  ;;  %s7239_s7 = sld [smem:[#allocation63_spill]] }
 0x6e7   : > { %v2581_v12 = vpop.f32.mrf.mxu0 }
 0x6e8   : > { %2715 = vrot.lane.b32.xlu0 %v2581_v12, %s7118_s11  ;;  %s7238_s11 = smov %s7237_s0  ;;  %s7240_s0 = sld [smem:[#allocation64_spill]] }
 0x6e9   : > { %v3051_v1 = vld [vmem:[%s7238_s11 + $0x30] sm:$0xff]  ;;  %v3050_v3 = vld [vmem:[%s7238_s11 + $0x28] sm:$0xff]  ;;  %v3049_v4 = vld [vmem:[%s7238_s11 + $0x20] sm:$0xff] }
 0x6ea   : > { %v3048_v10 = vld [vmem:[%s7238_s11 + $0x18] sm:$0xff]  ;;  %v3047_v11 = vld [vmem:[%s7238_s11 + $0x10] sm:$0xff]  ;;  %v3046_v28 = vld [vmem:[%s7238_s11 + $0x8] sm:$0xff] }
 0x6eb   : > { %v3045_v30 = vld [vmem:[%s7238_s11] sm:$0xff]  ;;  %s7259_s11 = sld [smem:[#allocation87_spill]] }
 0x6ee   : > { %v4965_v18 = vld [vmem:[%s7240_s0] ss:$0 sm:$0xff]  ;;  %s7245_s0 = sld [smem:[#allocation73_spill]] }
 0x6ef   : > { %v2711_v13 = vpop.f32.mrf.mxu0 }
 0x6f0   : > { %2723 = vrot.lane.b32.xlu0 %v2711_v13, %s7116_s28  ;;  %s7236_s28 = sld [smem:[#allocation81_spill]]  ;;  %v4964_v13 = vld [vmem:[%s7239_s7] ss:$0 sm:$0xff] }
 0x6f1   : > { %s7243_s7 = sld [smem:[#allocation82_spill]] }
 0x6f6   : > { %v2984_v55 = vld [vmem:[%s7236_s28 + $0x38] sm:$0xff]  ;;  %v2983_v56 = vld [vmem:[%s7236_s28 + $0x30] sm:$0xff]  ;;  %v2982_v58 = vld [vmem:[%s7236_s28 + $0x28] sm:$0xff] }
 0x6f7   : > { %3000 = vmatpush.msra.mxu1 %v2984_v55  ;;  %v2981_v59 = vld [vmem:[%s7236_s28 + $0x20] sm:$0xff]  ;;  %v2979_v60 = vld [vmem:[%s7236_s28 + $0x10] sm:$0xff]  ;;  %v2978_v61 = vld [vmem:[%s7236_s28 + $0x8] sm:$0xff]  ;;  %s7244_s5 = smov %s7243_s7 }
 0x6f8   : > { %v2977_v62 = vld [vmem:[%s7236_s28] sm:$0xff] }
 0x6f9   : > { %3001 = vmatpush.msra.mxu1 %v2983_v56  ;;  %v2849_v56 = vld [vmem:[%s7242_s2 + $0x38] sm:$0xff] }
 0x6fb   : > { %3002 = vmatpush.msra.mxu1 %v2982_v58  ;;  %v3013_v58 = vld [vmem:[%s7244_s5] sm:$0xff] }
 0x6fd   : > { %3003 = vmatpush.msra.mxu1 %v2981_v59 }
 0x709   : > { %v2939_v24 = vpop.f32.mrf.mxu0 }
 0x70a   : > { %v2942_v27 = vmul.f32 8.0, %v2939_v24  ;;  %v2802_v24 = vld [vmem:[%s7241_s1 + $0x20] sm:$0xff] }
 0x70b   : > { %2824 = vmatpush.msrb.mxu2 %v2802_v24 }
 0x70c   : > { %v2944_v34 = vadd.f32 %v2943_v25, %v2942_v27  ;;  %v2801_v25 = vld [vmem:[%s7241_s1 + $0x18] sm:$0xff]  ;;  %v2800_v27 = vld [vmem:[%s7241_s1 + $0x10] sm:$0xff] }
 0x70d   : > { %2825 = vmatpush.msrb.mxu2 %v2801_v25 }
 0x70e   : > { %v2947_v36 = vsel %vm2243_vm2, %v2944_v34, 0.0 }
 0x70f   : > { %2826 = vmatpush.msrb.mxu2 %v2800_v27 }
 0x71a   : > { %2948 = vadd.xlane.f32.xlu0 %v2947_v36  ;;  %v2857_v36 = vld [vmem:[%s7242_s2 + $0x78] sm:$0xff] }
 0x71b   : > { %2862 = vmatpush.msra.mxu3 %v2857_v36 }
 0x751   : > { %v2720_v39 = vpop.permute.xlu1 %2719 }
 0x75a   : > { %v2716_v37 = vpop.permute.xlu0 %2715 }
 0x75b   : > { %v2726_v38 = vsel %vm2456_vm7, %v2515_v9, %v2716_v37  ;;  %v2798_v37 = vld [vmem:[%s7241_s1] sm:$0xff] }
 0x75c   : > { %v2727_v41 = vsel %vm2206_vm0, %v2726_v38, %v2720_v39  ;;  %v2856_v38 = vld [vmem:[%s7242_s2 + $0x70] sm:$0xff]  ;;  %v3020_v39 = vld [vmem:[%s7243_s7 + $0x38] sm:$0xff]  ;;  %s7246_s7 = sld [smem:[#allocation74_spill]] }
 0x75d   : > { %2863 = vmatpush.msra.mxu3 %v2856_v38 }
 0x762   : > { %v2724_v40 = vpop.permute.xlu0 %2723 }
 0x763   : > { %v2729_v42 = vsel %vm2728_vm10, %v2727_v41, %v2724_v40  ;;  %v2855_v40 = vld [vmem:[%s7242_s2 + $0x68] sm:$0xff]  ;;  %v3019_v41 = vld [vmem:[%s7244_s5 + $0x30] sm:$0xff] }
 0x764   : > { %4580 = vmatmul.msk.f32.vlgmr.msrb.gmra.mxu1 %vm2243_vm2, %v2729_v42  ;;  %v2854_v42 = vld [vmem:[%s7242_s2 + $0x60] sm:$0xff]  ;;  %2864 = vmatpush.msra.mxu3 %v2855_v40 }
 0x766   : > { %2865 = vmatpush.msra.mxu3 %v2854_v42 }
 0x78d   : > { %v2949_v43 = vpop.xlane.xlu0 %2948 }
 0x78e   : > { %v2950_v45 = vmul.f32 %v2949_v43, %v6628_v54  ;;  %v3018_v43 = vld [vmem:[%s7244_s5 + $0x28] sm:$0xff] }
 0x790   : > { %v2951_v48 = vsub.f32 %v2944_v34, %v2950_v45  ;;  %v2799_v34 = vld [vmem:[%s7241_s1 + $0x8] sm:$0xff]  ;;  %v3017_v45 = vld [vmem:[%s7244_s5 + $0x20] sm:$0xff]  ;;  %s7247_s1 = sld [smem:[#allocation76_spill]] }
 0x791   : > { %2827 = vmatpush.msrb.mxu2 %v2799_v34 }
 0x792   : > { %v2952_v51 = vmul.f32 %v2951_v48, %v2951_v48 }
 0x793   : > { %2828 = vmatpush.msrb.mxu2 %v2798_v37 }
 0x794   : > { %v2953_v52 = vsel %vm2243_vm2, %v2952_v51, 0.0 }
 0x795   : > { %3033 = vmatpush.msra.mxu2 %v3020_v39 }
 0x797   : > { %3034 = vmatpush.msra.mxu2 %v3019_v41 }
 0x799   : > { %3035 = vmatpush.msra.mxu2 %v3018_v43  ;;  %v2346_v43 = vshrl.u32 %v2268_v31, 7 }
 0x79b   : > { %3036 = vmatpush.msra.mxu2 %v3017_v45  ;;  %vm2347_vm3 = vcmp.ge.s32.totalorder %v2346_v43, %v6619_v32 }
 0x7e1   : > { %v2762_v46 = vpop.f32.mrf.mxu1 }
 0x7e2   : > { %v2763_v47 = vadd.f32 %v4963_v44, %v2762_v46  ;;  %v2853_v44 = vld [vmem:[%s7242_s2 + $0x58] sm:$0xff]  ;;  %v2852_v46 = vld [vmem:[%s7242_s2 + $0x50] sm:$0xff] }
 0x7e3   : > { %2866 = vmatpush.msra.mxu3 %v2853_v44 }
 0x7e4   : > { %v2765_v49 = vadd.f32 %v2763_v47, %v6664_v53  ;;  %v2980_v53 = vld [vmem:[%s7236_s28 + $0x18] sm:$0xff] }
 0x7e5   : > { %3004 = vmatpush.msra.mxu1 %v2980_v53  ;;  %v3016_v47 = vld [vmem:[%s7244_s5 + $0x18] sm:$0xff]  ;;  %2867 = vmatpush.msra.mxu3 %v2852_v46  ;;  %v2848_v53 = vld [vmem:[%s7242_s2 + $0x30] sm:$0xff]  ;;  %v5877_v46 = vmov -1e+09  }
 0x7e6   : > { %v2768_v50 = vsel %vm2243_vm2, %v2765_v49, 0.0  ;;  %3037 = vmatpush.msra.mxu2 %v3016_v47  ;;  %v2348_v47 = vsel %vm2347_vm3, 0.0, %v5877_v46 }
 0x7e7   : > { %2769 = vadd.xlane.f32.xlu1 %v2768_v50  ;;  %3005 = vmatpush.msra.mxu1 %v2979_v60  ;;  %v2850_v50 = vld [vmem:[%s7242_s2 + $0x40] sm:$0xff]  ;;  %v2847_v60 = vld [vmem:[%s7242_s2 + $0x28] sm:$0xff] }
 0x7e9   : > { %3006 = vmatpush.msra.mxu1 %v2978_v61  ;;  %v2846_v61 = vld [vmem:[%s7242_s2 + $0x20] sm:$0xff] }
 0x7eb   : > { %3007 = vmatpush.msra.mxu1 %v2977_v62  ;;  %v2845_v62 = vld [vmem:[%s7242_s2 + $0x18] sm:$0xff] }
 0x7ed   : > { %3065 = vmatpush.msrb.mxu1 %v3052_v63 }
 0x7ef   : > { %2954 = vadd.xlane.f32.xlu1 %v2953_v52  ;;  %3066 = vmatpush.msrb.mxu1 %v3051_v1  ;;  %v3014_v52 = vld [vmem:[%s7244_s5 + $0x8] sm:$0xff] }
 0x7f1   : > { %3067 = vmatpush.msrb.mxu1 %v3050_v3 }
 0x7f3   : > { %3068 = vmatpush.msrb.mxu1 %v3049_v4 }
 0x7f5   : > { %3069 = vmatpush.msrb.mxu1 %v3048_v10 }
 0x7f7   : > { %3070 = vmatpush.msrb.mxu1 %v3047_v11 }
 0x7f9   : > { %3071 = vmatpush.msrb.mxu1 %v3046_v28 }
 0x7fb   : > { %3072 = vmatpush.msrb.mxu1 %v3045_v30 }
 0x85a   : > { %v2770_v0 = vpop.xlane.xlu1 %2769 }
 0x85b   : > { %v2771_v2 = vmul.f32 %v2770_v0, %v6628_v54  ;;  %v2844_v0 = vld [vmem:[%s7242_s2 + $0x10] sm:$0xff] }
 0x85d   : > { %v6773_v7 = vsub.f32 %v2765_v49, %v2771_v2  ;;  %v3015_v49 = vld [vmem:[%s7244_s5 + $0x10] sm:$0xff]  ;;  %v2843_v2 = vld [vmem:[%s7242_s2 + $0x8] sm:$0xff]  ;;  %s7253_s5 = smov 16  }
 0x85e   : > { %3038 = vmatpush.msra.mxu2 %v3015_v49 }
 0x85f   : > { %v2773_v8 = vmul.f32 %v6773_v7, %v6773_v7 }
 0x860   : > { %3039 = vmatpush.msra.mxu2 %v3014_v52 }
 0x861   : > { %v2774_v14 = vsel %vm2243_vm2, %v2773_v8, 0.0  ;;  %v2842_v8 = vld [vmem:[%s7242_s2] sm:$0xff] }
 0x862   : > { %2775 = vadd.xlane.f32.xlu2 %v2774_v14  ;;  %v2955_v26 = vpop.xlane.xlu1 %2954  ;;  %3040 = vmatpush.msra.mxu2 %v3013_v58  ;;  %v4966_v14 = vld [vmem:[%s7245_s0] ss:$0 sm:$0xff]  ;;  %s7248_s0 = smov 96  }
 0x863   : > { %v2956_v29 = vmul.f32 %v2955_v26, %v6628_v54 }
 0x865   : > { %v2957_v57 = vadd.f32 1e-05, %v2956_v29  ;;  %v4967_v29 = vld [vmem:[%s7246_s7] ss:$0 sm:$0xff]  ;;  %s7249_s7 = smov 112  }
 0x867   : > { %5009 = vrsqrt.f32 %v2957_v57  ;;  %vm2964_vm12 = vweird.f32 %v2957_v57 }
 0x86d   : > { %v5010_v33 = vpop.eup %5009 }
 0x86e   : > { %v2959_v35 = vmul.f32 %v5010_v33, %v2957_v57  ;;  %vm2965_vm11 = vweird.f32 %v5010_v33 }
 0x86f   : > { %vm2966_vm13 = vmor %vm2964_vm12, %vm2965_vm11 }
 0x870   : > { %v2960_v5 = vmul.f32 %v5010_v33, %v2959_v35  ;;  %v4969_v35 = vld [vmem:[#allocation7] ss:$0 sm:$0xff] }
 0x872   : > { %v2961_v6 = vmul.f32 0.5, %v2960_v5 }
 0x874   : > { %v2962_v9 = vsub.f32 1.5, %v2961_v6 }
 0x876   : > { %v2963_v12 = vmul.f32 %v5010_v33, %v2962_v9  ;;  %v4970_v9 = vld [vmem:[%s7247_s1] ss:$0 sm:$0xff] }
 0x878   : > { %v2967_v16 = vsel %vm2966_vm13, %v5010_v33, %v2963_v12 }
 0x879   : > { %v2968_v17 = vmul.f32 %v2967_v16, %v2951_v48  ;;  %v2851_v48 = vld [vmem:[%s7242_s2 + $0x48] sm:$0xff]  ;;  %v4968_v16 = vld [vmem:[#allocation2] ss:$0 sm:$0xff]  ;;  %s7250_s2 = sld [smem:[#allocation52_spill]] }
 0x87a   : > { %2868 = vmatpush.msra.mxu3 %v2851_v48 }
 0x87b   : > { %v2972_v19 = vmul.f32 %v4964_v13, %v2968_v17 }
 0x87c   : > { %2869 = vmatpush.msra.mxu3 %v2850_v50 }
 0x87d   : > { %v6785_v20 = vadd.f32 %v4965_v18, %v2972_v19  ;;  %v4971_v18 = vld [vmem:[#allocation5] ss:$0 sm:$0xff] }
 0x87e   : > { %2870 = vmatpush.msra.mxu3 %v2849_v56 }
 0x87f   : > { %4584 = vmatmul.msk.f32.vlgmr.msra.gmra.mxu1 %vm2243_vm2, %v6785_v20  ;;  %s2177_s1 = scalar_lea.vmem %s7250_s2, %s6532_s23  ;;  %s7251_s2 = smov 80  }
 0x880   : > { %2871 = vmatpush.msra.mxu3 %v2848_v53  ;;  %v2342_v41 = vld [vmem:[%s2177_s1] sm:$0x1]  ;;  %s7252_s1 = sld [smem:[#allocation78_spill]] }
 0x881   : > { %v2343_v42 = vsub.f32 1.0, %v2342_v41 }
 0x882   : > { %2872 = vmatpush.msra.mxu3 %v2847_v60 }
 0x883   : > { %v2344_v44 = vmul.f32 -1e+09, %v2343_v42 }
 0x884   : > { %2873 = vmatpush.msra.mxu3 %v2846_v61 }
 0x885   : > { %v2350_v45 = vperm.slane %v2344_v44, 0 }
 0x886   : > { %2874 = vmatpush.msra.mxu3 %v2845_v62  ;;  %v4972_v44 = vld [vmem:[%s7252_s1] ss:$0 sm:$0xff]  ;;  %s7257_s1 = sld [smem:[#allocation79_spill]] }
 0x887   : > { %4586 = vmatmul.msk.f32.vlgmr.msrb.gmra.mxu1 %vm2243_vm2, %v6785_v20  ;;  %v2352_v48 = vadd.f32 %v2350_v45, %v2348_v47 }
 0x888   : > { %2875 = vmatpush.msra.mxu3 %v2844_v0 }
 0x88a   : > { %2876 = vmatpush.msra.mxu3 %v2843_v2 }
 0x88c   : > { %2877 = vmatpush.msra.mxu3 %v2842_v8 }
 0x8d5   : > { %v2776_v51 = vpop.xlane.xlu2 %2775 }
 0x8d6   : > { %v2777_v55 = vmul.f32 %v2776_v51, %v6628_v54 }
 0x8d8   : > { %v2778_v59 = vadd.f32 1e-05, %v2777_v55 }
 0x8da   : > { %5011 = vrsqrt.f32 %v2778_v59  ;;  %vm2785_vm15 = vweird.f32 %v2778_v59 }
 0x8e0   : > { %v5012_v63 = vpop.eup %5011 }
 0x8e1   : > { %v2780_v1 = vmul.f32 %v5012_v63, %v2778_v59  ;;  %vm2786_vm14 = vweird.f32 %v5012_v63 }
 0x8e2   : > { %vm2787_vm1 = vmor %vm2785_vm15, %vm2786_vm14 }
 0x8e3   : > { %v2781_v3 = vmul.f32 %v5012_v63, %v2780_v1 }
 0x8e5   : > { %v2782_v4 = vmul.f32 0.5, %v2781_v3 }
 0x8e7   : > { %v2783_v10 = vsub.f32 1.5, %v2782_v4 }
 0x8e9   : > { %v2784_v11 = vmul.f32 %v5012_v63, %v2783_v10 }
 0x8eb   : > { %v2788_v26 = vsel %vm2787_vm1, %v5012_v63, %v2784_v11 }
 0x8ec   : > { %v2789_v28 = vmul.f32 %v2788_v26, %v6773_v7 }
 0x8ee   : > { %v2793_v30 = vmul.f32 %v4966_v14, %v2789_v28 }
 0x8f0   : > { %v6827_v57 = vadd.f32 %v4967_v29, %v2793_v30 }
 0x8f2   : > { %4581 = vmatmul.msk.f32.vlgmr.msrb.gmra.mxu2 %vm2243_vm2, %v6827_v57 }
 0x8fa   : > { %4585 = vmatmul.msk.f32.vlgmr.msra.gmra.mxu2 %vm2243_vm2, %v6785_v20 }
 0x8fc   : > { %v3009_v33 = vpop.f32.mrf.mxu1 }
 0x8fd   : > { %v3010_v22 = vadd.f32 %v4968_v16, %v3009_v33 }
 0x8ff   : > { %v3012_v27 = vmul.f32 0.25, %v3010_v22 }
 0x904   : > { %v3074_v5 = vpop.f32.mrf.mxu1 }
 0x905   : > { %v6833_v6 = vadd.f32 %v4969_v35, %v3074_v5 }
 0x907   : > { %3132 = vmatpush.msrb.mxu3 %v6833_v6 }
 0x975   : > { %v2830_v12 = vpop.f32.mrf.mxu2 }
 0x976   : > { %v2831_v7 = vadd.f32 %v4970_v9, %v2830_v12 }
 0x978   : > { %v2834_v13 = vmul.f32 0.044715, %v2831_v7  ;;  %v2833_v36 = vmul.f32 0.5, %v2831_v7 }
 0x97a   : > { %v2835_v17 = vmul.f32 %v2834_v13, %v2831_v7 }
 0x97c   : > { %v2836_v19 = vmul.f32 %v2835_v17, %v2831_v7 }
 0x97d   : > { %v3042_v21 = vpop.f32.mrf.mxu2 }
 0x97e   : > { %v3043_v23 = vadd.f32 %v4971_v18, %v3042_v21  ;;  %v2837_v24 = vadd.f32 %v2836_v19, %v2831_v7 }
 0x980   : > { %3205 = vrot.lane.b32.xlu2 %v3043_v23, %s7248_s0  ;;  %3139 = vrot.lane.b32.xlu1 %v3043_v23, %s7249_s7  ;;  %v2838_v25 = vmul.f32 0.7978846, %v2837_v24 }
 0x981   : > { %4587 = vmatpush.xpose.msk.msrb.mxu2 %vm2456_vm7, %v3043_v23 }
 0x982   : > { %5013 = vtanh.f32 %v2838_v25 }
 0x984   : > { %4588 = vmatmul.msk.f32.vlgmr.msrb.gmra.mxu2 %vm2456_vm7, %v3012_v27 }
 0x988   : > { %v5014_v34 = vpop.eup %5013  ;;  %3203 = vrot.lane.b32.xlu1 %v3012_v27, %s7248_s0 }
 0x989   : > { %v2840_v37 = vadd.f32 1.0, %v5014_v34 }
 0x98b   : > { %v2841_v38 = vmul.f32 %v2840_v37, %v2833_v36 }
 0x98d   : > { %2878 = vmatmul.f32.vlgmr.msra.gmra.mxu3 %v2841_v38 }
 0x9da   : > { %v3206_v39 = vpop.permute.xlu2 %3205 }
 0x9db   : > { %4593 = vmatpush.xpose.msk.msra.mxu3 %vm2456_vm7, %v3206_v39 }
 0x9f2   : > { %v3140_v40 = vpop.permute.xlu1 %3139 }
 0x9f3   : > { %4590 = vmatpush.xpose.msk.msrb.mxu0 %vm2456_vm7, %v3140_v40 }
 0x9fa   : > { %v3204_v0 = vpop.permute.xlu1 %3203 }
 0xa07   : > { %v3100_v49 = vpop.f32.mrf.mxu2 }
 0xa08   : > { %v3101_v50 = vadd.f32 %v3100_v49, %v2352_v48 }
 0xa0a   : > { %v3103_v51 = vsel %vm2483_vm8, %v3101_v50, -inf }
 0xa0b   : > { %3104 = vmax.xlane.f32.xlu0 %v3103_v51  ;;  %v3354_v51 = vld [vmem:[%s7254_s6 + $0x30] sm:$0xff] }
 0xa10   : > { %v2879_v4 = vpop.f32.mrf.mxu3 }
 0xa11   : > { %v2880_v45 = vadd.f32 %v4972_v44, %v2879_v4  ;;  %v4975_v44 = vld [vmem:[#allocation8] ss:$0 sm:$0xff] }
 0xa13   : > { %v2882_v46 = vadd.f32 %v2880_v45, %v6827_v57  ;;  %v3351_v57 = vld [vmem:[%s7254_s6 + $0x18] sm:$0xff] }
 0xa15   : > { %v2885_v47 = vsel %vm2243_vm2, %v2882_v46, 0.0 }
 0xa1f   : > { %3137 = vrot.lane.b32.xlu0 %v3012_v27, %s7249_s7 }
 0xa27   : > { %3270 = vrot.lane.b32.xlu0 %v3043_v23, %s7251_s2 }
 0xa7e   : > { %v3105_v52 = vpop.xlane.xlu0 %3104 }
 0xa7f   : > { %v3106_v55 = vsub.f32 %v3101_v50, %v3105_v52  ;;  %v3355_v50 = vld [vmem:[%s7254_s6 + $0x38] sm:$0xff]  ;;  %v3353_v52 = vld [vmem:[%s7254_s6 + $0x28] sm:$0xff] }
 0xa81   : > { %v3107_v56 = vmul.f32 1.442695, %v3106_v55  ;;  %v3352_v55 = vld [vmem:[%s7254_s6 + $0x20] sm:$0xff] }
 0xa83   : > { %5015 = vpow2.f32 %v3107_v56 }
 0xa89   : > { %v5016_v31 = vpop.eup %5015 }
 0xa8a   : > { %v3109_v58 = vsel %vm2483_vm8, %v5016_v31, 0.0 }
 0xa8b   : > { %3110 = vadd.xlane.f32.xlu2 %v3109_v58 }
 0xa91   : > { %v3138_v59 = vpop.permute.xlu0 %3137 }
 0xa92   : > { %4591 = vmatmul.msk.f32.vlgmr.msrb.gmra.mxu0 %vm2456_vm7, %v3138_v59 }
 0xa99   : > { %v3271_v53 = vpop.permute.xlu0 %3270 }
 0xa9a   : > { %4596 = vmatpush.xpose.msk.msra.mxu1 %vm2456_vm7, %v3271_v53 }
 0xaa3   : > { %3268 = vrot.lane.b32.xlu2 %v3012_v27, %s7251_s2 }
 0xafe   : > { %v3111_v60 = vpop.xlane.xlu2 %3110 }
 0xaff   : > { %5017 = vrcp.f32 %v3111_v60 }
 0xb05   : > { %v5018_v61 = vpop.eup %5017 }
 0xb06   : > { %v3113_v62 = vmul.f32 %v5018_v61, %v5016_v31  ;;  %v3269_v63 = vpop.permute.xlu2 %3268  ;;  %v3350_v61 = vld [vmem:[%s7254_s6 + $0x10] sm:$0xff] }
 0xb07   : > { %4597 = vmatmul.msk.f32.vlgmr.msra.gmra.mxu1 %vm2456_vm7, %v3269_v63  ;;  %v3348_v63 = vld [vmem:[%s7254_s6] sm:$0xff] }
 0xb08   : > { %4589 = vmatmul.msk.f32.vlgmr.msrb.gmra.mxu3 %vm2483_vm8, %v3113_v62  ;;  %v3349_v62 = vld [vmem:[%s7254_s6 + $0x8] sm:$0xff]  ;;  %s7258_s6 = sld [smem:[#allocation80_spill]] }
 0xb09   : > { %3371 = vmatpush.msrb.mxu3 %v3355_v50  ;;  %v3418_v50 = vld [vmem:[%s7259_s11 + $0x10] sm:$0xff] }
 0xb0b   : > { %3372 = vmatpush.msrb.mxu3 %v3354_v51  ;;  %v3417_v51 = vld [vmem:[%s7259_s11 + $0x8] sm:$0xff] }
 0xb0d   : > { %3373 = vmatpush.msrb.mxu3 %v3353_v52  ;;  %v3416_v52 = vld [vmem:[%s7259_s11] sm:$0xff] }
 0xb0f   : > { %v3162_v1 = vpop.f32.mrf.mxu0  ;;  %3374 = vmatpush.msrb.mxu3 %v3352_v55  ;;  %v4976_v55 = vld [vmem:[#allocation16] ss:$0 sm:$0xff] }
 0xb10   : > { %v3163_v2 = vadd.f32 %v3162_v1, %v2352_v48  ;;  %4594 = vmatmul.msk.f32.vlgmr.msra.gmra.mxu3 %vm2456_vm7, %v3204_v0 }
 0xb11   : > { %3375 = vmatpush.msrb.mxu3 %v3351_v57 }
 0xb12   : > { %v3165_v3 = vsel %vm2483_vm8, %v3163_v2, -inf }
 0xb13   : > { %3166 = vmax.xlane.f32.xlu0 %v3165_v3  ;;  %3376 = vmatpush.msrb.mxu3 %v3350_v61 }
 0xb15   : > { %3377 = vmatpush.msrb.mxu3 %v3349_v62 }
 0xb17   : > { %3378 = vmatpush.msrb.mxu3 %v3348_v63 }
 0xb84   : > { %v3293_v8 = vpop.f32.mrf.mxu1 }
 0xb85   : > { %v3294_v10 = vadd.f32 %v3293_v8, %v2352_v48  ;;  %v3459_v8 = vld [vmem:[#allocation14 + $0x38] sm:$0xff] }
 0xb86   : > { %v3167_v11 = vpop.xlane.xlu0 %3166  ;;  %3475 = vmatpush.msrb.mxu1 %v3459_v8 }
 0xb87   : > { %v3168_v14 = vsub.f32 %v3163_v2, %v3167_v11  ;;  %v3296_v26 = vsel %vm2483_vm8, %v3294_v10, -inf  ;;  %v3458_v11 = vld [vmem:[#allocation14 + $0x30] sm:$0xff] }
 0xb88   : > { %3297 = vmax.xlane.f32.xlu1 %v3296_v26  ;;  %3476 = vmatpush.msrb.mxu1 %v3458_v11  ;;  %v3457_v26 = vld [vmem:[#allocation14 + $0x28] sm:$0xff] }
 0xb89   : > { %v3169_v28 = vmul.f32 1.442695, %v3168_v14  ;;  %v3493_v14 = vld [vmem:[#allocation17 + $0x30] sm:$0xff] }
 0xb8a   : > { %3477 = vmatpush.msrb.mxu1 %v3457_v26 }
 0xb8b   : > { %5019 = vpow2.f32 %v3169_v28  ;;  %v6860_v29 = vpop.f32.mrf.mxu3  ;;  %v3492_v28 = vld [vmem:[#allocation17 + $0x28] sm:$0xff] }
 0xb91   : > { %v5020_v30 = vpop.eup %5019 }
 0xb92   : > { %v3171_v33 = vsel %vm2483_vm8, %v5020_v30, 0.0 }
 0xb93   : > { %v3228_v35 = vpop.f32.mrf.mxu3  ;;  %3172 = vadd.xlane.f32.xlu0 %v3171_v33  ;;  %v3455_v33 = vld [vmem:[#allocation14 + $0x18] sm:$0xff] }
 0xb94   : > { %v3229_v5 = vadd.f32 %v3228_v35, %v2352_v48  ;;  %v3490_v35 = vld [vmem:[#allocation17 + $0x18] sm:$0xff] }
 0xb96   : > { %v3231_v9 = vsel %vm2483_vm8, %v3229_v5, -inf }
 0xb97   : > { %3232 = vmax.xlane.f32.xlu2 %v3231_v9  ;;  %v3489_v9 = vld [vmem:[#allocation17 + $0x10] sm:$0xff] }
 0xbaf   : > { %3177 = vrot.lane.b32.xlu2 %v6833_v6, %s7249_s7 }
 0xbfb   : > { %v3298_v12 = vpop.xlane.xlu1 %3297 }
 0xbfc   : > { %v3299_v7 = vsub.f32 %v3294_v10, %v3298_v12  ;;  %v3494_v10 = vld [vmem:[#allocation17 + $0x38] sm:$0xff]  ;;  %v3453_v12 = vld [vmem:[#allocation14 + $0x8] sm:$0xff] }
 0xbfe   : > { %v3300_v13 = vmul.f32 1.442695, %v3299_v7  ;;  %v3488_v7 = vld [vmem:[#allocation17 + $0x8] sm:$0xff] }
 0xc00   : > { %5021 = vpow2.f32 %v3300_v13  ;;  %v3452_v13 = vld [vmem:[#allocation14] sm:$0xff] }
 0xc06   : > { %v5022_v16 = vpop.eup %5021  ;;  %v3173_v17 = vpop.xlane.xlu0 %3172 }
 0xc07   : > { %v3302_v18 = vsel %vm2483_vm8, %v5022_v16, 0.0  ;;  %5023 = vrcp.f32 %v3173_v17 }
 0xc08   : > { %3303 = vadd.xlane.f32.xlu1 %v3302_v18 }
 0xc0a   : > { %v3233_v19 = vpop.xlane.xlu2 %3232 }
 0xc0b   : > { %v3234_v21 = vsub.f32 %v3229_v5, %v3233_v19  ;;  %v3454_v5 = vld [vmem:[#allocation14 + $0x10] sm:$0xff] }
 0xc0d   : > { %v3235_v22 = vmul.f32 1.442695, %v3234_v21  ;;  %v5024_v23 = vpop.eup %5023 }
 0xc0e   : > { %v3175_v24 = vmul.f32 %v5024_v23, %v5020_v30  ;;  %v3491_v30 = vld [vmem:[#allocation17 + $0x20] sm:$0xff] }
 0xc0f   : > { %5025 = vpow2.f32 %v3235_v22 }
 0xc12   : > { %v3178_v25 = vpop.permute.xlu2 %3177 }
 0xc13   : > { %3198 = vmatpush.msra.mxu2 %v3178_v25 }
 0xc14   : > { %4592 = vmatmul.msk.f32.vlgmr.msra.gmra.mxu2 %vm2483_vm8, %v3175_v24 }
 0xc15   : > { %v5026_v27 = vpop.eup %5025 }
 0xc16   : > { %v3237_v34 = vsel %vm2483_vm8, %v5026_v27, 0.0 }
 0xc17   : > { %3238 = vadd.xlane.f32.xlu0 %v3237_v34  ;;  %v4973_v34 = vld [vmem:[%s7257_s1] ss:$0 sm:$0xff] }
 0xc21   : > { %3307 = vrot.lane.b32.xlu1 %v6833_v6, %s7251_s2 }
 0xc2b   : > { %3242 = vrot.lane.b32.xlu0 %v6833_v6, %s7248_s0 }
 0xc7b   : > { %v3304_v36 = vpop.xlane.xlu1 %3303 }
 0xc7c   : > { %5027 = vrcp.f32 %v3304_v36 }
 0xc82   : > { %v5028_v37 = vpop.eup %5027 }
 0xc83   : > { %v3306_v39 = vmul.f32 %v5028_v37, %v5022_v16  ;;  %v3487_v16 = vld [vmem:[#allocation17] sm:$0xff] }
 0xc8a   : > { %v3239_v38 = vpop.xlane.xlu0 %3238 }
 0xc8b   : > { %5029 = vrcp.f32 %v3239_v38  ;;  %v4974_v38 = vld [vmem:[%s7258_s6] ss:$0 sm:$0xff]  ;;  %s7261_s6 = sld [smem:[#allocation50_spill]] }
 0xc91   : > { %v5030_v42 = vpop.eup %5029 }
 0xc92   : > { %v3241_v43 = vmul.f32 %v5030_v42, %v5026_v27  ;;  %v3422_v42 = vld [vmem:[%s7259_s11 + $0x30] sm:$0xff] }
 0xc93   : > { %v3308_v40 = vpop.permute.xlu1 %3307 }
 0xc94   : > { %3328 = vmatpush.msrb.mxu2 %v3308_v40 }
 0xc95   : > { %4598 = vmatmul.msk.f32.vlgmr.msrb.gmra.mxu2 %vm2483_vm8, %v3306_v39 }
 0xc96   : > { %3507 = vmatpush.msra.mxu2 %v3494_v10 }
 0xc97   : > { %v3200_v41 = vpop.f32.mrf.mxu2 }
 0xc98   : > { %3334 = vrot.lane.b32.xlu2 %v3200_v41, %s7253_s5  ;;  %3508 = vmatpush.msra.mxu2 %v3493_v14  ;;  %v3423_v41 = vld [vmem:[%s7259_s11 + $0x38] sm:$0xff] }
 0xc9a   : > { %3509 = vmatpush.msra.mxu2 %v3492_v28 }
 0xc9c   : > { %3510 = vmatpush.msra.mxu2 %v3491_v30 }
 0xc9d   : > { %v3243_v6 = vpop.permute.xlu0 %3242 }
 0xc9e   : > { %3263 = vmatpush.msra.mxu0 %v3243_v6  ;;  %3511 = vmatpush.msra.mxu2 %v3490_v35  ;;  %v3420_v6 = vld [vmem:[%s7259_s11 + $0x20] sm:$0xff]  ;;  %v4979_v35 = vld [vmem:[#allocation11] ss:$0 sm:$0xff] }
 0xc9f   : > { %4595 = vmatmul.msk.f32.vlgmr.msra.gmra.mxu0 %vm2483_vm8, %v3241_v43  ;;  %v3421_v43 = vld [vmem:[%s7259_s11 + $0x28] sm:$0xff] }
 0xca0   : > { %3512 = vmatpush.msra.mxu2 %v3489_v9  ;;  %3439 = vmatpush.msrb.mxu0 %v3423_v41 }
 0xca2   : > { %3513 = vmatpush.msra.mxu2 %v3488_v7  ;;  %3440 = vmatpush.msrb.mxu0 %v3422_v42 }
 0xca4   : > { %3514 = vmatpush.msra.mxu2 %v3487_v16  ;;  %3441 = vmatpush.msrb.mxu0 %v3421_v43 }
 0xca6   : > { %3442 = vmatpush.msrb.mxu0 %v3420_v6 }
 0xcc1   : > { %2886 = vadd.xlane.f32.xlu2 %v2885_v47 }
 0xcf2   : > { %v3335_v56 = vpop.permute.xlu2 %3334 }
 0xcf3   : > { %v3345_v0 = vsel %vm2456_vm7, %v6860_v29, %v3335_v56  ;;  %v3456_v29 = vld [vmem:[#allocation14 + $0x20] sm:$0xff] }
 0xcf4   : > { %3478 = vmatpush.msrb.mxu1 %v3456_v29  ;;  %v4978_v29 = vld [vmem:[#allocation10] ss:$0 sm:$0xff] }
 0xcf6   : > { %3479 = vmatpush.msrb.mxu1 %v3455_v33 }
 0xcf8   : > { %3480 = vmatpush.msrb.mxu1 %v3454_v5 }
 0xcfa   : > { %3481 = vmatpush.msrb.mxu1 %v3453_v12  ;;  %v4980_v12 = vld [vmem:[#allocation13] ss:$0 sm:$0xff] }
 0xcfc   : > { %3482 = vmatpush.msrb.mxu1 %v3452_v13 }
 0xd18   : > { %v3330_v48 = vpop.f32.mrf.mxu2 }
 0xd19   : > { %3342 = vrot.lane.b32.xlu1 %v3330_v48, %s7255_s8 }
 0xd1c   : > { %v3265_v49 = vpop.f32.mrf.mxu0 }
 0xd1d   : > { %3338 = vrot.lane.b32.xlu0 %v3265_v49, %s7256_s9  ;;  %v3419_v49 = vld [vmem:[%s7259_s11 + $0x18] sm:$0xff] }
 0xd1e   : > { %3443 = vmatpush.msrb.mxu0 %v3419_v49 }
 0xd20   : > { %3444 = vmatpush.msrb.mxu0 %v3418_v50 }
 0xd22   : > { %3445 = vmatpush.msrb.mxu0 %v3417_v51 }
 0xd24   : > { %3446 = vmatpush.msrb.mxu0 %v3416_v52 }
 0xd34   : > { %v2887_v31 = vpop.xlane.xlu2 %2886 }
 0xd35   : > { %v2888_v58 = vmul.f32 %v2887_v31, %v6628_v54  ;;  %v4977_v31 = vld [vmem:[#allocation19] ss:$0 sm:$0xff] }
 0xd37   : > { %v6887_v59 = vsub.f32 %v2882_v46, %v2888_v58 }
 0xd39   : > { %v2890_v53 = vmul.f32 %v6887_v59, %v6887_v59 }
 0xd3b   : > { %v2891_v60 = vsel %vm2243_vm2, %v2890_v53, 0.0 }
 0xd43   : > { %2892 = vadd.xlane.f32.xlu1 %v2891_v60 }
 0xd8b   : > { %v3343_v2 = vpop.permute.xlu1 %3342 }
 0xd8f   : > { %v3339_v1 = vpop.permute.xlu0 %3338 }
 0xd90   : > { %v3346_v3 = vsel %vm2206_vm0, %v3345_v0, %v3339_v1 }
 0xd91   : > { %v3347_v4 = vsel %vm2728_vm10, %v3346_v3, %v3343_v2 }
 0xd92   : > { %4599 = vmatmul.msk.f32.vlgmr.msrb.gmra.mxu3 %vm2243_vm2, %v3347_v4 }
 0xdb6   : > { %v2893_v17 = vpop.xlane.xlu1 %2892 }
 0xdb7   : > { %v2894_v18 = vmul.f32 %v2893_v17, %v6628_v54 }
 0xdb9   : > { %v2895_v19 = vadd.f32 1e-05, %v2894_v18 }
 0xdbb   : > { %5031 = vrsqrt.f32 %v2895_v19  ;;  %vm2902_vm5 = vweird.f32 %v2895_v19 }
 0xdc1   : > { %v5032_v21 = vpop.eup %5031 }
 0xdc2   : > { %v2897_v22 = vmul.f32 %v5032_v21, %v2895_v19  ;;  %vm2903_vm4 = vweird.f32 %v5032_v21 }
 0xdc3   : > { %vm2904_vm6 = vmor %vm2902_vm5, %vm2903_vm4 }
 0xdc4   : > { %v2898_v23 = vmul.f32 %v5032_v21, %v2897_v22 }
 0xdc6   : > { %v2899_v24 = vmul.f32 0.5, %v2898_v23 }
 0xdc8   : > { %v2900_v25 = vsub.f32 1.5, %v2899_v24 }
 0xdca   : > { %v2901_v27 = vmul.f32 %v5032_v21, %v2900_v25 }
 0xdcc   : > { %v2905_v36 = vsel %vm2904_vm6, %v5032_v21, %v2901_v27 }
 0xdcd   : > { %v2906_v37 = vmul.f32 %v2905_v36, %v6887_v59 }
 0xdcf   : > { %v2910_v39 = vmul.f32 %v4973_v34, %v2906_v37 }
 0xdd1   : > { %v2914_v40 = vadd.f32 %v4974_v38, %v2910_v39 }
 0xdd3   : > { %4601 = vmatmul.msk.f32.vlgmr.msrb.gmra.mxu1 %vm2243_vm2, %v2914_v40  ;;  %4602 = vmatmul.msk.f32.vlgmr.msra.gmra.mxu2 %vm2243_vm2, %v2914_v40 }
 0xe15   : > { %v3380_v45 = vpop.f32.mrf.mxu3 }
 0xe16   : > { %v3381_v46 = vadd.f32 %v4975_v44, %v3380_v45 }
 0xe18   : > { %v3383_v47 = vadd.f32 %v3381_v46, %v6785_v20 }
 0xe1a   : > { %v3386_v48 = vsel %vm2243_vm2, %v3383_v47, 0.0 }
 0xe1b   : > { %3387 = vadd.xlane.f32.xlu0 %v3386_v48 }
 0xe50   : > { %v3484_v57 = vpop.f32.mrf.mxu1 }
 0xe51   : > { %v3485_v56 = vadd.f32 %v4976_v55, %v3484_v57 }
 0xe53   : > { %4603 = vmatpush.xpose.msk.msra.mxu3 %vm2456_vm7, %v3485_v56  ;;  %3581 = vrot.lane.b32.xlu0 %v3485_v56, %s7249_s7 }
 0xe56   : > { %v3516_v20 = vpop.f32.mrf.mxu2 }
 0xe57   : > { %v6918_v58 = vadd.f32 %v4977_v31, %v3516_v20 }
 0xe59   : > { %3574 = vmatpush.msra.mxu0 %v6918_v58 }
 0xe5b   : > { %3712 = vrot.lane.b32.xlu0 %v3485_v56, %s7251_s2 }
 0xe8e   : > { %v3388_v59 = vpop.xlane.xlu0 %3387 }
 0xe8f   : > { %v3389_v53 = vmul.f32 %v3388_v59, %v6628_v54 }
 0xe91   : > { %v3390_v60 = vsub.f32 %v3383_v47, %v3389_v53 }
 0xe93   : > { %v3391_v61 = vmul.f32 %v3390_v60, %v3390_v60 }
 0xe95   : > { %v3392_v62 = vsel %vm2243_vm2, %v3391_v61, 0.0 }
 0xe96   : > { %3393 = vadd.xlane.f32.xlu2 %v3392_v62 }
 0xeae   : > { %3647 = vrot.lane.b32.xlu2 %v3485_v56, %s7248_s0 }
 0xec5   : > { %v3582_v63 = vpop.permute.xlu0 %3581 }
 0xec6   : > { %4606 = vmatpush.xpose.msk.msra.mxu1 %vm2456_vm7, %v3582_v63 }
 0xecd   : > { %v3713_v0 = vpop.permute.xlu0 %3712 }
 0xece   : > { %4612 = vmatpush.xpose.msk.msrb.mxu1 %vm2456_vm7, %v3713_v0 }
 0xf09   : > { %v3394_v1 = vpop.xlane.xlu2 %3393 }
 0xf0a   : > { %v3395_v2 = vmul.f32 %v3394_v1, %v6628_v54 }
 0xf0c   : > { %v3396_v3 = vadd.f32 1e-05, %v3395_v2 }
 0xf0e   : > { %5033 = vrsqrt.f32 %v3396_v3  ;;  %vm3403_vm11 = vweird.f32 %v3396_v3 }
 0xf11   : > { %v3648_v4 = vpop.permute.xlu2 %3647 }
 0xf12   : > { %4609 = vmatpush.xpose.msk.msrb.mxu3 %vm2456_vm7, %v3648_v4 }
 0xf14   : > { %v5034_v8 = vpop.eup %5033 }
 0xf15   : > { %v3398_v10 = vmul.f32 %v5034_v8, %v3396_v3  ;;  %vm3404_vm9 = vweird.f32 %v5034_v8 }
 0xf16   : > { %vm3405_vm12 = vmor %vm3403_vm11, %vm3404_vm9 }
 0xf17   : > { %v3399_v11 = vmul.f32 %v5034_v8, %v3398_v10 }
 0xf19   : > { %v3400_v14 = vmul.f32 0.5, %v3399_v11  ;;  %v5061_v11 = vld [vmem:[%s7216_s4 + $0x78] sm:$0xff] }
 0xf1b   : > { %v3401_v26 = vsub.f32 1.5, %v3400_v14 }
 0xf1d   : > { %v3402_v28 = vmul.f32 %v5034_v8, %v3401_v26 }
 0xf1f   : > { %v3406_v30 = vsel %vm3405_vm12, %v5034_v8, %v3402_v28  ;;  %v5062_v28 = vld [vmem:[%s7216_s4 + $0x70] sm:$0xff] }
 0xf20   : > { %v3407_v33 = vmul.f32 %v3406_v30, %v3390_v60  ;;  %v5064_v30 = vld [vmem:[%s7216_s4 + $0x60] sm:$0xff] }
 0xf22   : > { %v3411_v5 = vmul.f32 %v4978_v29, %v3407_v33  ;;  %v5063_v29 = vld [vmem:[%s7216_s4 + $0x68] sm:$0xff]  ;;  %v5065_v33 = vld [vmem:[%s7216_s4 + $0x58] sm:$0xff] }
 0xf24   : > { %v6929_v9 = vadd.f32 %v4979_v35, %v3411_v5  ;;  %v5066_v35 = vld [vmem:[%s7216_s4 + $0x50] sm:$0xff]  ;;  %v5067_v5 = vld [vmem:[%s7216_s4 + $0x48] sm:$0xff] }
 0xf26   : > { %4600 = vmatmul.msk.f32.vlgmr.msrb.gmra.mxu0 %vm2243_vm2, %v6929_v9 }
 0xfa3   : > { %v3448_v7 = vpop.f32.mrf.mxu0 }
 0xfa4   : > { %v3449_v13 = vadd.f32 %v4980_v12, %v3448_v7  ;;  %v5068_v12 = vld [vmem:[%s7216_s4 + $0x40] sm:$0xff]  ;;  %v5069_v7 = vld [vmem:[%s7216_s4 + $0x38] sm:$0xff] }
 0xfa6   : > { %v3451_v16 = vmul.f32 0.25, %v3449_v13  ;;  %v5070_v13 = vld [vmem:[%s7216_s4 + $0x30] sm:$0xff] }
 0xfa8   : > { %3645 = vrot.lane.b32.xlu2 %v3451_v16, %s7248_s0  ;;  %3579 = vrot.lane.b32.xlu1 %v3451_v16, %s7249_s7 }
 0xfa9   : > { %4604 = vmatmul.msk.f32.vlgmr.msra.gmra.mxu3 %vm2456_vm7, %v3451_v16 }
 0xfb0   : > { %3710 = vrot.lane.b32.xlu1 %v3451_v16, %s7251_s2  ;;  %v5071_v16 = vld [vmem:[%s7216_s4 + $0x28] sm:$0xff] }
0x1002   : > { %v3646_v17 = vpop.permute.xlu2 %3645 }
0x1003   : > { %4610 = vmatmul.msk.f32.vlgmr.msrb.gmra.mxu3 %vm2456_vm7, %v3646_v17  ;;  %v5072_v17 = vld [vmem:[%s7216_s4 + $0x20] sm:$0xff] }
0x101a   : > { %v3580_v18 = vpop.permute.xlu1 %3579 }
0x101b   : > { %4607 = vmatmul.msk.f32.vlgmr.msra.gmra.mxu1 %vm2456_vm7, %v3580_v18  ;;  %v5073_v18 = vld [vmem:[%s7216_s4 + $0x18] sm:$0xff] }
0x1022   : > { %v3711_v19 = vpop.permute.xlu1 %3710 }
0x1023   : > { %4613 = vmatmul.msk.f32.vlgmr.msrb.gmra.mxu1 %vm2456_vm7, %v3711_v19  ;;  %v5074_v19 = vld [vmem:[%s7216_s4 + $0x10] sm:$0xff] }
0x102c   : > { %v3542_v21 = vpop.f32.mrf.mxu3 }
0x102d   : > { %v3543_v22 = vadd.f32 %v3542_v21, %v6694_v15  ;;  %v5075_v21 = vld [vmem:[%s7216_s4 + $0x8] sm:$0xff] }
0x102f   : > { %v3545_v23 = vsel %vm2483_vm8, %v3543_v22, -inf }
0x1030   : > { %3546 = vmax.xlane.f32.xlu2 %v3545_v23 }
0x1086   : > { %v3670_v34 = vpop.f32.mrf.mxu3 }
0x1087   : > { %v3671_v36 = vadd.f32 %v3670_v34, %v6694_v15  ;;  %v3797_v34 = vld [vmem:[#allocation20 + $0x38] sm:$0xff] }
0x1088   : > { %3813 = vmatpush.msra.mxu3 %v3797_v34 }
0x1089   : > { %v3673_v40 = vsel %vm2483_vm8, %v3671_v36, -inf }
0x1098   : > { %v3604_v24 = vpop.f32.mrf.mxu1 }
0x1099   : > { %v3605_v25 = vadd.f32 %v3604_v24, %v6694_v15 }
0x109b   : > { %v3607_v27 = vsel %vm2483_vm8, %v3605_v25, -inf }
0x109c   : > { %3608 = vmax.xlane.f32.xlu0 %v3607_v27 }
0x10a0   : > { %v3735_v37 = vpop.f32.mrf.mxu1 }
0x10a1   : > { %v3736_v38 = vadd.f32 %v3735_v37, %v6694_v15  ;;  %v3795_v37 = vld [vmem:[#allocation20 + $0x28] sm:$0xff] }
0x10a3   : > { %v3547_v39 = vpop.xlane.xlu2 %3546  ;;  %v3738_v41 = vsel %vm2483_vm8, %v3736_v38, -inf }
0x10a4   : > { %v3548_v42 = vsub.f32 %v3543_v22, %v3547_v39  ;;  %3674 = vmax.xlane.f32.xlu0 %v3673_v40  ;;  %3739 = vmax.xlane.f32.xlu1 %v3738_v41  ;;  %v5076_v22 = vld [vmem:[%s7216_s4] sm:$0xff]  ;;  %v3793_v39 = vld [vmem:[#allocation20 + $0x18] sm:$0xff]  ;;  %s7265_s4 = sand.u32 1, %s5775_s10  }
0x10a5   : > { %v3792_v40 = vld [vmem:[#allocation20 + $0x10] sm:$0xff]  ;;  %v3791_v41 = vld [vmem:[#allocation20 + $0x8] sm:$0xff] }
0x10a6   : > { %v3549_v43 = vmul.f32 1.442695, %v3548_v42  ;;  %v3790_v42 = vld [vmem:[#allocation20] sm:$0xff] }
0x10a8   : > { %5035 = vpow2.f32 %v3549_v43 }
0x10ae   : > { %v5036_v6 = vpop.eup %5035 }
0x10af   : > { %v3551_v44 = vsel %vm2483_vm8, %v5036_v6, 0.0 }
0x10b0   : > { %3552 = vadd.xlane.f32.xlu1 %v3551_v44 }
0x110f   : > { %v3609_v45 = vpop.xlane.xlu0 %3608 }
0x1110   : > { %v3610_v46 = vsub.f32 %v3605_v25, %v3609_v45 }
0x1112   : > { %v3611_v47 = vmul.f32 1.442695, %v3610_v46 }
0x1114   : > { %5037 = vpow2.f32 %v3611_v47 }
0x1117   : > { %v3740_v48 = vpop.xlane.xlu1 %3739  ;;  %v3675_v15 = vpop.xlane.xlu0 %3674 }
0x1118   : > { %v3741_v49 = vsub.f32 %v3736_v38, %v3740_v48  ;;  %v3676_v50 = vsub.f32 %v3671_v36, %v3675_v15  ;;  %v3796_v36 = vld [vmem:[#allocation20 + $0x30] sm:$0xff]  ;;  %v3794_v38 = vld [vmem:[#allocation20 + $0x20] sm:$0xff] }
0x1119   : > { %3814 = vmatpush.msra.mxu3 %v3796_v36  ;;  %v4981_v48 = vld [vmem:[#allocation22] ss:$0 sm:$0xff]  ;;  %v4984_v36 = vld [vmem:[#allocation28] ss:$0 sm:$0xff] }
0x111a   : > { %v5038_v51 = vpop.eup %5037  ;;  %v3742_v52 = vmul.f32 1.442695, %v3741_v49  ;;  %v3677_v55 = vmul.f32 1.442695, %v3676_v50 }
0x111b   : > { %v3613_v57 = vsel %vm2483_vm8, %v5038_v51, 0.0  ;;  %3815 = vmatpush.msra.mxu3 %v3795_v37 }
0x111c   : > { %5039 = vpow2.f32 %v3742_v52  ;;  %3614 = vadd.xlane.f32.xlu2 %v3613_v57 }
0x111d   : > { %5041 = vpow2.f32 %v3677_v55  ;;  %3816 = vmatpush.msra.mxu3 %v3794_v38 }
0x111f   : > { %3817 = vmatpush.msra.mxu3 %v3793_v39 }
0x1121   : > { %3818 = vmatpush.msra.mxu3 %v3792_v40 }
0x1122   : > { %v5040_v56 = vpop.eup %5039 }
0x1123   : > { %v5042_v31 = vpop.eup %5041  ;;  %v3553_v20 = vpop.xlane.xlu1 %3552  ;;  %v3744_v59 = vsel %vm2483_vm8, %v5040_v56, 0.0  ;;  %3819 = vmatpush.msra.mxu3 %v3791_v41 }
0x1124   : > { %5043 = vrcp.f32 %v3553_v20  ;;  %3745 = vadd.xlane.f32.xlu0 %v3744_v59  ;;  %v3679_v53 = vsel %vm2483_vm8, %v5042_v31, 0.0  ;;  %v3865_v20 = vld [vmem:[#allocation26 + $0x38] sm:$0xff]  ;;  %v3864_v59 = vld [vmem:[#allocation26 + $0x30] sm:$0xff] }
0x1125   : > { %3680 = vadd.xlane.f32.xlu1 %v3679_v53  ;;  %3820 = vmatpush.msra.mxu3 %v3790_v42  ;;  %v3863_v53 = vld [vmem:[#allocation26 + $0x28] sm:$0xff] }
0x112a   : > { %v5044_v60 = vpop.eup %5043 }
0x112b   : > { %v3555_v61 = vmul.f32 %v5044_v60, %v5036_v6  ;;  %v3861_v60 = vld [vmem:[#allocation26 + $0x18] sm:$0xff] }
0x112d   : > { %4605 = vmatmul.msk.f32.vlgmr.msra.gmra.mxu0 %vm2483_vm8, %v3555_v61  ;;  %v3860_v61 = vld [vmem:[#allocation26 + $0x10] sm:$0xff] }
0x1134   : > { %3619 = vrot.lane.b32.xlu2 %v6918_v58, %s7249_s7 }
0x1138   : > { %3749 = vrot.lane.b32.xlu0 %v6918_v58, %s7251_s2  ;;  %s7263_s2 = sld [smem:[#allocation96_spill]] }
0x113e   : > { %3684 = vrot.lane.b32.xlu1 %v6918_v58, %s7248_s0 }
0x118f   : > { %v3615_v62 = vpop.xlane.xlu2 %3614 }
0x1190   : > { %5045 = vrcp.f32 %v3615_v62  ;;  %v3859_v62 = vld [vmem:[#allocation26 + $0x8] sm:$0xff] }
0x1196   : > { %v5046_v63 = vpop.eup %5045 }
0x1197   : > { %v3617_v0 = vmul.f32 %v5046_v63, %v5038_v51  ;;  %v3620_v1 = vpop.permute.xlu2 %3619  ;;  %v3746_v2 = vpop.xlane.xlu0 %3745  ;;  %v3858_v63 = vld [vmem:[#allocation26] sm:$0xff] }
0x1198   : > { %3640 = vmatpush.msrb.mxu2 %v3620_v1  ;;  %5047 = vrcp.f32 %v3746_v2  ;;  %v3681_v3 = vpop.xlane.xlu1 %3680 }
0x1199   : > { %4608 = vmatmul.msk.f32.vlgmr.msrb.gmra.mxu2 %vm2483_vm8, %v3617_v0  ;;  %5049 = vrcp.f32 %v3681_v3 }
0x119e   : > { %v5048_v4 = vpop.eup %5047 }
0x119f   : > { %v3748_v8 = vmul.f32 %v5048_v4, %v5040_v56  ;;  %v5050_v58 = vpop.eup %5049 }
0x11a0   : > { %v3683_v14 = vmul.f32 %v5050_v58, %v5042_v31 }
0x11aa   : > { %v3750_v10 = vpop.permute.xlu0 %3749  ;;  %v3576_v24 = vpop.f32.mrf.mxu0 }
0x11ab   : > { %3770 = vmatpush.msra.mxu2 %v3750_v10 }
0x11ac   : > { %4614 = vmatmul.msk.f32.vlgmr.msra.gmra.mxu2 %vm2483_vm8, %v3748_v8 }
0x11ad   : > { %4617 = vmatpush.xpose.msk.msrb.mxu2 %vm2243_vm2, %v5061_v11 }
0x11b0   : > { %v3685_v26 = vpop.permute.xlu1 %3684 }
0x11b1   : > { %3705 = vmatpush.msrb.mxu0 %v3685_v26  ;;  %4618 = vmatpush.xpose.msk.msrb.mxu2 %vm2243_vm2, %v5062_v28 }
0x11b2   : > { %4611 = vmatmul.msk.f32.vlgmr.msrb.gmra.mxu0 %vm2483_vm8, %v3683_v14 }
0x11b3   : > { %3881 = vmatpush.msra.mxu0 %v3865_v20 }
0x11b5   : > { %4619 = vmatpush.xpose.msk.msrb.mxu2 %vm2243_vm2, %v5063_v29  ;;  %3882 = vmatpush.msra.mxu0 %v3864_v59 }
0x11b7   : > { %3883 = vmatpush.msra.mxu0 %v3863_v53 }
0x11b9   : > { %4620 = vmatpush.xpose.msk.msrb.mxu2 %vm2243_vm2, %v5064_v30  ;;  %v4982_v30 = vld [vmem:[#allocation23] ss:$0 sm:$0xff] }
0x11bd   : > { %4621 = vmatpush.xpose.msk.msrb.mxu2 %vm2243_vm2, %v5065_v33 }
0x11c1   : > { %4622 = vmatpush.xpose.msk.msrb.mxu2 %vm2243_vm2, %v5066_v35 }
0x11c5   : > { %4623 = vmatpush.xpose.msk.msrb.mxu2 %vm2243_vm2, %v5067_v5  ;;  %v4983_v5 = vld [vmem:[#allocation25] ss:$0 sm:$0xff] }
0x11c9   : > { %4624 = vmatpush.xpose.msk.msrb.mxu2 %vm2243_vm2, %v5068_v12 }
0x11cd   : > { %4625 = vmatpush.xpose.msk.msrb.mxu2 %vm2243_vm2, %v5069_v7 }
0x11d1   : > { %4626 = vmatpush.xpose.msk.msrb.mxu2 %vm2243_vm2, %v5070_v13 }
0x11d5   : > { %4627 = vmatpush.xpose.msk.msrb.mxu2 %vm2243_vm2, %v5071_v16 }
0x11d9   : > { %4628 = vmatpush.xpose.msk.msrb.mxu2 %vm2243_vm2, %v5072_v17 }
0x11dd   : > { %4629 = vmatpush.xpose.msk.msrb.mxu2 %vm2243_vm2, %v5073_v18 }
0x11e1   : > { %4630 = vmatpush.xpose.msk.msrb.mxu2 %vm2243_vm2, %v5074_v19 }
0x11e5   : > { %4631 = vmatpush.xpose.msk.msrb.mxu2 %vm2243_vm2, %v5075_v21 }
0x11e9   : > { %4632 = vmatpush.xpose.msk.msrb.mxu2 %vm2243_vm2, %v5076_v22 }
0x121c   : > { %v3642_v23 = vpop.f32.mrf.mxu2 }
0x121d   : > { %3776 = vrot.lane.b32.xlu2 %v3642_v23, %s7253_s5  ;;  %s7260_s5 = sld [smem:[#allocation95_spill]] }
0x1223   : > { %v3917_v0 = vld [vmem:[%s7260_s5 + $0x78] sm:$0xff]  ;;  %v3916_v1 = vld [vmem:[%s7260_s5 + $0x70] sm:$0xff]  ;;  %v3915_v2 = vld [vmem:[%s7260_s5 + $0x68] sm:$0xff] }
0x1224   : > { %3922 = vmatpush.msra.mxu1 %v3917_v0  ;;  %v3914_v8 = vld [vmem:[%s7260_s5 + $0x60] sm:$0xff]  ;;  %v3913_v13 = vld [vmem:[%s7260_s5 + $0x58] sm:$0xff]  ;;  %v3912_v16 = vld [vmem:[%s7260_s5 + $0x50] sm:$0xff] }
0x1225   : > { %v3911_v17 = vld [vmem:[%s7260_s5 + $0x48] sm:$0xff]  ;;  %v3910_v18 = vld [vmem:[%s7260_s5 + $0x40] sm:$0xff]  ;;  %v3909_v19 = vld [vmem:[%s7260_s5 + $0x38] sm:$0xff] }
0x1226   : > { %3923 = vmatpush.msra.mxu1 %v3916_v1  ;;  %v3908_v21 = vld [vmem:[%s7260_s5 + $0x30] sm:$0xff]  ;;  %v3907_v22 = vld [vmem:[%s7260_s5 + $0x28] sm:$0xff]  ;;  %v3906_v23 = vld [vmem:[%s7260_s5 + $0x20] sm:$0xff] }
0x1227   : > { %v3902_v34 = vld [vmem:[%s7260_s5] sm:$0xff]  ;;  %v4986_v1 = vld [vmem:[#allocation31] ss:$0 sm:$0xff] }
0x1228   : > { %3924 = vmatpush.msra.mxu1 %v3915_v2 }
0x122a   : > { %3925 = vmatpush.msra.mxu1 %v3914_v8 }
0x122c   : > { %3926 = vmatpush.msra.mxu1 %v3913_v13 }
0x122e   : > { %3927 = vmatpush.msra.mxu1 %v3912_v16 }
0x122f   : > { %v3707_v25 = vpop.f32.mrf.mxu0  ;;  %v3772_v27 = vpop.f32.mrf.mxu2 }
0x1230   : > { %3780 = vrot.lane.b32.xlu0 %v3707_v25, %s7256_s9  ;;  %3784 = vrot.lane.b32.xlu2 %v3772_v27, %s7255_s8  ;;  %v3904_v25 = vld [vmem:[%s7260_s5 + $0x10] sm:$0xff]  ;;  %v3903_v27 = vld [vmem:[%s7260_s5 + $0x8] sm:$0xff]  ;;  %s2171_s9 = scalar_lea.vmem %s7261_s6, %s6535_s3  ;;  %s7262_s8 = sld [smem:[#allocation54_spill]] }
0x1231   : > { %3928 = vmatpush.msra.mxu1 %v3911_v17  ;;  %s7131_s3 = sand.u32 1, %s5775_s10   ;;  %s4636_s6 = sshll.u32 %s6215_s15, 3 }
0x1232   : > { %s7034_s0 = sshll.u32 %s7131_s3, 3  ;;  %s5697_s15 = scalar_lea.hbm %s7263_s2, 16 }
0x1233   : > { %3929 = vmatpush.msra.mxu1 %v3910_v18  ;;  %s2150_s7 = scalar_lea.vmem [#allocation34], %s7034_s0 }
0x1235   : > { %3930 = vmatpush.msra.mxu1 %v3909_v19 }
0x1237   : > { %3931 = vmatpush.msra.mxu1 %v3908_v21 }
0x1239   : > { %3932 = vmatpush.msra.mxu1 %v3907_v22 }
0x123b   : > { %3933 = vmatpush.msra.mxu1 %v3906_v23 }
0x1277   : > { %v3777_v43 = vpop.permute.xlu2 %3776 }
0x1278   : > { %v3787_v6 = vsel %vm2456_vm7, %v3576_v24, %v3777_v43  ;;  %v3905_v24 = vld [vmem:[%s7260_s5 + $0x18] sm:$0xff]  ;;  %s4105_s5 = scalar_lea.sflag [#allocation4], %s7265_s4 }
0x1279   : > { %3934 = vmatpush.msra.mxu1 %v3905_v24 }
0x127b   : > { %3935 = vmatpush.msra.mxu1 %v3904_v25 }
0x127d   : > { %3936 = vmatpush.msra.mxu1 %v3903_v27 }
0x127f   : > { %3937 = vmatpush.msra.mxu1 %v3902_v34 }
0x128a   : > { %v3785_v45 = vpop.permute.xlu2 %3784 }
0x12a2   : > { %v3781_v44 = vpop.permute.xlu0 %3780 }
0x12a3   : > { %v3788_v46 = vsel %vm2206_vm0, %v3787_v6, %v3781_v44 }
0x12a4   : > { %v3789_v47 = vsel %vm2728_vm10, %v3788_v46, %v3785_v45 }
0x12a5   : > { %4615 = vmatmul.msk.f32.vlgmr.msra.gmra.mxu3 %vm2243_vm2, %v3789_v47  ;;  %v4985_v47 = vld [vmem:[#allocation29] ss:$0 sm:$0xff] }
0x1328   : > { %v3822_v15 = vpop.f32.mrf.mxu3 }
0x1329   : > { %v3823_v49 = vadd.f32 %v4981_v48, %v3822_v15 }
0x132b   : > { %v3825_v50 = vadd.f32 %v3823_v49, %v6929_v9  ;;  %v3862_v9 = vld [vmem:[#allocation26 + $0x20] sm:$0xff] }
0x132c   : > { %3884 = vmatpush.msra.mxu0 %v3862_v9 }
0x132d   : > { %v3828_v51 = vsel %vm2243_vm2, %v3825_v50, 0.0 }
0x132e   : > { %3829 = vadd.xlane.f32.xlu0 %v3828_v51  ;;  %3885 = vmatpush.msra.mxu0 %v3861_v60  ;;  %v4061_v51 = vld [vmem:[%s2171_s9] sm:$0xff]  ;;  %s4118_s9 = scalar_lea.hbm %s7263_s2, %s4636_s6 }
0x132f   : > { %vm4069_vm1 = vcmp.ge.s32.totalorder %v4061_v51, 0  ;;  %s4122_s3 = sshll.u32 %s4118_s9, 4  ;;  %s4123_s3 = int_to_ptr.hbm [resolvable:$true] %s4122_s3 }
0x1330   : > { %3886 = vmatpush.msra.mxu0 %v3860_v61  ;;  %s5691_s11 = sshra.s32 %s4123_s3, 4  ;;  %s5692_s11 = int_to_ptr.hbm [resolvable:$true] %s5691_s11 }
0x1331   : > { %s5693_s12 = scalar_lea.hbm %s5692_s11, 8  ;;  %p5698_p4 = scmp.lt.s32.totalorder %s5692_s11, %s7263_s2 }
0x1332   : > { %3887 = vmatpush.msra.mxu0 %v3859_v62  ;;  %p5694_p9 = scmp.ne.s32.totalorder %s5692_s11, %s5693_s12  ;;  %p5699_p7 = scmp.lt.s32.totalorder %s5697_s15, %s5693_s12 }
0x1334   : > { %3888 = vmatpush.msra.mxu0 %v3858_v63  ;;  %p5695_p12 = pnand %p5694_p9, %p6232_p5  ;;  %p5700_p8 = por %p5699_p7, %p5698_p4 }
0x1336   : > { %p5696_p0 = pneg %p5695_p12 }
0x1338   : > { %p5701_p11 = pnand %p5700_p8, %p5696_p0 }
0x13a1   : > { %v3830_v52 = vpop.xlane.xlu0 %3829 }
0x13a2   : > { %v3831_v55 = vmul.f32 %v3830_v52, %v6628_v54 }
0x13a4   : > { %v3832_v57 = vsub.f32 %v3825_v50, %v3831_v55 }
0x13a6   : > { %v3833_v56 = vmul.f32 %v3832_v57, %v3832_v57 }
0x13a8   : > { %v3834_v31 = vsel %vm2243_vm2, %v3833_v56, 0.0 }
0x13a9   : > { %3835 = vadd.xlane.f32.xlu1 %v3834_v31 }
0x141c   : > { %v3836_v3 = vpop.xlane.xlu1 %3835 }
0x141d   : > { %v3837_v4 = vmul.f32 %v3836_v3, %v6628_v54 }
0x141f   : > { %v3838_v10 = vadd.f32 1e-05, %v3837_v4  ;;  %v4987_v4 = vld [vmem:[#allocation32] ss:$0 sm:$0xff] }
0x1421   : > { %5051 = vrsqrt.f32 %v3838_v10  ;;  %vm3845_vm7 = vweird.f32 %v3838_v10 }
0x1427   : > { %v5052_v58 = vpop.eup %5051 }
0x1428   : > { %v3840_v11 = vmul.f32 %v5052_v58, %v3838_v10  ;;  %vm3846_vm0 = vweird.f32 %v5052_v58  ;;  %v4988_v10 = vld [vmem:[%s7262_s8] ss:$0 sm:$0xff]  ;;  %s4120_s8 = sshll.u32 %s2150_s7, 4  ;;  %s4121_s8 = int_to_ptr.vmem [resolvable:$true] %s4120_s8 }
0x1429   : > { %vm3847_vm8 = vmor %vm3845_vm7, %vm3846_vm0 }
0x142a   : > { %v3841_v14 = vmul.f32 %v5052_v58, %v3840_v11 }
0x142c   : > { %v3842_v26 = vmul.f32 0.5, %v3841_v14 }
0x142e   : > { %v3843_v28 = vsub.f32 1.5, %v3842_v26 }
0x1430   : > { %v3844_v29 = vmul.f32 %v5052_v58, %v3843_v28 }
0x1432   : > { %v3848_v33 = vsel %vm3847_vm8, %v5052_v58, %v3844_v29 }
0x1433   : > { %v3849_v35 = vmul.f32 %v3848_v33, %v3832_v57 }
0x1435   : > { %v3853_v12 = vmul.f32 %v4982_v30, %v3849_v35  ;;  %v5878_v30 = vmov 0.0  }
0x1436   : > { %v4634_v33 = vsel %vm4069_vm1, 1.0, %v5878_v30 }
0x1437   : > { %v3857_v7 = vadd.f32 %v4983_v5, %v3853_v12 }
0x1439   : > { %4616 = vmatmul.msk.f32.vlgmr.msra.gmra.mxu0 %vm2243_vm2, %v3857_v7 }
0x14b6   : > { %v3890_v37 = vpop.f32.mrf.mxu0 }
0x14b7   : > { %v3891_v38 = vadd.f32 %v4984_v36, %v3890_v37 }
0x14b9   : > { %v3894_v39 = vmul.f32 0.044715, %v3891_v38  ;;  %v3893_v44 = vmul.f32 0.5, %v3891_v38 }
0x14bb   : > { %v3895_v40 = vmul.f32 %v3894_v39, %v3891_v38 }
0x14bd   : > { %v3896_v41 = vmul.f32 %v3895_v40, %v3891_v38 }
0x14bf   : > { %v3897_v42 = vadd.f32 %v3896_v41, %v3891_v38 }
0x14c1   : > { %v3898_v43 = vmul.f32 0.7978846, %v3897_v42 }
0x14c3   : > { %5053 = vtanh.f32 %v3898_v43 }
0x14c9   : > { %v5054_v6 = vpop.eup %5053 }
0x14ca   : > { %v3900_v45 = vadd.f32 1.0, %v5054_v6 }
0x14cc   : > { %v3901_v46 = vmul.f32 %v3900_v45, %v3893_v44 }
0x14ce   : > { %3938 = vmatmul.f32.vlgmr.msra.gmra.mxu1 %v3901_v46 }
0x154b   : > { %v3939_v48 = vpop.f32.mrf.mxu1 }
0x154c   : > { %v3940_v15 = vadd.f32 %v4985_v47, %v3939_v48 }
0x154e   : > { %v3942_v49 = vadd.f32 %v3940_v15, %v3857_v7 }
0x1550   : > { %v3945_v50 = vsel %vm2243_vm2, %v3942_v49, 0.0 }
0x1551   : > { %3946 = vadd.xlane.f32.xlu2 %v3945_v50 }
0x1569   : > { %4063 = vperm.xlu2 %4954, %v4061_v51  }
0x15c4   : > { %v3947_v52 = vpop.xlane.xlu2 %3946 }
0x15c5   : > { %v3948_v55 = vmul.f32 %v3947_v52, %v6628_v54 }
0x15c7   : > { %v3949_v57 = vsub.f32 %v3942_v49, %v3948_v55 }
0x15c9   : > { %v3950_v56 = vmul.f32 %v3949_v57, %v3949_v57 }
0x15cb   : > { %v3951_v31 = vsel %vm2243_vm2, %v3950_v56, 0.0 }
0x15cc   : > { %3952 = vadd.xlane.f32.xlu0 %v3951_v31  ;;  %v4064_v14 = vpop.permute.xlu2 %4063 }
0x15cd   : > { %vm4065_vm15 = vcmp.eq.s32.totalorder %v6619_v32, %v4064_v14 }
0x163f   : > { %v3953_v20 = vpop.xlane.xlu0 %3952 }
0x1640   : > { %v3954_v59 = vmul.f32 %v3953_v20, %v6628_v54 }
0x1642   : > { %v3955_v53 = vadd.f32 1e-05, %v3954_v59 }
0x1644   : > { %5055 = vrsqrt.f32 %v3955_v53  ;;  %vm3962_vm13 = vweird.f32 %v3955_v53 }
0x164a   : > { %v5056_v9 = vpop.eup %5055 }
0x164b   : > { %v3957_v60 = vmul.f32 %v5056_v9, %v3955_v53  ;;  %vm3963_vm10 = vweird.f32 %v5056_v9 }
0x164c   : > { %vm3964_vm14 = vmor %vm3962_vm13, %vm3963_vm10 }
0x164d   : > { %v3958_v61 = vmul.f32 %v5056_v9, %v3957_v60 }
0x164f   : > { %v3959_v62 = vmul.f32 0.5, %v3958_v61 }
0x1651   : > { %v3960_v63 = vsub.f32 1.5, %v3959_v62 }
0x1653   : > { %v3961_v0 = vmul.f32 %v5056_v9, %v3960_v63 }
0x1655   : > { %v3965_v2 = vsel %vm3964_vm14, %v5056_v9, %v3961_v0 }
0x1656   : > { %v3966_v3 = vmul.f32 %v3965_v2, %v3949_v57 }
0x1658   : > { %v3970_v8 = vmul.f32 %v4986_v1, %v3966_v3 }
0x165a   : > { %v3974_v54 = vadd.f32 %v4987_v4, %v3970_v8 }
0x165c   : > { %4633 = vmatmul.msk.f32.vlgmr.msrb.gmra.mxu2 %vm2243_vm2, %v3974_v54  ;;  %vm4074_vm2 = vcmask 7168  }
0x165d   : > { %v4082_v5 = vsel %vm4074_vm2, %v4634_v33, 0.0 }
0x165e   : > { %v4083_v12 = vrot.slane %v4082_v5, 4 }
0x1660   : > { %v4084_v13 = vadd.f32 %v4083_v12, %v4082_v5 }
0x1662   : > { %v4085_v16 = vrot.slane %v4084_v13, 2 }
0x1664   : > { %v4086_v17 = vadd.f32 %v4085_v16, %v4084_v13 }
0x1666   : > { %v4087_v18 = vrot.slane %v4086_v17, 1 }
0x1668   : > { %v4088_v19 = vadd.f32 %v4087_v18, %v4086_v17 }
0x16df   : > { %v4047_v58 = vpop.f32.mrf.mxu2 }
0x16e0   : > { %v4048_v11 = vadd.f32 %v4988_v10, %v4047_v58 }
0x16e2   : > { %4051 = vmax.xlane.f32.xlu1 %v4048_v11  ;;  %4050 = vst [vmem:[%s2150_s7] sm:$0xff] %v4048_v11  ;;  %v4066_v26 = vsel %vm4065_vm15, %v4048_v11, 0.0 }
0x16ea   : > { %4067 = vadd.xlane.f32.xlu1 %v4066_v26 }
0x1755   : > { %v4052_v28 = vpop.xlane.xlu1 %4051 }
0x1756   : > { %v4053_v29 = vsub.f32 %v4048_v11, %v4052_v28 }
0x1758   : > { %v4054_v35 = vmul.f32 1.442695, %v4053_v29 }
0x175a   : > { %5057 = vpow2.f32 %v4054_v35 }
0x175d   : > { %v4068_v25 = vpop.xlane.xlu1 %4067 }
0x1760   : > { %v5058_v7 = vpop.eup %5057 }
0x1761   : > { %4056 = vadd.xlane.f32.xlu0 %v5058_v7 }
0x1775   : > { %4093 = vperm.xlu0 %4953, %v4088_v19  }
0x17d4   : > { %v4057_v21 = vpop.xlane.xlu0 %4056 }
0x17d5   : > { %5059 = vlog2.f32 %v4057_v21 }
0x17db   : > { %v5060_v22 = vpop.eup %5059 }
0x17dc   : > { %v4059_v23 = vmul.f32 0.6931472, %v5060_v22 }
0x17de   : > { %v4060_v24 = vadd.f32 %v4059_v23, %v4052_v28 }
0x17e0   : > { %v4072_v27 = vsub.f32 %v4060_v24, %v4068_v25 }
0x17e2   : > { %v4073_v34 = vmul.f32 %v4634_v33, %v4072_v27 }
0x17e4   : > { %v4075_v36 = vsel %vm4074_vm2, %v4073_v34, 0.0 }
0x17e5   : > { %v4076_v37 = vrot.slane %v4075_v36, 4 }
0x17e6   : > { %5704 = shalt.err (!%p5701_p11)
}
0x17e7   : > { %s7266_s0 = sld [smem:[#allocation97_spill]]  ;;  %v4077_v38 = vadd.f32 %v4076_v37, %v4075_v36  ;;  %vm4090_vm3 = vcmp.eq.s32.totalorder %v6619_v32, 1  ;;  %v4094_v43 = vpop.permute.xlu0 %4093  ;;  %vm4089_vm4 = vcmp.eq.s32.totalorder %v6619_v32, 0 }
0x17e8   : > { %4719 = dma.vmem_to_hbm [thread:$0]  (%p6232_p5), %s4121_s8, 128, %s4123_s3, %s4105_s5   ;;  %v4096_v6 = vsel %vm4090_vm3, %v4094_v43, 0.0 }
0x17e9   : > { %v4078_v39 = vrot.slane %v4077_v38, 2 }
0x17eb   : > { %v4079_v40 = vadd.f32 %v4078_v39, %v4077_v38 }
0x17ed   : > { %v4080_v41 = vrot.slane %v4079_v40, 1  ;;  %s2180_s4 = scalar_lea.vmem %s7266_s0, %s6532_s23 }
0x17ef   : > { %v4081_v42 = vadd.f32 %v4080_v41, %v4079_v40 }
0x17f1   : > { %4099 = vperm.xlu1 %4955, %v4081_v42  }
0x1863   : > { %v4100_v44 = vpop.permute.xlu1 %4099 }
0x1864   : > { %v4102_v45 = vsel %vm4089_vm4, %v4100_v44, %v4096_v6 }
0x1865   : > { %4103 = vst [vmem:[%s2180_s4] sm:$0x1] %v4102_v45 }
0x1866 PF: > { %s7267_s12 = sld [smem:[#allocation100_spill]] }
0x1867   : > { %s7268_s11 = sld [smem:[#allocation98_spill]] }
0x186c   : > { %p4826_p5 = scmp.ge.s32.totalorder %s7267_s12, 2 }
0x186d   : > { %s4137_s3 = sand.u32 1, %s7268_s11  }
0x186e   : > { %p4783_p13 = pnand %p4826_p5, %p6236_p6  ;;  %s4138_s7 = scalar_lea.sflag [#allocation4], %s4137_s3 }
0x1870   : > { %p4784_p1 = pneg %p4783_p13 }
0x1872   : > { %5766 = dma.done.wait (%p4784_p1), %s4138_s7, 128  }
0x1873   : > { %5768 = vsyncadd (%p4784_p1), %s4138_s7, 4294967168  ;;  %s7270_s0 = sld [smem:[#allocation101_spill]]  ;;  %s7273_s7 = smov %s5775_s10 }
0x1874   : > { %s7271_s1 = sld [smem:[#allocation99_spill]] }
0x1875   : > { %s7272_s11 = sld [smem:[#allocation102_spill]] }
0x1879   : > { %p145_p2 = scmp.ge.s32.totalorder %s7270_s0, 4  }
0x187a   : > { %s7274_s10 = smov %s7271_s1 }
0x187b   : > { %7275 = sst [smem:[#allocation98_spill]] %s7272_s11  ;;  %147 = sbr.rel (!%p145_p2) target bundleno = 137 (0x89), region = 464 }
0x1880   :  { %4150 = vsyncpa [#allocation3], 1 }
0x1881   :  { %4152 = vsyncpa [#allocation3 + $0x1], 1 }
0x1882   :  { %4153 = vsyncpa [#allocation6], 1 }
0x1883   :  { %4154 = vsyncpa [#allocation9], 1 }
0x1884   :  { %4155 = vsyncpa [#allocation12], 1 }
0x1885   :  { %4156 = vsyncpa [#allocation15], 1 }
0x1886   :  { %4157 = vsyncpa [#allocation18], 1 }
0x1887   :  { %4158 = vsyncpa [#allocation21], 1 }
0x1888   :  { %4159 = vsyncpa [#allocation24], 1 }
0x1889   :  { %4160 = vsyncpa [#allocation27], 1 }
0x188a   :  { %4161 = vsyncpa [#allocation30], 1 }
0x188b   :  { %4162 = vsyncpa [#allocation33], 1 }
0x188c   :  { %4163 = vsyncpa [#allocation4], 1 }
0x188d   :  { %4165 = vsyncpa [#allocation4 + $0x1], 1 }

</bundles_post_ra>
